<compile_context>
chip_gen: v7x
topology: tpu7x:2x2x1
jax: 0.10.0
libtpu: 0.0.40
codegen_flags: <defaults>
</compile_context>

<pallas_src>
import functools

import jax
import jax.numpy as jnp
from jax.experimental import pallas as pl
from jax.experimental.pallas import tpu as pltpu

FEAT = 512          # model_linear['resnet18']
CLASS_NUM = 10
LANE = 128


def _round_up(x, m):
    return (x + m - 1) // m * m


# ---------------------------------------------------------------------------
# Fused Pallas kernel
# ---------------------------------------------------------------------------

def fused_net_kernel(img_ref, wc_ref, bc_ref, wl_ref, bl_ref, out_ref, acc_ref,
                     *, rc, w, inv_hw):
    """3x3 conv (9 shifted-slice matmuls) + bias + ReLU + global-avg-pool
    + Linear head, fused.

    grid = (batch_tiles [parallel], h_chunks [arbitrary reduction, innermost])

    img_ref: (BT, H+2, W+2, Cin)  bf16 zero-padded NHWC image (resident per b)
    wc_ref:  (9, Cin, FEAT)       bf16 conv weight per tap (ky*3 + kx)
    bc_ref:  (1, FEAT)            f32 conv bias
    wl_ref:  (FEAT, CPAD)         bf16 Linear weight (transposed, lane-padded)
    bl_ref:  (1, CPAD)            f32 Linear bias (lane-padded)
    out_ref: (BT, 1, CPAD)        f32 logits (lane-padded)
    acc_ref: (BT, FEAT)           f32 pooled-feature accumulator (VMEM scratch)
    """
    h = pl.program_id(1)

    @pl.when(h == 0)
    def _():
        acc_ref[...] = jnp.zeros_like(acc_ref)

    bt, feat = acc_ref.shape
    cin = img_ref.shape[3]
    m = bt * rc * w
    r0 = h * rc                      # first output row of this chunk

    # conv-as-GEMM without HBM im2col: 9 shifted slices of the resident image,
    # each a (M, Cin) x (Cin, FEAT) matmul accumulated in f32.
    y = jnp.zeros((m, feat), jnp.float32)
    for tap in range(9):
        dy, dx = tap // 3, tap % 3
        x_tap = img_ref[:, pl.ds(r0 + dy, rc), pl.ds(dx, w), :]  # (bt,rc,w,cin)
        y = y + jnp.dot(x_tap.reshape(m, cin), wc_ref[tap],
                        preferred_element_type=jnp.float32)
    y = jnp.maximum(y + bc_ref[...], 0.0)                        # bias + ReLU (f32)

    # partial AdaptiveAvgPool2d((1,1)): accumulate the spatial sum of this chunk.
    if bt == 1:
        acc_ref[...] += jnp.sum(y, axis=0, keepdims=True)
    else:
        acc_ref[...] += jnp.sum(y.reshape(bt, rc * w, feat), axis=1)

    @pl.when(h == pl.num_programs(1) - 1)
    def _():
        # x = avgpool -> x.view(B, -1) -> Linear(x)   (lane-dense padded output)
        pooled = (acc_ref[...] * inv_hw).astype(jnp.bfloat16)    # (bt, feat) mean
        logits = (jnp.dot(pooled, wl_ref[...],
                          preferred_element_type=jnp.float32) + bl_ref[...])
        out_ref[...] = logits[:, None, :]


# ---------------------------------------------------------------------------
# Glue (parameter setup / wrapper / reference)
# ---------------------------------------------------------------------------

def init_params(key, in_ch, feat=FEAT, class_num=CLASS_NUM):
    k1, k2, k3, k4 = jax.random.split(key, 4)
    conv_w = jax.random.normal(k1, (feat, in_ch, 3, 3), jnp.float32) * (
        1.0 / jnp.sqrt(9.0 * in_ch))
    conv_b = jax.random.normal(k2, (feat,), jnp.float32) * 0.01
    lin_w = jax.random.normal(k3, (class_num, feat), jnp.float32) * (
        1.0 / jnp.sqrt(float(feat)))
    lin_b = jax.random.normal(k4, (class_num,), jnp.float32) * 0.01
    return dict(conv_w=conv_w, conv_b=conv_b, lin_w=lin_w, lin_b=lin_b)


def net_forward(x_nchw, params):
    B, Cin, H, W = x_nchw.shape
    CPAD = _round_up(CLASS_NUM, LANE)          # lane-dense Linear output

    # Raw image (plus 1-pixel halo) is the only conv input in HBM:
    # NCHW -> NHWC, zero-pad spatial by 1, cast to bf16. No im2col / K-pad here.
    x_nhwc = jnp.transpose(x_nchw, (0, 2, 3, 1))
    xp = jnp.pad(x_nhwc, ((0, 0), (1, 1), (1, 1), (0, 0))).astype(jnp.bfloat16)

    # conv weight (F, Cin, 3, 3) -> per-tap (9, Cin, F), bf16 (tap = ky*3 + kx)
    wc = jnp.transpose(params["conv_w"], (2, 3, 1, 0)).reshape(9, Cin, FEAT)
    wc = wc.astype(jnp.bfloat16)
    bc = params["conv_b"].reshape(1, FEAT).astype(jnp.float32)

    # Linear head: (class, FEAT) -> (FEAT, CPAD) bf16, bias -> (1, CPAD) f32.
    wl = jnp.pad(params["lin_w"].T,
                 ((0, 0), (0, CPAD - CLASS_NUM))).astype(jnp.bfloat16)
    bl = jnp.pad(params["lin_b"],
                 (0, CPAD - CLASS_NUM)).reshape(1, CPAD).astype(jnp.float32)

    # --- tiling, derived from this chip's VMEM capacity ----------------------
    try:
        vmem_bytes = int(pltpu.get_tpu_info().vmem_capacity_bytes)
    except Exception:  # pragma: no cover - conservative fallback (v7x size)
        vmem_bytes = 64 << 20
    y_cap = max(1 << 20, vmem_bytes // 8)       # cap on per-step f32 conv-out temp
    vmem_limit = int(min(48 << 20, vmem_bytes // 2))

    # batch tile ("parallel"): keep >= 2 grid steps so both v7x TCs get work.
    BT = 8 if (B >= 16 and B % 8 == 0) else 1
    # spatial row chunk ("arbitrary" reduction, innermost grid axis): bounds
    # the (BT*RC*W, FEAT) f32 intermediate per grid step.
    RC = max(1, min(H, y_cap // (BT * W * FEAT * 4)))
    while H % RC:
        RC -= 1
    grid = (B // BT, H // RC)

    # TODO(synk): for images too large for one padded image per batch tile to
    # sit in VMEM, tile H on the grid with explicit halo DMA instead.
    kernel = functools.partial(fused_net_kernel, rc=RC, w=W,
                               inv_hw=1.0 / float(H * W))

    out_padded = pl.pallas_call(
        kernel,
        out_shape=jax.ShapeDtypeStruct((B, 1, CPAD), jnp.float32),
        grid_spec=pltpu.PrefetchScalarGridSpec(
            num_scalar_prefetch=0,
            grid=grid,
            in_specs=[
                pl.BlockSpec((BT, H + 2, W + 2, Cin), lambda b, h: (b, 0, 0, 0)),
                pl.BlockSpec((9, Cin, FEAT), lambda b, h: (0, 0, 0)),
                pl.BlockSpec((1, FEAT), lambda b, h: (0, 0)),
                pl.BlockSpec((FEAT, CPAD), lambda b, h: (0, 0)),
                pl.BlockSpec((1, CPAD), lambda b, h: (0, 0)),
            ],
            out_specs=pl.BlockSpec((BT, 1, CPAD), lambda b, h: (b, 0, 0)),
            scratch_shapes=[pltpu.VMEM((BT, FEAT), jnp.float32)],
        ),
        compiler_params=pltpu.CompilerParams(
            dimension_semantics=("parallel", "arbitrary"),
            vmem_limit_bytes=vmem_limit),
    )(xp, wc, bc, wl, bl)

    return out_padded[:, 0, :CLASS_NUM]


def reference_forward(x_nchw, params):
    """Pure-JAX f32 reference of the same stand-in backbone + Linear head."""
    B, Cin, H, W = x_nchw.shape
    x = jnp.transpose(x_nchw, (0, 2, 3, 1))
    xp = jnp.pad(x, ((0, 0), (1, 1), (1, 1), (0, 0)))
    w = jnp.transpose(params["conv_w"], (2, 3, 1, 0))            # (3,3,Cin,F)
    y = jnp.zeros((B, H, W, FEAT), jnp.float32)
    for dy in range(3):
        for dx in range(3):
            y = y + jnp.einsum('bhwc,cf->bhwf',
                               xp[:, dy:dy + H, dx:dx + W, :], w[dy, dx])
    y = jnp.maximum(y + params["conv_b"], 0.0)
    feat = y.mean(axis=(1, 2))                                   # (B, FEAT)
    return feat @ params["lin_w"].T + params["lin_b"]


# ---------------------------------------------------------------------------
# Main
# ---------------------------------------------------------------------------

if __name__ == "__main__":
    key = jax.random.PRNGKey(0)
    k_x, k_p = jax.random.split(key)

    B, Cin, H, W = 2, 4, 16, 16
    x = jax.random.normal(k_x, (B, Cin, H, W), jnp.float32)      # NCHW input
    params = init_params(k_p, Cin)

    out = jax.block_until_ready(net_forward(x, params))
    ref = jax.block_until_ready(reference_forward(x, params))

    assert out.shape == (B, CLASS_NUM), out.shape
    assert out.dtype == jnp.float32
    assert bool(jnp.all(jnp.isfinite(out)))
    # bf16 matmul operands with f32 accumulation -> ~1e-2 relative vs f32 ref.
    assert bool(jnp.allclose(out, ref, rtol=5e-2, atol=5e-2)), (
        "max abs diff = %f" % float(jnp.max(jnp.abs(out - ref))))
    print("KERNEL_OK")
</pallas_src>

<mosaic_0001>
module attributes {stable_mosaic.version = 11 : i64} {
  func.func @fused_net_kernel(%arg0: i32, %arg1: i32, %arg2: memref<1x18x18x4xbf16, #tpu.memory_space<vmem>>, %arg3: memref<9x4x512xbf16, #tpu.memory_space<vmem>>, %arg4: memref<1x512xf32, #tpu.memory_space<vmem>>, %arg5: memref<512x128xbf16, #tpu.memory_space<vmem>>, %arg6: memref<1x128xf32, #tpu.memory_space<vmem>>, %arg7: memref<1x1x128xf32, #tpu.memory_space<vmem>>, %arg8: memref<1x512xf32, #tpu.memory_space<vmem>>) attributes {dimension_semantics = [#tpu.dimension_semantics<parallel>, #tpu.dimension_semantics<arbitrary>], iteration_bounds = array<i64: 2, 1>, scalar_prefetch = 0 : i64, scratch_operands = 1 : i64, tpu.core_type = #tpu.core_type<tc>, window_params = [{transform_indices = @transform_0, window_bounds = array<i64: 1, 18, 18, 4>}, {pipeline_mode = #tpu.pipeline_mode<synchronous>, transform_indices = @transform_1, window_bounds = array<i64: 9, 4, 512>}, {pipeline_mode = #tpu.pipeline_mode<synchronous>, transform_indices = @transform_2, window_bounds = array<i64: 1, 512>}, {pipeline_mode = #tpu.pipeline_mode<synchronous>, transform_indices = @transform_3, window_bounds = array<i64: 512, 128>}, {pipeline_mode = #tpu.pipeline_mode<synchronous>, transform_indices = @transform_4, window_bounds = array<i64: 1, 128>}, {transform_indices = @transform_5, window_bounds = array<i64: 1, 1, 128>}]} {
    %c0_i32 = arith.constant 0 : i32
    %0 = arith.cmpi eq, %arg1, %c0_i32 : i32
    %1 = arith.extui %0 : i1 to i32
    %c0_i32_0 = arith.constant 0 : i32
    %2 = arith.cmpi ne, %1, %c0_i32_0 : i32
    scf.if %2 {
      %cst_72 = arith.constant 0.000000e+00 : f32
      %90 = vector.broadcast %cst_72 : f32 to vector<1x512xf32>
      %c0_73 = arith.constant 0 : index
      %c0_74 = arith.constant 0 : index
      %91 = vector.load %arg8[%c0_73, %c0_74] : memref<1x512xf32, #tpu.memory_space<vmem>>, vector<1x512xf32>
      tpu.vector_store %arg8[%c0_73, %c0_74], %90 {strides = array<i32>} : memref<1x512xf32, #tpu.memory_space<vmem>>, vector<1x512xf32>,
    } else {
    }
    %c16_i32 = arith.constant 16 : i32
    %3 = arith.muli %arg1, %c16_i32 : i32
    %cst = arith.constant 0.000000e+00 : f32
    %4 = vector.broadcast %cst : f32 to vector<256x512xf32>
    %c0_i32_1 = arith.constant 0 : i32
    %5 = arith.addi %3, %c0_i32_1 : i32
    %c0 = arith.constant 0 : index
    %6 = arith.index_cast %5 : i32 to index
    %c0_2 = arith.constant 0 : index
    %c0_3 = arith.constant 0 : index
    %7 = vector.load %arg2[%c0, %6, %c0_2, %c0_3] : memref<1x18x18x4xbf16, #tpu.memory_space<vmem>>, vector<1x16x16x4xbf16>
    %8 = vector.shape_cast %7 : vector<1x16x16x4xbf16> to vector<256x4xbf16>
    %c0_4 = arith.constant 0 : index
    %c0_5 = arith.constant 0 : index
    %c0_6 = arith.constant 0 : index
    %9 = vector.load %arg3[%c0_4, %c0_5, %c0_6] : memref<9x4x512xbf16, #tpu.memory_space<vmem>>, vector<1x4x512xbf16>
    %10 = vector.shape_cast %9 : vector<1x4x512xbf16> to vector<4x512xbf16>
    %cst_7 = arith.constant dense<0.000000e+00> : vector<256x512xf32>
    %11 = tpu.matmul %8, %10, %cst_7 {dimension_numbers = #tpu.dot_dimension_numbers<[1], [0], [0], [1], [0, 0, 1, 1], [], []>} : vector<256x4xbf16>, vector<4x512xbf16>, vector<256x512xf32> -> vector<256x512xf32>
    %12 = arith.addf %4, %11 : vector<256x512xf32>
    %c0_i32_8 = arith.constant 0 : i32
    %13 = arith.addi %3, %c0_i32_8 : i32
    %c0_9 = arith.constant 0 : index
    %14 = arith.index_cast %13 : i32 to index
    %c1 = arith.constant 1 : index
    %c0_10 = arith.constant 0 : index
    %15 = vector.load %arg2[%c0_9, %14, %c1, %c0_10] : memref<1x18x18x4xbf16, #tpu.memory_space<vmem>>, vector<1x16x16x4xbf16>
    %16 = vector.shape_cast %15 : vector<1x16x16x4xbf16> to vector<256x4xbf16>
    %c1_11 = arith.constant 1 : index
    %c0_12 = arith.constant 0 : index
    %c0_13 = arith.constant 0 : index
    %17 = vector.load %arg3[%c1_11, %c0_12, %c0_13] : memref<9x4x512xbf16, #tpu.memory_space<vmem>>, vector<1x4x512xbf16>
    %18 = vector.shape_cast %17 : vector<1x4x512xbf16> to vector<4x512xbf16>
    %cst_14 = arith.constant dense<0.000000e+00> : vector<256x512xf32>
    %19 = tpu.matmul %16, %18, %cst_14 {dimension_numbers = #tpu.dot_dimension_numbers<[1], [0], [0], [1], [0, 0, 1, 1], [], []>} : vector<256x4xbf16>, vector<4x512xbf16>, vector<256x512xf32> -> vector<256x512xf32>
    %20 = arith.addf %12, %19 : vector<256x512xf32>
    %c0_i32_15 = arith.constant 0 : i32
    %21 = arith.addi %3, %c0_i32_15 : i32
    %c0_16 = arith.constant 0 : index
    %22 = arith.index_cast %21 : i32 to index
    %c2 = arith.constant 2 : index
    %c0_17 = arith.constant 0 : index
    %23 = vector.load %arg2[%c0_16, %22, %c2, %c0_17] : memref<1x18x18x4xbf16, #tpu.memory_space<vmem>>, vector<1x16x16x4xbf16>
    %24 = vector.shape_cast %23 : vector<1x16x16x4xbf16> to vector<256x4xbf16>
    %c2_18 = arith.constant 2 : index
    %c0_19 = arith.constant 0 : index
    %c0_20 = arith.constant 0 : index
    %25 = vector.load %arg3[%c2_18, %c0_19, %c0_20] : memref<9x4x512xbf16, #tpu.memory_space<vmem>>, vector<1x4x512xbf16>
    %26 = vector.shape_cast %25 : vector<1x4x512xbf16> to vector<4x512xbf16>
    %cst_21 = arith.constant dense<0.000000e+00> : vector<256x512xf32>
    %27 = tpu.matmul %24, %26, %cst_21 {dimension_numbers = #tpu.dot_dimension_numbers<[1], [0], [0], [1], [0, 0, 1, 1], [], []>} : vector<256x4xbf16>, vector<4x512xbf16>, vector<256x512xf32> -> vector<256x512xf32>
    %28 = arith.addf %20, %27 : vector<256x512xf32>
    %c1_i32 = arith.constant 1 : i32
    %29 = arith.addi %3, %c1_i32 : i32
    %c0_22 = arith.constant 0 : index
    %30 = arith.index_cast %29 : i32 to index
    %c0_23 = arith.constant 0 : index
    %c0_24 = arith.constant 0 : index
    %31 = vector.load %arg2[%c0_22, %30, %c0_23, %c0_24] : memref<1x18x18x4xbf16, #tpu.memory_space<vmem>>, vector<1x16x16x4xbf16>
    %32 = vector.shape_cast %31 : vector<1x16x16x4xbf16> to vector<256x4xbf16>
    %c3 = arith.constant 3 : index
    %c0_25 = arith.constant 0 : index
    %c0_26 = arith.constant 0 : index
    %33 = vector.load %arg3[%c3, %c0_25, %c0_26] : memref<9x4x512xbf16, #tpu.memory_space<vmem>>, vector<1x4x512xbf16>
    %34 = vector.shape_cast %33 : vector<1x4x512xbf16> to vector<4x512xbf16>
    %cst_27 = arith.constant dense<0.000000e+00> : vector<256x512xf32>
    %35 = tpu.matmul %32, %34, %cst_27 {dimension_numbers = #tpu.dot_dimension_numbers<[1], [0], [0], [1], [0, 0, 1, 1], [], []>} : vector<256x4xbf16>, vector<4x512xbf16>, vector<256x512xf32> -> vector<256x512xf32>
    %36 = arith.addf %28, %35 : vector<256x512xf32>
    %c1_i32_28 = arith.constant 1 : i32
    %37 = arith.addi %3, %c1_i32_28 : i32
    %c0_29 = arith.constant 0 : index
    %38 = arith.index_cast %37 : i32 to index
    %c1_30 = arith.constant 1 : index
    %c0_31 = arith.constant 0 : index
    %39 = vector.load %arg2[%c0_29, %38, %c1_30, %c0_31] : memref<1x18x18x4xbf16, #tpu.memory_space<vmem>>, vector<1x16x16x4xbf16>
    %40 = vector.shape_cast %39 : vector<1x16x16x4xbf16> to vector<256x4xbf16>
    %c4 = arith.constant 4 : index
    %c0_32 = arith.constant 0 : index
    %c0_33 = arith.constant 0 : index
    %41 = vector.load %arg3[%c4, %c0_32, %c0_33] : memref<9x4x512xbf16, #tpu.memory_space<vmem>>, vector<1x4x512xbf16>
    %42 = vector.shape_cast %41 : vector<1x4x512xbf16> to vector<4x512xbf16>
    %cst_34 = arith.constant dense<0.000000e+00> : vector<256x512xf32>
    %43 = tpu.matmul %40, %42, %cst_34 {dimension_numbers = #tpu.dot_dimension_numbers<[1], [0], [0], [1], [0, 0, 1, 1], [], []>} : vector<256x4xbf16>, vector<4x512xbf16>, vector<256x512xf32> -> vector<256x512xf32>
    %44 = arith.addf %36, %43 : vector<256x512xf32>
    %c1_i32_35 = arith.constant 1 : i32
    %45 = arith.addi %3, %c1_i32_35 : i32
    %c0_36 = arith.constant 0 : index
    %46 = arith.index_cast %45 : i32 to index
    %c2_37 = arith.constant 2 : index
    %c0_38 = arith.constant 0 : index
    %47 = vector.load %arg2[%c0_36, %46, %c2_37, %c0_38] : memref<1x18x18x4xbf16, #tpu.memory_space<vmem>>, vector<1x16x16x4xbf16>
    %48 = vector.shape_cast %47 : vector<1x16x16x4xbf16> to vector<256x4xbf16>
    %c5 = arith.constant 5 : index
    %c0_39 = arith.constant 0 : index
    %c0_40 = arith.constant 0 : index
    %49 = vector.load %arg3[%c5, %c0_39, %c0_40] : memref<9x4x512xbf16, #tpu.memory_space<vmem>>, vector<1x4x512xbf16>
    %50 = vector.shape_cast %49 : vector<1x4x512xbf16> to vector<4x512xbf16>
    %cst_41 = arith.constant dense<0.000000e+00> : vector<256x512xf32>
    %51 = tpu.matmul %48, %50, %cst_41 {dimension_numbers = #tpu.dot_dimension_numbers<[1], [0], [0], [1], [0, 0, 1, 1], [], []>} : vector<256x4xbf16>, vector<4x512xbf16>, vector<256x512xf32> -> vector<256x512xf32>
    %52 = arith.addf %44, %51 : vector<256x512xf32>
    %c2_i32 = arith.constant 2 : i32
    %53 = arith.addi %3, %c2_i32 : i32
    %c0_42 = arith.constant 0 : index
    %54 = arith.index_cast %53 : i32 to index
    %c0_43 = arith.constant 0 : index
    %c0_44 = arith.constant 0 : index
    %55 = vector.load %arg2[%c0_42, %54, %c0_43, %c0_44] : memref<1x18x18x4xbf16, #tpu.memory_space<vmem>>, vector<1x16x16x4xbf16>
    %56 = vector.shape_cast %55 : vector<1x16x16x4xbf16> to vector<256x4xbf16>
    %c6 = arith.constant 6 : index
    %c0_45 = arith.constant 0 : index
    %c0_46 = arith.constant 0 : index
    %57 = vector.load %arg3[%c6, %c0_45, %c0_46] : memref<9x4x512xbf16, #tpu.memory_space<vmem>>, vector<1x4x512xbf16>
    %58 = vector.shape_cast %57 : vector<1x4x512xbf16> to vector<4x512xbf16>
    %cst_47 = arith.constant dense<0.000000e+00> : vector<256x512xf32>
    %59 = tpu.matmul %56, %58, %cst_47 {dimension_numbers = #tpu.dot_dimension_numbers<[1], [0], [0], [1], [0, 0, 1, 1], [], []>} : vector<256x4xbf16>, vector<4x512xbf16>, vector<256x512xf32> -> vector<256x512xf32>
    %60 = arith.addf %52, %59 : vector<256x512xf32>
    %c2_i32_48 = arith.constant 2 : i32
    %61 = arith.addi %3, %c2_i32_48 : i32
    %c0_49 = arith.constant 0 : index
    %62 = arith.index_cast %61 : i32 to index
    %c1_50 = arith.constant 1 : index
    %c0_51 = arith.constant 0 : index
    %63 = vector.load %arg2[%c0_49, %62, %c1_50, %c0_51] : memref<1x18x18x4xbf16, #tpu.memory_space<vmem>>, vector<1x16x16x4xbf16>
    %64 = vector.shape_cast %63 : vector<1x16x16x4xbf16> to vector<256x4xbf16>
    %c7 = arith.constant 7 : index
    %c0_52 = arith.constant 0 : index
    %c0_53 = arith.constant 0 : index
    %65 = vector.load %arg3[%c7, %c0_52, %c0_53] : memref<9x4x512xbf16, #tpu.memory_space<vmem>>, vector<1x4x512xbf16>
    %66 = vector.shape_cast %65 : vector<1x4x512xbf16> to vector<4x512xbf16>
    %cst_54 = arith.constant dense<0.000000e+00> : vector<256x512xf32>
    %67 = tpu.matmul %64, %66, %cst_54 {dimension_numbers = #tpu.dot_dimension_numbers<[1], [0], [0], [1], [0, 0, 1, 1], [], []>} : vector<256x4xbf16>, vector<4x512xbf16>, vector<256x512xf32> -> vector<256x512xf32>
    %68 = arith.addf %60, %67 : vector<256x512xf32>
    %c2_i32_55 = arith.constant 2 : i32
    %69 = arith.addi %3, %c2_i32_55 : i32
    %c0_56 = arith.constant 0 : index
    %70 = arith.index_cast %69 : i32 to index
    %c2_57 = arith.constant 2 : index
    %c0_58 = arith.constant 0 : index
    %71 = vector.load %arg2[%c0_56, %70, %c2_57, %c0_58] : memref<1x18x18x4xbf16, #tpu.memory_space<vmem>>, vector<1x16x16x4xbf16>
    %72 = vector.shape_cast %71 : vector<1x16x16x4xbf16> to vector<256x4xbf16>
    %c8 = arith.constant 8 : index
    %c0_59 = arith.constant 0 : index
    %c0_60 = arith.constant 0 : index
    %73 = vector.load %arg3[%c8, %c0_59, %c0_60] : memref<9x4x512xbf16, #tpu.memory_space<vmem>>, vector<1x4x512xbf16>
    %74 = vector.shape_cast %73 : vector<1x4x512xbf16> to vector<4x512xbf16>
    %cst_61 = arith.constant dense<0.000000e+00> : vector<256x512xf32>
    %75 = tpu.matmul %72, %74, %cst_61 {dimension_numbers = #tpu.dot_dimension_numbers<[1], [0], [0], [1], [0, 0, 1, 1], [], []>} : vector<256x4xbf16>, vector<4x512xbf16>, vector<256x512xf32> -> vector<256x512xf32>
    %76 = arith.addf %68, %75 : vector<256x512xf32>
    %c0_62 = arith.constant 0 : index
    %c0_63 = arith.constant 0 : index
    %77 = vector.load %arg4[%c0_62, %c0_63] : memref<1x512xf32, #tpu.memory_space<vmem>>, vector<1x512xf32>
    %78 = vector.broadcast %77 : vector<1x512xf32> to vector<256x512xf32>
    %79 = arith.addf %76, %78 : vector<256x512xf32>
    %cst_64 = arith.constant 0.000000e+00 : f32
    %80 = vector.broadcast %cst_64 : f32 to vector<256x512xf32>
    %81 = arith.maximumf %79, %80 : vector<256x512xf32>
    %c0_65 = arith.constant 0 : index
    %c0_66 = arith.constant 0 : index
    %82 = vector.load %arg8[%c0_65, %c0_66] : memref<1x512xf32, #tpu.memory_space<vmem>>, vector<1x512xf32>
    %cst_67 = arith.constant dense<0.000000e+00> : vector<512xf32>
    %83 = vector.multi_reduction <add>, %81, %cst_67 [0] : vector<256x512xf32> to vector<512xf32>
    %84 = vector.shape_cast %83 : vector<512xf32> to vector<1x512xf32>
    %85 = arith.addf %82, %84 : vector<1x512xf32>
    %c0_68 = arith.constant 0 : index
    %c0_69 = arith.constant 0 : index
    %86 = vector.load %arg8[%c0_68, %c0_69] : memref<1x512xf32, #tpu.memory_space<vmem>>, vector<1x512xf32>
    tpu.vector_store %arg8[%c0_68, %c0_69], %85 {strides = array<i32>} : memref<1x512xf32, #tpu.memory_space<vmem>>, vector<1x512xf32>,
    %c0_i32_70 = arith.constant 0 : i32
    %87 = arith.cmpi eq, %arg1, %c0_i32_70 : i32
    %88 = arith.extui %87 : i1 to i32
    %c0_i32_71 = arith.constant 0 : i32
    %89 = arith.cmpi ne, %88, %c0_i32_71 : i32
    scf.if %89 {
      %c0_72 = arith.constant 0 : index
      %c0_73 = arith.constant 0 : index
      %90 = vector.load %arg8[%c0_72, %c0_73] : memref<1x512xf32, #tpu.memory_space<vmem>>, vector<1x512xf32>
      %cst_74 = arith.constant 3.906250e-03 : f32
      %91 = vector.broadcast %cst_74 : f32 to vector<1x512xf32>
      %92 = arith.mulf %90, %91 : vector<1x512xf32>
      %93 = arith.truncf %92 : vector<1x512xf32> to vector<1x512xbf16>
      %c0_75 = arith.constant 0 : index
      %c0_76 = arith.constant 0 : index
      %94 = vector.load %arg5[%c0_75, %c0_76] : memref<512x128xbf16, #tpu.memory_space<vmem>>, vector<512x128xbf16>
      %cst_77 = arith.constant dense<0.000000e+00> : vector<1x128xf32>
      %95 = tpu.matmul %93, %94, %cst_77 {dimension_numbers = #tpu.dot_dimension_numbers<[1], [0], [0], [1], [0, 0, 1, 1], [], []>} : vector<1x512xbf16>, vector<512x128xbf16>, vector<1x128xf32> -> vector<1x128xf32>
      %c0_78 = arith.constant 0 : index
      %c0_79 = arith.constant 0 : index
      %96 = vector.load %arg6[%c0_78, %c0_79] : memref<1x128xf32, #tpu.memory_space<vmem>>, vector<1x128xf32>
      %97 = arith.addf %95, %96 : vector<1x128xf32>
      %98 = vector.shape_cast %97 : vector<1x128xf32> to vector<1x1x128xf32>
      %c0_80 = arith.constant 0 : index
      %c0_81 = arith.constant 0 : index
      %c0_82 = arith.constant 0 : index
      %99 = vector.load %arg7[%c0_80, %c0_81, %c0_82] : memref<1x1x128xf32, #tpu.memory_space<vmem>>, vector<1x1x128xf32>
      tpu.vector_store %arg7[%c0_80, %c0_81, %c0_82], %98 {strides = array<i32>} : memref<1x1x128xf32, #tpu.memory_space<vmem>>, vector<1x1x128xf32>,
    } else {
    }
    return
  }
  func.func @transform_0(%arg0: i32, %arg1: i32) -> (i32, i32, i32, i32) {
    %c0_i32 = arith.constant 0 : i32
    %c0_i32_0 = arith.constant 0 : i32
    %c0_i32_1 = arith.constant 0 : i32
    %c0_i32_2 = arith.constant 0 : i32
    return %arg0, %c0_i32, %c0_i32_0, %c0_i32_1 : i32, i32, i32, i32
  }
  func.func @transform_1(%arg0: i32, %arg1: i32) -> (i32, i32, i32) {
    %c0_i32 = arith.constant 0 : i32
    %c0_i32_0 = arith.constant 0 : i32
    %c0_i32_1 = arith.constant 0 : i32
    %c0_i32_2 = arith.constant 0 : i32
    return %c0_i32, %c0_i32_0, %c0_i32_1 : i32, i32, i32
  }
  func.func @transform_2(%arg0: i32, %arg1: i32) -> (i32, i32) {
    %c0_i32 = arith.constant 0 : i32
    %c0_i32_0 = arith.constant 0 : i32
    %c0_i32_1 = arith.constant 0 : i32
    return %c0_i32, %c0_i32_0 : i32, i32
  }
  func.func @transform_3(%arg0: i32, %arg1: i32) -> (i32, i32) {
    %c0_i32 = arith.constant 0 : i32
    %c0_i32_0 = arith.constant 0 : i32
    %c0_i32_1 = arith.constant 0 : i32
    return %c0_i32, %c0_i32_0 : i32, i32
  }
  func.func @transform_4(%arg0: i32, %arg1: i32) -> (i32, i32) {
    %c0_i32 = arith.constant 0 : i32
    %c0_i32_0 = arith.constant 0 : i32
    %c0_i32_1 = arith.constant 0 : i32
    return %c0_i32, %c0_i32_0 : i32, i32
  }
  func.func @transform_5(%arg0: i32, %arg1: i32) -> (i32, i32, i32) {
    %c0_i32 = arith.constant 0 : i32
    %c0_i32_0 = arith.constant 0 : i32
    %c0_i32_1 = arith.constant 0 : i32
    return %arg0, %c0_i32, %c0_i32_0 : i32, i32, i32
  }
}

</mosaic_0001>

<bundles_post_ra>
// kernel: tpu_custom_call.1
= control target key start
LH: loop header
LB: loop body
LE: loop exit
PB: predicated region body
PF: predicated region fallthrough
CT: control target
= control target key end

     0   :  { %10 = vsyncpa [#allocation4], 0  ;;  %s12965_s0 = inlined_call_operand.vmem [shape: bf16[2,18,18,4], index: 0, kind: input, shape index: {}]   ;;  %s12966_s1 = inlined_call_operand.vmem [shape: bf16[9,4,512], index: 1, kind: input, shape index: {}]   ;;  %s12967_s2 = inlined_call_operand.vmem [shape: f32[1,512], index: 2, kind: input, shape index: {}]   ;;  %s12968_s3 = inlined_call_operand.vmem [shape: bf16[512,128], index: 3, kind: input, shape index: {}]   ;;  %s12969_s4 = inlined_call_operand.vmem [shape: f32[1,128], index: 4, kind: input, shape index: {}]   ;;  %s12970_s5 = inlined_call_operand.hbm [shape: f32[2,1,128], index: 5, kind: output, shape index: {}]  }
   0x1   :  { %12 = vsyncpa [#allocation4 + $0x1], 0  ;;  %s10920_s18 = smov 0   ;;  %s10922_s19 = smov 0  }
   0x2   :  { %s10924_s20 = smov 0   ;;  %s10926_s21 = smov 0  }
   0x3   :  { %s10928_s22 = smov 0   ;;  %s10930_s23 = smov 0  }
   0x4 LB: > { %s8781_s24 = sadd.s32 4294967295, %s10883_s23   ;;  %s8782_s25 = sadd.s32 4294967294, %s10883_s23   ;;  %s10883_s23 = sphi %s10930_s23, %s18_s23   ;;  %s10879_s22 = sphi %s10928_s22, %s12983_s22   ;;  %s10875_s21 = sphi %s10926_s21, %s12982_s21   ;;  %s10871_s20 = sphi %s10924_s20, %s12981_s20   ;;  %s10867_s19 = sphi %s10922_s19, %s12980_s19   ;;  %s10863_s18 = sphi %s10920_s18, %s12979_s18  }
   0x5   : > { %s30_s26 = sadd.s32 1, %s10879_s22  ;;  %s147_s27 = sadd.s32 1, %s10871_s20 }
   0x6   : > { %p32_p0 = scmp.ge.s32.totalorder %s30_s26, 2  ;;  %p157_p1 = scmp.ne.s32.totalorder %s10871_s20, %s10867_s19 }
   0x7   : > { %p158_p2 = scmp.eq.s32.totalorder %s8781_s24, 1  ;;  %p163_p3 = scmp.ne.s32.totalorder %s10867_s19, %s10863_s18 }
   0x8   : > { %s12985_s26 = smov (%p32_p0, %s30_s26), 0  ;;  %p164_p5 = scmp.eq.s32.totalorder %s8782_s25, 1 }
   0x9   : > { %p10960_p4 = por %p158_p2, %p157_p1  ;;  %s144_s29 = ssub.s32 %s10879_s22, %s12985_s26 }
   0xa   : > { %p8785_p6 = scmp.ge.s32.totalorder %s10883_s23, 1  ;;  %p145_p7 = scmp.eq.s32.totalorder %s144_s29, 0 }
   0xb   : > { %p10967_p8 = por %p164_p5, %p163_p3  ;;  %p202_p9 = scmp.lt.s32.totalorder %s10883_s23, 3 }
   0xc   : > { %s10973_s6 = scalar_select %p145_p7, %s10871_s20, %s147_s27  }
   0xd   : > { %p203_p10 = pnand %p8785_p6, %p202_p9 }
   0xe   : > { %v239_v0 = vlaneseq (!%p203_p10)  ;;  %v8787_v1 = vld [vmem:[%s12966_s1 + $0x8] sm:$0xff] (!%p203_p10)  ;;  %v10885_v2 = vmov (!%p203_p10), 1983009808   ;;  %v280_v4 = vld [vmem:[%s12966_s1] sm:$0xff] (!%p203_p10)  ;;  %p229_p11 = scmp.lt.s32.totalorder (!%p203_p10), %s10875_s21, 1  ;;  %v10886_v6 = vmov (!%p203_p10), 0  }
   0xf   : > { %206 = sbr.rel (%p203_p10) target bundleno = 1675 (0x68b), region = 40  ;;  %v737_v3 = vunpack.c.l.s4 (!%p203_p10), %v10885_v2  ;;  %846 = vmatprep.mubr.bf16.mxu0 (!%p203_p10), %v10886_v6  ;;  %1039 = vmatprep.mubr.bf16.mxu1 (!%p203_p10), %v10886_v6  ;;  %v735_v8 = vcombine.high (!%p203_p10), %v8787_v1, %v8787_v1  ;;  %v1281_v9 = vcombine.high (!%p203_p10), %v280_v4, %v280_v4  ;;  %vm297_vm0 = vsmask.f32 (!%p203_p10), 3328  ;;  %s227_s29 = sand.u32 (!%p203_p10), 1, %s10867_s19  }
  0x10   : > { %v10983_v5 = vshrl.u32 (!%p203_p10), %v239_v0, 7  ;;  %vm298_vm1 = vsmask.f32 (!%p203_p10), 7440  ;;  %vm801_vm2 = vcmask (!%p203_p10), 1041408   ;;  %vm752_vm3 = vcmask (!%p203_p10), 31744   ;;  %s9581_s9 = sshll.u32 (!%p203_p10), %s10875_s21, 4 }
  0x11   : > { %v738_v7 = vunpack.c.0.s8 (!%p203_p10), %v737_v3  ;;  %vm11021_vm4 = vmor (!%p203_p10), %vm297_vm0, %vm298_vm1  ;;  %vm1840_vm5 = vcmask (!%p203_p10), 1042432   ;;  %vm1841_vm6 = vcmask (!%p203_p10), 1046532   ;;  %vm12757_vm8 = vcmp.lt.s32.totalorder (!%p203_p10), %v239_v0, 512  ;;  %s228_s10 = scalar_lea.vmem (!%p203_p10), [#allocation3], %s227_s29  ;;  %s12918_s14 = scalar_lea.hbm (!%p203_p10), %s12970_s5, %s9581_s9 }
  0x12   : > { %vm11501_vm7 = vmor (!%p203_p10), %vm1840_vm5, %vm1841_vm6 }
  0x13   : > { %v10989_v10 = vsub.s32 (!%p203_p10), %v738_v7, %v10983_v5 }
  0x15   : > { %v742_v11 = vrot.slane (!%p203_p10), %v8787_v1, %v10989_v10  ;;  %v749_v12 = vrot.slane (!%p203_p10), %v735_v8, %v10989_v10  ;;  %v1288_v13 = vrot.slane (!%p203_p10), %v280_v4, %v10989_v10  ;;  %v10995_v14 = vrot.slane (!%p203_p10), %v1281_v9, %v10989_v10 }
  0x16   : > { %s230_s11 = scalar_select %p229_p11, %s10875_s21, 1 }
  0x17   : > { %v750_v18 = vcombine.high %v742_v11, %v742_v11  ;;  %v751_v19 = vcombine.high %v749_v12, %v749_v12  ;;  %v803_v20 = vsel %vm801_vm2, %v742_v11, 0  ;;  %v809_v21 = vsel %vm801_vm2, %v749_v12, 0  ;;  %s10889_s21 = smov [#allocation3]  }
  0x18   : > { %s10652_s12 = smul.u32 216, %s230_s11  ;;  %v1296_v23 = vcombine.high %v1288_v13, %v1288_v13  ;;  %v1297_v24 = vcombine.high %v10995_v14, %v10995_v14  ;;  %v1347_v55 = vsel %vm801_vm2, %v1288_v13, 0  ;;  %v1353_v8 = vsel %vm801_vm2, %v10995_v14, 0  ;;  %s8708_s11 = sshll.u32 %s228_s10, 4  ;;  %s12920_s11 = int_to_ptr.vmem [resolvable:$true] %s8708_s11 }
  0x19   : > { %8804 = vmatprep.subr.msk.bf16.mxu0 %vm801_vm2, %v750_v18  ;;  %8821 = vmatprep.subr.msk.bf16.mxu1 %vm801_vm2, %v751_v19  ;;  %s10805_s16 = scalar_lea.vmem %s12920_s11, 16  ;;  %s10809_s17 = sshll.u32 %s10889_s21, 4  ;;  %s10810_s17 = int_to_ptr.vmem [resolvable:$false] %s10809_s17 }
  0x1a   : > { %s11000_s15 = scalar_lea.vmem %s12965_s0, %s10652_s12  ;;  %815 = vmatpush1.bf16.msra.mxu0 %v803_v20  ;;  %1008 = vmatpush1.bf16.msra.mxu1 %v809_v21  ;;  %p10806_p12 = scmp.ne.s32.totalorder %s12920_s11, %s10805_s16 }
  0x1b   : > { %v248_v15 = vld [vmem:[%s11000_s15] sm:$0xf]  ;;  %v249_v16 = vld [vmem:[%s11000_s15 + $0x4] sm:$0xf]  ;;  %v281_v17 = vld [vmem:[%s11000_s15 + $0x8] sm:$0x1]  ;;  %8854 = vmatprep.subr.msk.bf16.mxu0 %vm801_vm2, %v1296_v23  ;;  %8871 = vmatprep.subr.msk.bf16.mxu1 %vm801_vm2, %v1297_v24  ;;  %p10812_p1 = scmp.lt.s32.totalorder %s12920_s11, %s10810_s17 }
  0x1c   : > { %v250_v22 = vld [vmem:[%s11000_s15 + $0xc] sm:$0xf]  ;;  %v301_v25 = vshrl.u32 %v248_v15, 16  ;;  %v304_v26 = vshll.u32 %v248_v15, 16  ;;  %v251_v27 = vld [vmem:[%s11000_s15 + $0x10] sm:$0xf]  ;;  %p10807_p13 = pnand %p10806_p12, %p10960_p4 }
  0x1d   : > { %v310_v28 = vshll.u32 %v249_v16, 16  ;;  %v314_v29 = vshrl.u32 %v249_v16, 16  ;;  %v320_v30 = vshll.u32 %v281_v17, 16  ;;  %v282_v31 = vld [vmem:[%s11000_s15 + $0x14] sm:$0x1]  ;;  %v325_v34 = vshrl.u32 %v250_v22, 16 }
  0x1e   : > { %v303_v32 = vrot.slane %v301_v25, 4  ;;  %v306_v33 = vrot.slane %v304_v26, 5  ;;  %v11015_v35 = vld [vmem:[%s11000_s15 + $0x18] sm:$0xf]  ;;  %v328_v39 = vshll.u32 %v250_v22, 16  ;;  %v334_v42 = vshll.u32 %v251_v27, 16  ;;  %p10808_p0 = pneg %p10807_p13 }
  0x1f   : > { %v312_v36 = vrot.slane %v310_v28, 5  ;;  %v316_v37 = vrot.slane %v314_v29, 4  ;;  %v322_v38 = vrot.slane %v320_v30, 5  ;;  %v327_v41 = vrot.slane %v325_v34, 4  ;;  %v11026_v48 = vld [vmem:[%s11000_s15 + $0x1c] sm:$0xf] }
  0x20   : > { %v307_v40 = vor.u32 %v306_v33, %v303_v32  ;;  %v338_v43 = vshrl.u32 %v251_v27, 16  ;;  %v330_v46 = vrot.slane %v328_v39, 5  ;;  %v344_v47 = vshll.u32 %v282_v31, 16  ;;  %v283_v60 = vld [vmem:[%s11000_s15 + $0x20] sm:$0x1]  ;;  %s10811_s24 = scalar_lea.vmem %s10810_s17, 32 }
  0x21   : > { %v317_v45 = vor.u32 %v316_v37, %v312_v36  ;;  %v349_v49 = vshrl.u32 %v11015_v35, 16  ;;  %v336_v51 = vrot.slane %v334_v42, 5  ;;  %v352_v53 = vshll.u32 %v11015_v35, 16  ;;  %v11039_v4 = vld [vmem:[%s11000_s15 + $0x24] sm:$0xf]  ;;  %p10813_p2 = scmp.lt.s32.totalorder %s10811_s24, %s10805_s16 }
  0x22   : > { %v308_v50 = vrot.slane %v307_v40, 4  ;;  %v340_v52 = vrot.slane %v338_v43, 4  ;;  %v331_v56 = vor.u32 %v330_v46, %v327_v41  ;;  %v358_v62 = vshll.u32 %v11026_v48, 16  ;;  %v11044_v12 = vld [vmem:[%s11000_s15 + $0x28] sm:$0xf] }
  0x23   : > { %v318_v54 = vrot.slane %v317_v45, 4  ;;  %v351_v57 = vrot.slane %v349_v49, 4  ;;  %v354_v61 = vrot.slane %v352_v53, 5  ;;  %v346_v2 = vrot.slane %v344_v47, 5  ;;  %v11059_v27 = vld [vmem:[%s11000_s15 + $0x30] sm:$0xf]  ;;  %p10814_p3 = por %p10813_p2, %p10812_p1 }
  0x24   : > { %v313_v58 = vsel %vm11021_vm4, %v308_v50, %v312_v36  ;;  %v341_v59 = vor.u32 %v340_v52, %v336_v51  ;;  %v332_v1 = vrot.slane %v331_v56, 4  ;;  %v362_v3 = vshrl.u32 %v11026_v48, 16  ;;  %v11062_v32 = vld [vmem:[%s11000_s15 + $0x34] sm:$0xf]  ;;  %v284_v33 = vld [vmem:[%s11000_s15 + $0x2c] sm:$0x1] }
  0x25   : > { %v323_v63 = vsel %vm11021_vm4, %v318_v54, %v322_v38  ;;  %v360_v11 = vrot.slane %v358_v62, 5  ;;  %v368_v15 = vshll.u32 %v283_v60, 16  ;;  %v355_v17 = vor.u32 %v354_v61, %v351_v57  ;;  %v285_v54 = vld [vmem:[%s11000_s15 + $0x38] sm:$0x1]  ;;  %v11082_v56 = vld [vmem:[%s11000_s15 + $0x40] sm:$0xf]  ;;  %p10815_p5 = pnand %p10814_p3, %p10808_p0 }
  0x26   : > { %v8788_v7 = vcombine.low %v313_v58, %v323_v63  ;;  %v342_v9 = vrot.slane %v341_v59, 4  ;;  %v364_v13 = vrot.slane %v362_v3, 4  ;;  %v337_v16 = vsel %vm11021_vm4, %v332_v1, %v336_v51 }
  0x27   : > { %v373_v18 = vshrl.u32 %v11039_v4, 16  ;;  %v376_v19 = vshll.u32 %v11039_v4, 16  ;;  %v382_v21 = vshll.u32 %v11044_v12, 16  ;;  %v386_v22 = vshrl.u32 %v11044_v12, 16 }
  0x28   : > { %8805 = vmatmul.mubr.msk.bf16.vlgmr.msra.gmra.mrb[0].mxu0 %vm752_vm3, %v8788_v7  ;;  %8822 = vmatmul.mubr.msk.bf16.vlgmr.msra.gmra.mrb[0].mxu1 %vm752_vm3, %v8788_v7  ;;  %v347_v14 = vsel %vm11021_vm4, %v342_v9, %v346_v2  ;;  %v365_v20 = vor.u32 %v364_v13, %v360_v11  ;;  %v370_v24 = vrot.slane %v368_v15, 5  ;;  %v356_v28 = vrot.slane %v355_v17, 4  ;;  %v286_v7 = vld [vmem:[%s11000_s15 + $0x44] sm:$0x1]  ;;  %v11098_v13 = vld [vmem:[%s11000_s15 + $0x48] sm:$0xf] }
  0x29   : > { %1359 = vmatpush1.bf16.msra.mxu0 %v1347_v55  ;;  %1552 = vmatpush1.bf16.msra.mxu1 %v1353_v8  ;;  %v8789_v23 = vcombine.low %v337_v16, %v347_v14  ;;  %v375_v25 = vrot.slane %v373_v18, 4  ;;  %v378_v26 = vrot.slane %v376_v19, 5  ;;  %v384_v30 = vrot.slane %v382_v21, 5  ;;  %v11079_v55 = vld [vmem:[%s11000_s15 + $0x3c] sm:$0xf] }
  0x2a   : > { %856 = vmatprep.mubr.bf16.mxu0 %v10886_v6  ;;  %1049 = vmatprep.mubr.bf16.mxu1 %v10886_v6  ;;  %v366_v29 = vrot.slane %v365_v20, 4  ;;  %v388_v31 = vrot.slane %v386_v22, 4  ;;  %v397_v34 = vshrl.u32 %v11059_v27, 16  ;;  %v400_v36 = vshll.u32 %v11059_v27, 16  ;;  %v11101_v15 = vld [vmem:[%s11000_s15 + $0x4c] sm:$0xf] }
  0x2b   : > { %v379_v37 = vor.u32 %v378_v26, %v375_v25  ;;  %v406_v38 = vshll.u32 %v11062_v32, 16  ;;  %v410_v39 = vshrl.u32 %v11062_v32, 16  ;;  %v361_v40 = vsel %vm11021_vm4, %v356_v28, %v360_v11  ;;  %v11104_v14 = vld [vmem:[%s11000_s15 + $0x54] sm:$0xf] }
  0x2c   : > { %v371_v41 = vsel %vm11021_vm4, %v366_v29, %v370_v24  ;;  %v389_v42 = vor.u32 %v388_v31, %v384_v30  ;;  %v392_v43 = vshll.u32 %v284_v33, 16  ;;  %v399_v45 = vrot.slane %v397_v34, 4 }
  0x2d   : > { %v402_v46 = vrot.slane %v400_v36, 5  ;;  %v8790_v47 = vcombine.low %v361_v40, %v371_v41  ;;  %v380_v49 = vrot.slane %v379_v37, 4  ;;  %v408_v50 = vrot.slane %v406_v38, 5  ;;  %v11122_v37 = vld [vmem:[%s11000_s15 + $0x58] sm:$0xf] }
  0x2e   : > { %v412_v51 = vrot.slane %v410_v39, 4  ;;  %v390_v52 = vrot.slane %v389_v42, 4  ;;  %v394_v53 = vrot.slane %v392_v43, 5  ;;  %v416_v60 = vshll.u32 %v285_v54, 16  ;;  %v288_v54 = vld [vmem:[%s11000_s15 + $0x5c] sm:$0x1] }
  0x2f   : > { %v403_v57 = vor.u32 %v402_v46, %v399_v45  ;;  %v385_v58 = vsel %vm11021_vm4, %v380_v49, %v384_v30  ;;  %v421_v61 = vshrl.u32 %v11079_v55, 16  ;;  %v424_v63 = vshll.u32 %v11079_v55, 16  ;;  %v287_v30 = vld [vmem:[%s11000_s15 + $0x50] sm:$0x1]  ;;  %v11127_v45 = vld [vmem:[%s11000_s15 + $0x60] sm:$0xf] }
  0x30   : > { %8806 = vmatmul.mubr.msk.bf16.gmra.mrb[4].mxu0 %vm752_vm3, %v8789_v23  ;;  %8823 = vmatmul.mubr.msk.bf16.gmra.mrb[4].mxu1 %vm752_vm3, %v8789_v23  ;;  %v413_v59 = vor.u32 %v412_v51, %v408_v50  ;;  %v395_v62 = vsel %vm11021_vm4, %v390_v52, %v394_v53  ;;  %v430_v1 = vshll.u32 %v11082_v56, 16  ;;  %v434_v2 = vshrl.u32 %v11082_v56, 16 }
  0x31   : > { %866 = vmatprep.mubr.bf16.mxu0 %v10886_v6  ;;  %1059 = vmatprep.mubr.bf16.mxu1 %v10886_v6  ;;  %v404_v3 = vrot.slane %v403_v57, 4  ;;  %v8791_v8 = vcombine.low %v385_v58, %v395_v62  ;;  %v418_v11 = vrot.slane %v416_v60, 5  ;;  %v423_v16 = vrot.slane %v421_v61, 4  ;;  %v11136_v57 = vld [vmem:[%s11000_s15 + $0x64] sm:$0xf] }
  0x32   : > { %v414_v9 = vrot.slane %v413_v59, 4  ;;  %v426_v17 = vrot.slane %v424_v63, 5  ;;  %v432_v18 = vrot.slane %v430_v1, 5  ;;  %v436_v19 = vrot.slane %v434_v2, 4  ;;  %v11145_v60 = vld [vmem:[%s11000_s15 + $0x6c] sm:$0xf] }
  0x33   : > { %v409_v20 = vsel %vm11021_vm4, %v404_v3, %v408_v50  ;;  %v440_v21 = vshll.u32 %v286_v7, 16  ;;  %v445_v22 = vshrl.u32 %v11098_v13, 16  ;;  %v448_v24 = vshll.u32 %v11098_v13, 16  ;;  %v11149_v63 = vld [vmem:[%s11000_s15 + $0x70] sm:$0xf] }
  0x34   : > { %v419_v23 = vsel %vm11021_vm4, %v414_v9, %v418_v11  ;;  %v454_v25 = vshll.u32 %v11101_v15, 16  ;;  %v458_v26 = vshrl.u32 %v11101_v15, 16  ;;  %v427_v28 = vor.u32 %v426_v17, %v423_v16 }
  0x35   : > { %v437_v29 = vor.u32 %v436_v19, %v432_v18  ;;  %v469_v31 = vshrl.u32 %v11104_v14, 16  ;;  %v472_v33 = vshll.u32 %v11104_v14, 16  ;;  %v8792_v34 = vcombine.low %v409_v20, %v419_v23  ;;  %v11160_v20 = vld [vmem:[%s11000_s15 + $0x7c] sm:$0xf] }
  0x36   : > { %v442_v36 = vrot.slane %v440_v21, 5  ;;  %v447_v38 = vrot.slane %v445_v22, 4  ;;  %v450_v39 = vrot.slane %v448_v24, 5  ;;  %v11124_v40 = vrot.slane %v454_v25, 5  ;;  %v289_v22 = vld [vmem:[%s11000_s15 + $0x68] sm:$0x1] }
  0x37   : > { %v460_v41 = vrot.slane %v458_v26, 4  ;;  %v428_v42 = vrot.slane %v427_v28, 4  ;;  %v438_v43 = vrot.slane %v437_v29, 4  ;;  %v471_v46 = vrot.slane %v469_v31, 4 }
  0x38   : > { %8807 = vmatmul.mubr.msk.bf16.gmra.mrb[8].mxu0 %vm752_vm3, %v8790_v47  ;;  %8824 = vmatmul.mubr.msk.bf16.gmra.mrb[8].mxu1 %vm752_vm3, %v8790_v47  ;;  %v474_v47 = vrot.slane %v472_v33, 5  ;;  %v464_v49 = vshll.u32 %v287_v30, 16  ;;  %v478_v50 = vshll.u32 %v11122_v37, 16  ;;  %v482_v51 = vshrl.u32 %v11122_v37, 16 }
  0x39   : > { %876 = vmatprep.mubr.bf16.mxu0 %v10886_v6  ;;  %1069 = vmatprep.mubr.bf16.mxu1 %v10886_v6  ;;  %v451_v52 = vor.u32 %v450_v39, %v447_v38  ;;  %v461_v53 = vor.u32 %v460_v41, %v11124_v40  ;;  %v433_v58 = vsel %vm11021_vm4, %v428_v42, %v432_v18  ;;  %v493_v62 = vshrl.u32 %v11127_v45, 16  ;;  %v11180_v38 = vld [vmem:[%s11000_s15 + $0x84] sm:$0xf]  ;;  %v290_v42 = vld [vmem:[%s11000_s15 + $0x74] sm:$0x1] }
  0x3a   : > { %v443_v59 = vsel %vm11021_vm4, %v438_v43, %v442_v36  ;;  %v475_v61 = vor.u32 %v474_v47, %v471_v46  ;;  %v466_v1 = vrot.slane %v464_v49, 5  ;;  %v11151_v2 = vrot.slane %v478_v50, 5  ;;  %v11190_v49 = vld [vmem:[%s11000_s15 + $0x88] sm:$0xf] }
  0x3b   : > { %v484_v3 = vrot.slane %v482_v51, 4  ;;  %v496_v7 = vshll.u32 %v11127_v45, 16  ;;  %v8793_v9 = vcombine.low %v433_v58, %v443_v59  ;;  %v452_v11 = vrot.slane %v451_v52, 4 }
  0x3c   : > { %v462_v16 = vrot.slane %v461_v53, 4  ;;  %v488_v17 = vshll.u32 %v288_v54, 16  ;;  %v502_v18 = vshll.u32 %v11136_v57, 16  ;;  %v506_v19 = vshrl.u32 %v11136_v57, 16  ;;  %v291_v54 = vld [vmem:[%s11000_s15 + $0x80] sm:$0x1] }
  0x3d   : > { %v11162_v21 = vrot.slane %v475_v61, 4  ;;  %v495_v23 = vrot.slane %v493_v62, 4  ;;  %v517_v24 = vshrl.u32 %v11145_v60, 16  ;;  %v520_v25 = vshll.u32 %v11145_v60, 16 }
  0x3e   : > { %v485_v26 = vor.u32 %v484_v3, %v11151_v2  ;;  %v498_v28 = vrot.slane %v496_v7, 5  ;;  %v526_v29 = vshll.u32 %v11149_v63, 16  ;;  %v530_v30 = vshrl.u32 %v11149_v63, 16 }
  0x3f   : > { %v457_v31 = vsel %vm11021_vm4, %v452_v11, %v11124_v40  ;;  %v467_v33 = vsel %vm11021_vm4, %v462_v16, %v466_v1  ;;  %v11184_v39 = vrot.slane %v502_v18, 5  ;;  %v508_v41 = vrot.slane %v506_v19, 4 }
  0x40   : > { %8808 = vmatmul.mubr.msk.bf16.gmra.mrb[12].mxu0 %vm752_vm3, %v8791_v8  ;;  %8825 = vmatmul.mubr.msk.bf16.gmra.mrb[12].mxu1 %vm752_vm3, %v8791_v8  ;;  %v11155_v8 = vld [vmem:[%s11000_s15 + $0x78] sm:$0xf]  ;;  %v519_v43 = vrot.slane %v517_v24, 4  ;;  %v522_v40 = vrot.slane %v520_v25, 5  ;;  %v550_v46 = vshll.u32 %v11160_v20, 16  ;;  %v554_v47 = vshrl.u32 %v11160_v20, 16 }
  0x41   : > { %886 = vmatprep.mubr.bf16.mxu0 %v10886_v6  ;;  %1079 = vmatprep.mubr.bf16.mxu1 %v10886_v6  ;;  %v544_v36 = vshll.u32 %v11155_v8, 16  ;;  %v8794_v50 = vcombine.low %v457_v31, %v467_v33  ;;  %v486_v51 = vrot.slane %v485_v26, 4  ;;  %v490_v52 = vrot.slane %v488_v17, 5  ;;  %v11208_v25 = vld [vmem:[%s11000_s15 + $0x90] sm:$0xf] }
  0x42   : > { %v512_v53 = vshll.u32 %v289_v22, 16  ;;  %v11193_v58 = vrot.slane %v526_v29, 5  ;;  %v532_v59 = vrot.slane %v530_v30, 4  ;;  %v499_v1 = vor.u32 %v498_v28, %v495_v23  ;;  %v292_v22 = vld [vmem:[%s11000_s15 + $0x8c] sm:$0x1] }
  0x43   : > { %v546_v62 = vrot.slane %v544_v36, 5  ;;  %v509_v3 = vor.u32 %v508_v41, %v11184_v39  ;;  %v565_v7 = vshrl.u32 %v11180_v38, 16  ;;  %v523_v11 = vor.u32 %v522_v40, %v519_v43  ;;  %v11216_v31 = vld [vmem:[%s11000_s15 + $0x94] sm:$0xf] }
  0x44   : > { %v536_v16 = vshll.u32 %v290_v42, 16  ;;  %v11198_v17 = vrot.slane %v550_v46, 5  ;;  %v556_v18 = vrot.slane %v554_v47, 4  ;;  %v481_v19 = vsel %vm11021_vm4, %v11162_v21, %v11151_v2  ;;  %v8904_v40 = vld [vmem:[%s12966_s1 + $0x10] sm:$0xff] }
  0x45   : > { %v574_v23 = vshll.u32 %v11190_v49, 16  ;;  %v578_v24 = vshrl.u32 %v11190_v49, 16  ;;  %v491_v26 = vsel %vm11021_vm4, %v486_v51, %v490_v52  ;;  %v514_v28 = vrot.slane %v512_v53, 5 }
  0x46   : > { %v533_v29 = vor.u32 %v532_v59, %v11193_v58  ;;  %v560_v30 = vshll.u32 %v291_v54, 16  ;;  %v500_v2 = vrot.slane %v499_v1, 4  ;;  %v567_v33 = vrot.slane %v565_v7, 4 }
  0x47   : > { %v510_v36 = vrot.slane %v509_v3, 4  ;;  %v524_v41 = vrot.slane %v523_v11, 4  ;;  %v538_v42 = vrot.slane %v536_v16, 5  ;;  %v557_v43 = vor.u32 %v556_v18, %v11198_v17 }
  0x48   : > { %8809 = vmatmul.mubr.msk.bf16.gmra.mrb[16].mxu0 %vm752_vm3, %v8792_v34  ;;  %8826 = vmatmul.mubr.msk.bf16.gmra.mrb[16].mxu1 %vm752_vm3, %v8792_v34  ;;  %v541_v34 = vshrl.u32 %v11155_v8, 16  ;;  %v8795_v46 = vcombine.low %v481_v19, %v491_v26  ;;  %v11224_v47 = vrot.slane %v574_v23, 5  ;;  %v534_v51 = vrot.slane %v533_v29, 4 }
  0x49   : > { %896 = vmatprep.mubr.bf16.mxu0 %v10886_v6  ;;  %1089 = vmatprep.mubr.bf16.mxu1 %v10886_v6  ;;  %v562_v52 = vrot.slane %v560_v30, 5  ;;  %v584_v53 = vshll.u32 %v292_v22, 16  ;;  %v589_v54 = vshrl.u32 %v11208_v25, 16  ;;  %v598_v1 = vshll.u32 %v11216_v31, 16 }
  0x4a   : > { %v543_v61 = vrot.slane %v541_v34, 4  ;;  %v558_v3 = vrot.slane %v557_v43, 4  ;;  %v602_v7 = vshrl.u32 %v11216_v31, 16  ;;  %v505_v11 = vsel %vm11021_vm4, %v500_v2, %v11184_v39 }
  0x4b   : > { %v2006_v18 = vcombine.high %v8904_v40, %v8904_v40  ;;  %v515_v19 = vsel %vm11021_vm4, %v510_v36, %v514_v28  ;;  %v586_v22 = vrot.slane %v584_v53, 5  ;;  %v591_v23 = vrot.slane %v589_v54, 4 }
  0x4c   : > { %v547_v21 = vor.u32 %v546_v62, %v543_v61  ;;  %v592_v62 = vshll.u32 %v11208_v25, 16  ;;  %v11250_v30 = vcombine.low %v11015_v35, %v11026_v48  ;;  %v11252_v2 = vrot.slane %v598_v1, 5 }
  0x4d   : > { %v11246_v29 = vrot.slane %v2006_v18, %v10989_v10  ;;  %v604_v28 = vrot.slane %v602_v7, 4  ;;  %v11267_v35 = vcombine.low %v11079_v55, %v11082_v56  ;;  %v11271_v48 = vcombine.low %v11098_v13, %v11101_v15  ;;  %v294_v7 = vld [vmem:[%s11000_s15 + $0xa4] sm:$0x1] }
  0x4e   : > { %v548_v59 = vrot.slane %v547_v21, 4  ;;  %v594_v26 = vrot.slane %v592_v62, 5  ;;  %v11257_v21 = vcombine.low %v11039_v4, %v11044_v12  ;;  %v8796_v43 = vcombine.low %v505_v11, %v515_v19 }
  0x4f   : > { %v2022_v36 = vcombine.high %v11246_v29, %v11246_v29  ;;  %v11275_v4 = vcombine.low %v11104_v14, %v11122_v37  ;;  %v11279_v12 = vcombine.low %v11127_v45, %v11136_v57  ;;  %v11293_v55 = vcombine.low %v11145_v60, %v11149_v63  ;;  %v11309_v37 = vld [vmem:[%s11000_s15 + $0x9c] sm:$0xf]  ;;  %v293_v45 = vld [vmem:[%s11000_s15 + $0x98] sm:$0x1]  ;;  %v11313_v60 = vld [vmem:[%s11000_s15 + $0xa0] sm:$0xf] }
  0x50   : > { %8810 = vmatmul.mubr.msk.bf16.gmra.mrb[20].mxu0 %vm752_vm3, %v8793_v9  ;;  %8827 = vmatmul.mubr.msk.bf16.gmra.mrb[20].mxu1 %vm752_vm3, %v8793_v9  ;;  %v568_v9 = vshll.u32 %v11180_v38, 16  ;;  %v553_v13 = vsel %vm11021_vm4, %v548_v59, %v11198_v17  ;;  %v563_v15 = vsel %vm11021_vm4, %v558_v3, %v562_v52  ;;  %v11306_v14 = vcombine.low %v11155_v8, %v11160_v20  ;;  %v277_v3 = vld [vmem:[%s11000_s15 + $0xac] sm:$0xf] }
  0x51   : > { %906 = vmatprep.mubr.bf16.mxu0 %v10886_v6  ;;  %1099 = vmatprep.mubr.bf16.mxu1 %v10886_v6  ;;  %v8798_v57 = vcombine.low %v553_v13, %v563_v15  ;;  %v595_v63 = vor.u32 %v594_v26, %v591_v23  ;;  %v605_v20 = vor.u32 %v604_v28, %v11252_v2  ;;  %v608_v17 = vshll.u32 %v293_v45, 16  ;;  %v279_v15 = vld [vmem:[%s11000_s15 + $0xb8] sm:$0xf] }
  0x52   : > { %v570_v34 = vrot.slane %v568_v9, 5  ;;  %v11231_v9 = vrot.slane %v8904_v40, %v10989_v10  ;;  %8938 = vmatprep.subr.msk.bf16.mxu1 %vm801_vm2, %v2022_v36  ;;  %v622_v40 = vshll.u32 %v11313_v60, 16  ;;  %v646_v19 = vshll.u32 %v277_v3, 16 }
  0x53   : > { %v606_v54 = vrot.slane %v605_v20, 4  ;;  %v610_v59 = vrot.slane %v608_v17, 5  ;;  %v674_v20 = vshrl.u32 %v279_v15, 16  ;;  %v11362_v17 = vcombine.low %v11309_v37, %v11313_v60 }
  0x54   : > { %v571_v61 = vor.u32 %v570_v34, %v567_v33  ;;  %v11261_v33 = vcombine.low %v11059_v27, %v11062_v32  ;;  %v529_v27 = vsel %vm11021_vm4, %v524_v41, %v11193_v58  ;;  %v539_v32 = vsel %vm11021_vm4, %v534_v51, %v538_v42 }
  0x55   : > { %v8797_v56 = vcombine.low %v529_v27, %v539_v32  ;;  %v613_v58 = vshrl.u32 %v11309_v37, 16  ;;  %v616_v41 = vshll.u32 %v11309_v37, 16  ;;  %v624_v62 = vrot.slane %v622_v40, 5  ;;  %v278_v32 = vld [vmem:[%s11000_s15 + $0xb4] sm:$0xf] }
  0x56   : > { %v572_v39 = vrot.slane %v571_v61, 4  ;;  %v276_v61 = vld [vmem:[%s11000_s15 + $0xa8] sm:$0xf] }
  0x57   : > { %v615_v51 = vrot.slane %v613_v58, 4  ;;  %v618_v52 = vrot.slane %v616_v41, 5  ;;  %v637_v18 = vshrl.u32 %v276_v61, 16  ;;  %v664_v58 = vshll.u32 %v278_v32, 16 }
  0x58   : > { %8811 = vmatmul.mubr.msk.bf16.gmra.mrb[24].mxu0 %vm752_vm3, %v8794_v50  ;;  %8828 = vmatmul.mubr.msk.bf16.gmra.mrb[24].mxu1 %vm752_vm3, %v8794_v50  ;;  %v580_v50 = vrot.slane %v578_v24, 4  ;;  %v2021_v24 = vcombine.high %v11231_v9, %v11231_v9  ;;  %v577_v8 = vsel %vm11021_vm4, %v572_v39, %v11224_v47  ;;  %v11347_v39 = vcombine.low %v11208_v25, %v11216_v31 }
  0x59   : > { %916 = vmatprep.mubr.bf16.mxu0 %v10886_v6  ;;  %1109 = vmatprep.mubr.bf16.mxu1 %v10886_v6  ;;  %v639_v28 = vrot.slane %v637_v18, 4 }
  0x5a   : > { %v581_v16 = vor.u32 %v580_v50, %v11224_v47  ;;  %8921 = vmatprep.subr.msk.bf16.mxu0 %vm801_vm2, %v2021_v24  ;;  %v11331_v50 = vcombine.low %v11180_v38, %v11190_v49  ;;  %v596_v47 = vrot.slane %v595_v63, 4  ;;  %v611_v38 = vsel %vm11021_vm4, %v606_v54, %v610_v59  ;;  %v296_v59 = vld [vmem:[%s11000_s15 + $0xbc] sm:$0x1] }
  0x5b   : > { %v640_v49 = vshll.u32 %v276_v61, 16  ;;  %v632_v24 = vshll.u32 %v294_v7, 16  ;;  %v676_v54 = vrot.slane %v674_v20, 4  ;;  %v680_v7 = vshll.u32 %v296_v59, 16  ;;  %v1750_v59 = vld [vmem:[%s11000_s15 + $0x18] sm:$0xe] }
  0x5c   : > { %v582_v34 = vrot.slane %v581_v16, 4  ;;  %v601_v11 = vsel %vm11021_vm4, %v596_v47, %v11252_v2  ;;  %v619_v16 = vor.u32 %v618_v52, %v615_v51  ;;  %v295_v2 = vld [vmem:[%s11000_s15 + $0xb0] sm:$0x1]  ;;  %v666_v47 = vrot.slane %v664_v58, 5 }
  0x5d   : > { %v8800_v26 = vcombine.low %v601_v11, %v611_v38  ;;  %v642_v36 = vrot.slane %v640_v49, 5  ;;  %v634_v13 = vrot.slane %v632_v24, 5  ;;  %v656_v45 = vshll.u32 %v295_v2, 16  ;;  %v10801_v2 = vld [vmem:[%s11000_s15] sm:$0xf] }
  0x5e   : > { %v587_v42 = vsel %vm11021_vm4, %v582_v34, %v586_v22  ;;  %v650_v22 = vshrl.u32 %v277_v3, 16  ;;  %v620_v34 = vrot.slane %v619_v16, 4  ;;  %v11373_v11 = vcombine.low %v276_v61, %v277_v3 }
  0x5f   : > { %v8799_v53 = vcombine.low %v577_v8, %v587_v42  ;;  %v643_v31 = vor.u32 %v642_v36, %v639_v28  ;;  %v670_v8 = vshll.u32 %v279_v15, 16  ;;  %v658_v52 = vrot.slane %v656_v45, 5  ;;  %v10802_v28 = vld [vmem:[%s11000_s15 + $0x4] sm:$0xf] }
  0x60   : > { %8812 = vmatmul.mubr.msk.bf16.gmra.mrb[28].mxu0 %vm752_vm3, %v8795_v46  ;;  %8829 = vmatmul.mubr.msk.bf16.gmra.mrb[28].mxu1 %vm752_vm3, %v8795_v46  ;;  %v626_v46 = vshrl.u32 %v11313_v60, 16  ;;  %v652_v27 = vrot.slane %v650_v22, 4  ;;  %v625_v25 = vsel %vm11021_vm4, %v620_v34, %v624_v62  ;;  %v682_v49 = vrot.slane %v680_v7, 5  ;;  %v9086_v45 = vld [vmem:[%s12966_s1 + $0x20] sm:$0xff] }
  0x61   : > { %926 = vmatprep.mubr.bf16.mxu0 %v10886_v6  ;;  %1119 = vmatprep.mubr.bf16.mxu1 %v10886_v6  ;;  %v644_v40 = vrot.slane %v643_v31, 4  ;;  %v11383_v3 = vcombine.low %v278_v32, %v279_v15  ;;  %v8838_v34 = vcombine.low %v10801_v2, %v10802_v28  ;;  %v3790_v31 = vcombine.high %v9086_v45, %v9086_v45 }
  0x62   : > { %v628_v1 = vrot.slane %v626_v46, 4 }
  0x64   : > { %v629_v23 = vor.u32 %v628_v1, %v624_v62 }
  0x68   : > { %8813 = vmatmul.mubr.msk.bf16.gmra.mrb[32].mxu0 %vm752_vm3, %v8796_v43  ;;  %8830 = vmatmul.mubr.msk.bf16.gmra.mrb[32].mxu1 %vm752_vm3, %v8796_v43  ;;  %v648_v43 = vrot.slane %v646_v19, 5 }
  0x69   : > { %936 = vmatprep.mubr.bf16.mxu0 %v10886_v6  ;;  %1129 = vmatprep.mubr.bf16.mxu1 %v10886_v6 }
  0x6a   : > { %v653_v63 = vor.u32 %v652_v27, %v648_v43  ;;  %v649_v62 = vsel %vm11021_vm4, %v644_v40, %v648_v43  ;;  %v2072_v43 = vsel %vm801_vm2, %v11231_v9, 0  ;;  %v2078_v27 = vsel %vm801_vm2, %v11246_v29, 0  ;;  %v10803_v9 = vld [vmem:[%s11000_s15 + $0xc] sm:$0xf]  ;;  %v10804_v29 = vld [vmem:[%s11000_s15 + $0x10] sm:$0xf] }
  0x6c   : > { %v654_v51 = vrot.slane %v653_v63, 4  ;;  %v11522_v63 = vrot.slane %v9086_v45, %v10989_v10  ;;  %v1762_v45 = vld [vmem:[%s11000_s15 + $0x48] sm:$0xe] }
  0x6e   : > { %v659_v37 = vsel %vm11021_vm4, %v654_v51, %v658_v52 }
  0x6f   : > { %v8802_v16 = vcombine.low %v649_v62, %v659_v37  ;;  %v1752_v62 = vld [vmem:[%s11000_s15 + $0x20] sm:$0x1]  ;;  %v8890_v37 = vrot.slane %v1750_v59, 9  ;;  %v1769_v59 = vld [vmem:[%s11000_s15 + $0x64] sm:$0xf] }
  0x70   : > { %8814 = vmatmul.mubr.msk.bf16.gmra.mrb[36].mxu0 %vm752_vm3, %v8797_v56  ;;  %8831 = vmatmul.mubr.msk.bf16.gmra.mrb[36].mxu1 %vm752_vm3, %v8797_v56  ;;  %v630_v56 = vrot.slane %v629_v23, 4  ;;  %v8987_v23 = vld [vmem:[%s12966_s1 + $0x18] sm:$0xff]  ;;  %v1862_v7 = vrot.slane %v1752_v62, 5 }
  0x71   : > { %946 = vmatprep.mubr.bf16.mxu0 %v10886_v6  ;;  %1139 = vmatprep.mubr.bf16.mxu1 %v10886_v6  ;;  %v2716_v24 = vcombine.high %v8987_v23, %v8987_v23 }
  0x72   : > { %v635_v41 = vsel %vm11021_vm4, %v630_v56, %v634_v13  ;;  %v8839_v13 = vcombine.low %v10803_v9, %v10804_v29  ;;  %v1760_v9 = vld [vmem:[%s11000_s15 + $0x40] sm:$0xf] }
  0x73   : > { %v8801_v42 = vcombine.low %v625_v25, %v635_v41  ;;  %v11398_v36 = vrot.slane %v2716_v24, %v10989_v10  ;;  %v1749_v25 = vld [vmem:[%s11000_s15 + $0x14] sm:$0x1]  ;;  %v11525_v41 = vrot.slane %v3790_v31, %v10989_v10  ;;  %v8894_v31 = vrot.slane %v1762_v45, 9 }
  0x74   : > { %v1757_v24 = vld [vmem:[%s11000_s15 + $0x34] sm:$0xf] }
  0x75   : > { %v2732_v56 = vcombine.high %v11398_v36, %v11398_v36  ;;  %v2788_v40 = vsel %vm801_vm2, %v11398_v36, 0  ;;  %v3806_v51 = vcombine.high %v11525_v41, %v11525_v41  ;;  %v1873_v28 = vrot.slane %v1757_v24, 5  ;;  %v1758_v36 = vld [vmem:[%s11000_s15 + $0x38] sm:$0x1]  ;;  %v1781_v45 = vld [vmem:[%s11000_s15 + $0x94] sm:$0xf] }
  0x78   : > { %8815 = vmatmul.mubr.msk.bf16.gmra.mrb[40].mxu0 %vm752_vm3, %v8798_v57  ;;  %8832 = vmatmul.mubr.msk.bf16.gmra.mrb[40].mxu1 %vm752_vm3, %v8798_v57  ;;  %v661_v57 = vshrl.u32 %v278_v32, 16 }
  0x79   : > { %956 = vmatprep.mubr.bf16.mxu0 %v10886_v6  ;;  %1149 = vmatprep.mubr.bf16.mxu1 %v10886_v6 }
  0x7a   : > { %v663_v46 = vrot.slane %v661_v57, 4  ;;  %v1747_v57 = vld [vmem:[%s11000_s15 + $0xc] sm:$0xe] }
  0x7c   : > { %v667_v1 = vor.u32 %v666_v47, %v663_v46  ;;  %v1751_v46 = vld [vmem:[%s11000_s15 + $0x1c] sm:$0xf]  ;;  %v3805_v47 = vcombine.high %v11522_v63, %v11522_v63 }
  0x7e   : > { %v668_v18 = vrot.slane %v667_v1, 4 }
  0x80   : > { %8816 = vmatmul.mubr.msk.bf16.gmra.mrb[44].mxu0 %vm752_vm3, %v8799_v53  ;;  %8833 = vmatmul.mubr.msk.bf16.gmra.mrb[44].mxu1 %vm752_vm3, %v8799_v53  ;;  %v672_v53 = vrot.slane %v670_v8, 5  ;;  %v8889_v8 = vrot.slane %v1747_v57, 9  ;;  %v1764_v57 = vld [vmem:[%s11000_s15 + $0x50] sm:$0x1] }
  0x81   : > { %966 = vmatprep.mubr.bf16.mxu0 %v10886_v6  ;;  %1159 = vmatprep.mubr.bf16.mxu1 %v10886_v6 }
  0x82   : > { %v677_v60 = vor.u32 %v676_v54, %v672_v53  ;;  %v673_v19 = vsel %vm11021_vm4, %v668_v18, %v672_v53  ;;  %v1859_v54 = vrot.slane %v1751_v46, 5  ;;  %v1765_v46 = vld [vmem:[%s11000_s15 + $0x54] sm:$0xe] }
  0x84   : > { %v678_v38 = vrot.slane %v677_v60, 4  ;;  %v1861_v60 = vrot.slane %v1859_v54, 4 }
  0x86   : > { %v683_v61 = vsel %vm11021_vm4, %v678_v38, %v682_v49  ;;  %v1863_v18 = vsel %vm11501_vm7, %v1861_v60, %v1862_v7  ;;  %v1753_v49 = vld [vmem:[%s11000_s15 + $0x24] sm:$0xe]  ;;  %v1768_v60 = vld [vmem:[%s11000_s15 + $0x60] sm:$0xe]  ;;  %v1770_v7 = vld [vmem:[%s11000_s15 + $0x68] sm:$0x1] }
  0x87   : > { %v8803_v22 = vcombine.low %v673_v19, %v683_v61  ;;  %v1755_v19 = vld [vmem:[%s11000_s15 + $0x2c] sm:$0x1] }
  0x88   : > { %8817 = vmatmul.mubr.msk.bf16.gmra.mrb[48].mxu0 %vm752_vm3, %v8800_v26  ;;  %8834 = vmatmul.mubr.msk.bf16.gmra.mrb[48].mxu1 %vm752_vm3, %v8800_v26  ;;  %v11393_v26 = vrot.slane %v8987_v23, %v10989_v10  ;;  %v1869_v23 = vrot.slane %v1755_v19, 5 }
  0x89   : > { %976 = vmatprep.mubr.bf16.mxu0 %v10886_v6  ;;  %1169 = vmatprep.mubr.bf16.mxu1 %v10886_v6 }
  0x8a   : > { %v2731_v32 = vcombine.high %v11393_v26, %v11393_v26 }
  0x90   : > { %8818 = vmatmul.mubr.msk.bf16.gmra.mrb[52].mxu0 %vm752_vm3, %v8801_v42  ;;  %8835 = vmatmul.mubr.msk.bf16.gmra.mrb[52].mxu1 %vm752_vm3, %v8801_v42  ;;  %v2782_v42 = vsel %vm801_vm2, %v11393_v26, 0 }
  0x91   : > { %986 = vmatprep.mubr.bf16.mxu0 %v10886_v6  ;;  %1179 = vmatprep.mubr.bf16.mxu1 %v10886_v6 }
  0x98   : > { %8819 = vmatmul.mubr.msk.bf16.gmra.mrb[56].mxu0 %vm752_vm3, %v8802_v16  ;;  %8836 = vmatmul.mubr.msk.bf16.gmra.mrb[56].mxu1 %vm752_vm3, %v8802_v16  ;;  %v1860_v16 = vsel %vm11501_vm7, %v8890_v37, %v1859_v54  ;;  %v1901_v37 = vrot.slane %v1769_v59, 5 }
  0x99   : > { %996 = vmatprep.mubr.bf16.mxu0 %v10886_v6  ;;  %1189 = vmatprep.mubr.bf16.mxu1 %v10886_v6  ;;  %v8907_v61 = vcombine.low %v1860_v16, %v1863_v18  ;;  %v8896_v16 = vrot.slane %v1768_v60, 9  ;;  %v1787_v60 = vld [vmem:[%s11000_s15 + $0xac] sm:$0xf] }
  0x9a   : > { %v1903_v18 = vrot.slane %v1901_v37, 4 }
  0x9b   : > { %v1902_v19 = vsel %vm11501_vm7, %v8896_v16, %v1901_v37  ;;  %v1943_v16 = vrot.slane %v1787_v60, 5  ;;  %v9042_v60 = vld [vmem:[%s11000_s15 + $0x1c] sm:$0xf] }
  0xa0   : > { %8820 = vmatmul.mubr.msk.bf16.gmra.mrb[60].mxu0 %vm752_vm3, %v8803_v22  ;;  %8837 = vmatmul.mubr.msk.bf16.gmra.mrb[60].mxu1 %vm752_vm3, %v8803_v22 }
  0xa1   : > { %1390 = vmatprep.mubr.bf16.mxu0 %v10886_v6  ;;  %1583 = vmatprep.mubr.bf16.mxu1 %v10886_v6 }
  0xa8   : > { %8855 = vmatmul.mubr.msk.bf16.vlgmr.msra.gmra.mrb[0].mxu0 %vm752_vm3, %v8838_v34  ;;  %8872 = vmatmul.mubr.msk.bf16.vlgmr.msra.gmra.mrb[0].mxu1 %vm752_vm3, %v8838_v34  ;;  %v1756_v34 = vld [vmem:[%s11000_s15 + $0x30] sm:$0xe] }
  0xa9   : > { %2084 = vmatpush1.bf16.msra.mxu0 %v2072_v43  ;;  %2277 = vmatpush1.bf16.msra.mxu1 %v2078_v27  ;;  %v8892_v27 = vrot.slane %v1756_v34, 9  ;;  %v1775_v34 = vld [vmem:[%s11000_s15 + $0x7c] sm:$0xf] }
  0xaa   : > { %1400 = vmatprep.mubr.bf16.mxu0 %v10886_v6  ;;  %1593 = vmatprep.mubr.bf16.mxu1 %v10886_v6 }
  0xab   : > { %9004 = vmatprep.subr.msk.bf16.mxu0 %vm801_vm2, %v2731_v32  ;;  %9021 = vmatprep.subr.msk.bf16.mxu1 %vm801_vm2, %v2732_v56  ;;  %v1875_v32 = vrot.slane %v1873_v28, 4  ;;  %v1876_v56 = vrot.slane %v1758_v36, 5  ;;  %v1874_v29 = vsel %vm11501_vm7, %v8892_v27, %v1873_v28  ;;  %v1915_v27 = vrot.slane %v1775_v34, 5 }
  0xb0   : > { %8856 = vmatmul.mubr.msk.bf16.gmra.mrb[4].mxu0 %vm752_vm3, %v8839_v13  ;;  %8873 = vmatmul.mubr.msk.bf16.gmra.mrb[4].mxu1 %vm752_vm3, %v8839_v13  ;;  %v1877_v13 = vsel %vm11501_vm7, %v1875_v32, %v1876_v56  ;;  %v1774_v32 = vld [vmem:[%s11000_s15 + $0x78] sm:$0xe]  ;;  %v1776_v56 = vld [vmem:[%s11000_s15 + $0x80] sm:$0x1] }
  0xb1   : > { %1410 = vmatprep.mubr.bf16.mxu0 %v10886_v6  ;;  %1603 = vmatprep.mubr.bf16.mxu1 %v10886_v6 }
  0xb8   : > { %8857 = vmatmul.mubr.msk.bf16.gmra.mrb[8].mxu0 %vm752_vm3, %v11250_v30  ;;  %8874 = vmatmul.mubr.msk.bf16.gmra.mrb[8].mxu1 %vm752_vm3, %v11250_v30  ;;  %v1745_v30 = vld [vmem:[%s11000_s15 + $0x4] sm:$0xf] }
  0xb9   : > { %1420 = vmatprep.mubr.bf16.mxu0 %v10886_v6  ;;  %1613 = vmatprep.mubr.bf16.mxu1 %v10886_v6 }
  0xc0   : > { %8858 = vmatmul.mubr.msk.bf16.gmra.mrb[12].mxu0 %vm752_vm3, %v11257_v21  ;;  %8875 = vmatmul.mubr.msk.bf16.gmra.mrb[12].mxu1 %vm752_vm3, %v11257_v21  ;;  %v1845_v21 = vrot.slane %v1745_v30, 5  ;;  %v1880_v30 = vrot.slane %v1760_v9, 5 }
  0xc1   : > { %1430 = vmatprep.mubr.bf16.mxu0 %v10886_v6  ;;  %1623 = vmatprep.mubr.bf16.mxu1 %v10886_v6 }
  0xc8   : > { %8859 = vmatmul.mubr.msk.bf16.gmra.mrb[16].mxu0 %vm752_vm3, %v11261_v33  ;;  %8876 = vmatmul.mubr.msk.bf16.gmra.mrb[16].mxu1 %vm752_vm3, %v11261_v33  ;;  %v1744_v33 = vld [vmem:[%s11000_s15] sm:$0xe] }
  0xc9   : > { %1440 = vmatprep.mubr.bf16.mxu0 %v10886_v6  ;;  %1633 = vmatprep.mubr.bf16.mxu1 %v10886_v6 }
  0xd0   : > { %8860 = vmatmul.mubr.msk.bf16.gmra.mrb[20].mxu0 %vm752_vm3, %v11267_v35  ;;  %8877 = vmatmul.mubr.msk.bf16.gmra.mrb[20].mxu1 %vm752_vm3, %v11267_v35  ;;  %v1746_v35 = vld [vmem:[%s11000_s15 + $0x8] sm:$0x1] }
  0xd1   : > { %1450 = vmatprep.mubr.bf16.mxu0 %v10886_v6  ;;  %1643 = vmatprep.mubr.bf16.mxu1 %v10886_v6 }
  0xd8   : > { %8861 = vmatmul.mubr.msk.bf16.gmra.mrb[24].mxu0 %vm752_vm3, %v11271_v48  ;;  %8878 = vmatmul.mubr.msk.bf16.gmra.mrb[24].mxu1 %vm752_vm3, %v11271_v48  ;;  %v8888_v48 = vrot.slane %v1744_v33, 9  ;;  %v1761_v33 = vld [vmem:[%s11000_s15 + $0x44] sm:$0x1] }
  0xd9   : > { %1460 = vmatprep.mubr.bf16.mxu0 %v10886_v6  ;;  %1653 = vmatprep.mubr.bf16.mxu1 %v10886_v6 }
  0xe0   : > { %8862 = vmatmul.mubr.msk.bf16.gmra.mrb[28].mxu0 %vm752_vm3, %v11275_v4  ;;  %8879 = vmatmul.mubr.msk.bf16.gmra.mrb[28].mxu1 %vm752_vm3, %v11275_v4  ;;  %v1847_v4 = vrot.slane %v1845_v21, 4 }
  0xe1   : > { %1470 = vmatprep.mubr.bf16.mxu0 %v10886_v6  ;;  %1663 = vmatprep.mubr.bf16.mxu1 %v10886_v6 }
  0xe8   : > { %8863 = vmatmul.mubr.msk.bf16.gmra.mrb[32].mxu0 %vm752_vm3, %v11279_v12  ;;  %8880 = vmatmul.mubr.msk.bf16.gmra.mrb[32].mxu1 %vm752_vm3, %v11279_v12  ;;  %v1848_v12 = vrot.slane %v1746_v35, 5  ;;  %v8909_v35 = vcombine.low %v1874_v29, %v1877_v13  ;;  %v8898_v29 = vrot.slane %v1774_v32, 9  ;;  %v1917_v13 = vrot.slane %v1915_v27, 4 }
  0xe9   : > { %1480 = vmatprep.mubr.bf16.mxu0 %v10886_v6  ;;  %1673 = vmatprep.mubr.bf16.mxu1 %v10886_v6 }
  0xf0   : > { %8864 = vmatmul.mubr.msk.bf16.gmra.mrb[36].mxu0 %vm752_vm3, %v11293_v55  ;;  %8881 = vmatmul.mubr.msk.bf16.gmra.mrb[36].mxu1 %vm752_vm3, %v11293_v55  ;;  %v10772_v55 = vld [vmem:[%s12968_s3 + $0x80] sm:$0xff]  }
  0xf1   : > { %1490 = vmatprep.mubr.bf16.mxu0 %v10886_v6  ;;  %1683 = vmatprep.mubr.bf16.mxu1 %v10886_v6 }
  0xf8   : > { %8865 = vmatmul.mubr.msk.bf16.gmra.mrb[40].mxu0 %vm752_vm3, %v11306_v14  ;;  %8882 = vmatmul.mubr.msk.bf16.gmra.mrb[40].mxu1 %vm752_vm3, %v11306_v14  ;;  %v1748_v14 = vld [vmem:[%s11000_s15 + $0x10] sm:$0xf] }
  0xf9   : > { %1500 = vmatprep.mubr.bf16.mxu0 %v10886_v6  ;;  %1693 = vmatprep.mubr.bf16.mxu1 %v10886_v6  ;;  %v1852_v15 = vrot.slane %v1748_v14, 5  ;;  %v1763_v14 = vld [vmem:[%s11000_s15 + $0x4c] sm:$0xf] }
  0xfb   : > { %v1854_v20 = vrot.slane %v1852_v15, 4  ;;  %v1853_v52 = vsel %vm11501_vm7, %v8889_v8, %v1852_v15  ;;  %v1887_v15 = vrot.slane %v1763_v14, 5  ;;  %v1890_v8 = vrot.slane %v1764_v57, 5 }
 0x100   : > { %8866 = vmatmul.mubr.msk.bf16.gmra.mrb[44].mxu0 %vm752_vm3, %v11331_v50  ;;  %8883 = vmatmul.mubr.msk.bf16.gmra.mrb[44].mxu1 %vm752_vm3, %v11331_v50  ;;  %v1846_v50 = vsel %vm11501_vm7, %v8888_v48, %v1845_v21  ;;  %v1759_v21 = vld [vmem:[%s11000_s15 + $0x3c] sm:$0xe] }
 0x101   : > { %1510 = vmatprep.mubr.bf16.mxu0 %v10886_v6  ;;  %1703 = vmatprep.mubr.bf16.mxu1 %v10886_v6  ;;  %v8893_v48 = vrot.slane %v1759_v21, 9  ;;  %v1778_v21 = vld [vmem:[%s11000_s15 + $0x88] sm:$0xf] }
 0x108   : > { %8867 = vmatmul.mubr.msk.bf16.gmra.mrb[48].mxu0 %vm752_vm3, %v11347_v39  ;;  %8884 = vmatmul.mubr.msk.bf16.gmra.mrb[48].mxu1 %vm752_vm3, %v11347_v39  ;;  %v1849_v39 = vsel %vm11501_vm7, %v1847_v4, %v1848_v12  ;;  %v1882_v4 = vrot.slane %v1880_v30, 4  ;;  %v1883_v12 = vrot.slane %v1761_v33, 5  ;;  %v1916_v33 = vsel %vm11501_vm7, %v8898_v29, %v1915_v27  ;;  %v9201_v29 = vld [vmem:[%s12966_s1 + $0x28] sm:$0xff] }
 0x109   : > { %1520 = vmatprep.mubr.bf16.mxu0 %v10886_v6  ;;  %1713 = vmatprep.mubr.bf16.mxu1 %v10886_v6  ;;  %v8905_v58 = vcombine.low %v1846_v50, %v1849_v39  ;;  %v1881_v50 = vsel %vm11501_vm7, %v8893_v48, %v1880_v30  ;;  %v1918_v30 = vrot.slane %v1776_v56, 5  ;;  %v1922_v48 = vrot.slane %v1778_v21, 5  ;;  %v10733_v21 = vld [vmem:[%s11000_s15 + $0xc] sm:$0xff]  }
 0x10a   : > { %v1884_v39 = vsel %vm11501_vm7, %v1882_v4, %v1883_v12  ;;  %v1777_v4 = vld [vmem:[%s11000_s15 + $0x84] sm:$0xe]  ;;  %v1779_v12 = vld [vmem:[%s11000_s15 + $0x8c] sm:$0x1] }
 0x110   : > { %8868 = vmatmul.mubr.msk.bf16.gmra.mrb[52].mxu0 %vm752_vm3, %v11362_v17  ;;  %8885 = vmatmul.mubr.msk.bf16.gmra.mrb[52].mxu1 %vm752_vm3, %v11362_v17  ;;  %v1855_v17 = vrot.slane %v1749_v25, 5  ;;  %v8910_v25 = vcombine.low %v1881_v50, %v1884_v39  ;;  %v8899_v50 = vrot.slane %v1777_v4, 9  ;;  %v1924_v39 = vrot.slane %v1922_v48, 4 }
 0x111   : > { %1530 = vmatprep.mubr.bf16.mxu0 %v10886_v6  ;;  %1723 = vmatprep.mubr.bf16.mxu1 %v10886_v6 }
 0x112   : > { %v1856_v53 = vsel %vm11501_vm7, %v1854_v20, %v1855_v17  ;;  %v1766_v20 = vld [vmem:[%s11000_s15 + $0x58] sm:$0xf]  ;;  %v1888_v17 = vsel %vm11501_vm7, %v8894_v31, %v1887_v15  ;;  %v1923_v57 = vsel %vm11501_vm7, %v8899_v50, %v1922_v48  ;;  %v1929_v31 = vrot.slane %v1781_v45, 5  ;;  %v10737_v50 = vld [vmem:[%s11000_s15 + $0x3c] sm:$0xff]  }
 0x113   : > { %v8906_v1 = vcombine.low %v1853_v52, %v1856_v53  ;;  %v8895_v52 = vrot.slane %v1765_v46, 9  ;;  %v1784_v46 = vld [vmem:[%s11000_s15 + $0xa0] sm:$0xf]  ;;  %v3862_v48 = vsel %vm801_vm2, %v11525_v41, 0  ;;  %v10735_v41 = vld [vmem:[%s11000_s15 + $0x24] sm:$0xff]  }
 0x114   : > { %v10740_v45 = vld [vmem:[%s11000_s15 + $0x60] sm:$0xff]  }
 0x118   : > { %8869 = vmatmul.mubr.msk.bf16.gmra.mrb[56].mxu0 %vm752_vm3, %v11373_v11  ;;  %8886 = vmatmul.mubr.msk.bf16.gmra.mrb[56].mxu1 %vm752_vm3, %v11373_v11  ;;  %v1754_v11 = vld [vmem:[%s11000_s15 + $0x28] sm:$0xf] }
 0x119   : > { %1540 = vmatprep.mubr.bf16.mxu0 %v10886_v6  ;;  %1733 = vmatprep.mubr.bf16.mxu1 %v10886_v6  ;;  %v1866_v38 = vrot.slane %v1754_v11, 5 }
 0x11b   : > { %v1868_v22 = vrot.slane %v1866_v38, 4 }
 0x11d   : > { %v1870_v2 = vsel %vm11501_vm7, %v1868_v22, %v1869_v23  ;;  %v1771_v22 = vld [vmem:[%s11000_s15 + $0x6c] sm:$0xe]  ;;  %v1773_v23 = vld [vmem:[%s11000_s15 + $0x74] sm:$0x1] }
 0x11e   : > { %v1911_v28 = vrot.slane %v1773_v23, 5 }
 0x120   : > { %8870 = vmatmul.mubr.msk.bf16.gmra.mrb[60].mxu0 %vm752_vm3, %v11383_v3  ;;  %8887 = vmatmul.mubr.msk.bf16.gmra.mrb[60].mxu1 %vm752_vm3, %v11383_v3  ;;  %v8891_v3 = vrot.slane %v1753_v49, 9  ;;  %v1772_v49 = vld [vmem:[%s11000_s15 + $0x70] sm:$0xf] }
 0x121   : > { %2115 = vmatprep.mubr.bf16.mxu0 %v10886_v6  ;;  %2308 = vmatprep.mubr.bf16.mxu1 %v10886_v6 }
 0x122   : > { %v1867_v26 = vsel %vm11501_vm7, %v8891_v3, %v1866_v38  ;;  %v1904_v38 = vrot.slane %v1770_v7, 5  ;;  %v1908_v3 = vrot.slane %v1772_v49, 5 }
 0x123   : > { %v8908_v43 = vcombine.low %v1867_v26, %v1870_v2  ;;  %v8897_v26 = vrot.slane %v1771_v22, 9  ;;  %v1790_v22 = vld [vmem:[%s11000_s15 + $0xb8] sm:$0xf] }
 0x124   : > { %v1910_v2 = vrot.slane %v1908_v3, 4 }
 0x125   : > { %v1909_v36 = vsel %vm11501_vm7, %v8897_v26, %v1908_v3  ;;  %v1950_v26 = vrot.slane %v1790_v22, 5 }
 0x128   : > { %8922 = vmatmul.mubr.msk.bf16.vlgmr.msra.gmra.mrb[0].mxu0 %vm752_vm3, %v8905_v58  ;;  %8939 = vmatmul.mubr.msk.bf16.vlgmr.msra.gmra.mrb[0].mxu1 %vm752_vm3, %v8905_v58  ;;  %v1889_v58 = vrot.slane %v1887_v15, 4  ;;  %v1925_v15 = vrot.slane %v1779_v12, 5 }
 0x129   : > { %2794 = vmatpush1.bf16.msra.mxu0 %v2782_v42  ;;  %2987 = vmatpush1.bf16.msra.mxu1 %v2788_v40  ;;  %v1894_v40 = vrot.slane %v1766_v20, 5 }
 0x12a   : > { %2125 = vmatprep.mubr.bf16.mxu0 %v10886_v6  ;;  %2318 = vmatprep.mubr.bf16.mxu1 %v10886_v6  ;;  %v1891_v42 = vsel %vm11501_vm7, %v1889_v58, %v1890_v8  ;;  %v1780_v58 = vld [vmem:[%s11000_s15 + $0x90] sm:$0xe]  ;;  %v1782_v8 = vld [vmem:[%s11000_s15 + $0x98] sm:$0x1] }
 0x12b   : > { %9103 = vmatprep.subr.msk.bf16.mxu0 %vm801_vm2, %v3805_v47  ;;  %9120 = vmatprep.subr.msk.bf16.mxu1 %vm801_vm2, %v3806_v51  ;;  %v1767_v47 = vld [vmem:[%s11000_s15 + $0x5c] sm:$0x1]  ;;  %v8911_v51 = vcombine.low %v1888_v17, %v1891_v42  ;;  %v1896_v53 = vrot.slane %v1894_v40, 4  ;;  %v1895_v62 = vsel %vm11501_vm7, %v8895_v52, %v1894_v40  ;;  %v8900_v17 = vrot.slane %v1780_v58, 9  ;;  %v10744_v58 = vld [vmem:[%s11000_s15 + $0x90] sm:$0xff]  }
 0x12c   : > { %v1897_v54 = vrot.slane %v1767_v47, 5  ;;  %v1931_v42 = vrot.slane %v1929_v31, 4  ;;  %v1932_v40 = vrot.slane %v1782_v8, 5  ;;  %v1936_v52 = vrot.slane %v1784_v46, 5  ;;  %v10745_v8 = vld [vmem:[%s11000_s15 + $0x9c] sm:$0xff]  }
 0x12d   : > { %v1930_v47 = vsel %vm11501_vm7, %v8900_v17, %v1929_v31  ;;  %v10743_v31 = vld [vmem:[%s11000_s15 + $0x84] sm:$0xff]  }
 0x12e   : > { %v10746_v17 = vld [vmem:[%s11000_s15 + $0xa8] sm:$0xff]  }
 0x130   : > { %8923 = vmatmul.mubr.msk.bf16.gmra.mrb[4].mxu0 %vm752_vm3, %v8906_v1  ;;  %8940 = vmatmul.mubr.msk.bf16.gmra.mrb[4].mxu1 %vm752_vm3, %v8906_v1  ;;  %v1898_v1 = vsel %vm11501_vm7, %v1896_v53, %v1897_v54  ;;  %v1783_v53 = vld [vmem:[%s11000_s15 + $0x9c] sm:$0xe]  ;;  %v1785_v54 = vld [vmem:[%s11000_s15 + $0xa4] sm:$0x1] }
 0x131   : > { %2135 = vmatprep.mubr.bf16.mxu0 %v10886_v6  ;;  %2328 = vmatprep.mubr.bf16.mxu1 %v10886_v6  ;;  %v8912_v11 = vcombine.low %v1895_v62, %v1898_v1  ;;  %v8901_v62 = vrot.slane %v1783_v53, 9  ;;  %v1938_v1 = vrot.slane %v1936_v52, 4  ;;  %v1939_v37 = vrot.slane %v1785_v54, 5 }
 0x133   : > { %v1937_v7 = vsel %vm11501_vm7, %v8901_v62, %v1936_v52  ;;  %v9041_v62 = vld [vmem:[%s11000_s15 + $0x18] sm:$0xf] }
 0x138   : > { %8924 = vmatmul.mubr.msk.bf16.gmra.mrb[8].mxu0 %vm752_vm3, %v8907_v61  ;;  %8941 = vmatmul.mubr.msk.bf16.gmra.mrb[8].mxu1 %vm752_vm3, %v8907_v61  ;;  %v1905_v61 = vsel %vm11501_vm7, %v1903_v18, %v1904_v38  ;;  %v1786_v18 = vld [vmem:[%s11000_s15 + $0xa8] sm:$0xe]  ;;  %v1788_v38 = vld [vmem:[%s11000_s15 + $0xb0] sm:$0x1] }
 0x139   : > { %2145 = vmatprep.mubr.bf16.mxu0 %v10886_v6  ;;  %2338 = vmatprep.mubr.bf16.mxu1 %v10886_v6  ;;  %v8913_v24 = vcombine.low %v1902_v19, %v1905_v61  ;;  %v8902_v19 = vrot.slane %v1786_v18, 9  ;;  %v1945_v61 = vrot.slane %v1943_v16, 4  ;;  %v1946_v3 = vrot.slane %v1788_v38, 5 }
 0x13b   : > { %v1944_v23 = vsel %vm11501_vm7, %v8902_v19, %v1943_v16  ;;  %v3383_v16 = vshll.u32 %v9041_v62, 16  ;;  %v3393_v19 = vshrl.u32 %v9042_v60, 16 }
 0x13d   : > { %v3385_v22 = vrot.slane %v3383_v16, 5 }
 0x140   : > { %8925 = vmatmul.mubr.msk.bf16.gmra.mrb[12].mxu0 %vm752_vm3, %v8908_v43  ;;  %8942 = vmatmul.mubr.msk.bf16.gmra.mrb[12].mxu1 %vm752_vm3, %v8908_v43  ;;  %v1912_v43 = vsel %vm11501_vm7, %v1910_v2, %v1911_v28  ;;  %v1789_v2 = vld [vmem:[%s11000_s15 + $0xb4] sm:$0xe]  ;;  %v1791_v28 = vld [vmem:[%s11000_s15 + $0xbc] sm:$0x1] }
 0x141   : > { %2155 = vmatprep.mubr.bf16.mxu0 %v10886_v6  ;;  %2348 = vmatprep.mubr.bf16.mxu1 %v10886_v6  ;;  %v8914_v9 = vcombine.low %v1909_v36, %v1912_v43  ;;  %v8903_v36 = vrot.slane %v1789_v2, 9  ;;  %v1952_v43 = vrot.slane %v1950_v26, 4  ;;  %v1953_v27 = vrot.slane %v1791_v28, 5  ;;  %v10748_v28 = vld [vmem:[%s11000_s15 + $0xc0] sm:$0xff]  }
 0x142   : > { %v3395_v2 = vrot.slane %v3393_v19, 4 }
 0x143   : > { %v1951_v32 = vsel %vm11501_vm7, %v8903_v36, %v1950_v26  ;;  %v1954_v56 = vsel %vm11501_vm7, %v1952_v43, %v1953_v27  ;;  %v9044_v36 = vld [vmem:[%s11000_s15 + $0x24] sm:$0xf]  ;;  %v9045_v43 = vld [vmem:[%s11000_s15 + $0x28] sm:$0xf] }
 0x148   : > { %8926 = vmatmul.mubr.msk.bf16.gmra.mrb[16].mxu0 %vm752_vm3, %v8909_v35  ;;  %8943 = vmatmul.mubr.msk.bf16.gmra.mrb[16].mxu1 %vm752_vm3, %v8909_v35  ;;  %v1919_v35 = vsel %vm11501_vm7, %v1917_v13, %v1918_v30  ;;  %v4640_v13 = vcombine.high %v9201_v29, %v9201_v29  ;;  %v11707_v30 = vrot.slane %v9201_v29, %v10989_v10 }
 0x149   : > { %2165 = vmatprep.mubr.bf16.mxu0 %v10886_v6  ;;  %2358 = vmatprep.mubr.bf16.mxu1 %v10886_v6  ;;  %v8915_v14 = vcombine.low %v1916_v33, %v1919_v35  ;;  %v3856_v35 = vsel %vm801_vm2, %v11522_v63, 0  ;;  %v10734_v63 = vld [vmem:[%s11000_s15 + $0x18] sm:$0xff]  }
 0x14a   : > { %v11711_v33 = vrot.slane %v4640_v13, %v10989_v10  ;;  %v4655_v4 = vcombine.high %v11707_v30, %v11707_v30  ;;  %v3404_v13 = vshrl.u32 %v9044_v36, 16 }
 0x14c   : > { %v4656_v12 = vcombine.high %v11711_v33, %v11711_v33 }
 0x150   : > { %8927 = vmatmul.mubr.msk.bf16.gmra.mrb[20].mxu0 %vm752_vm3, %v8910_v25  ;;  %8944 = vmatmul.mubr.msk.bf16.gmra.mrb[20].mxu1 %vm752_vm3, %v8910_v25  ;;  %v1926_v25 = vsel %vm11501_vm7, %v1924_v39, %v1925_v15  ;;  %v10738_v39 = vld [vmem:[%s11000_s15 + $0x48] sm:$0xff]   ;;  %v10739_v15 = vld [vmem:[%s11000_s15 + $0x54] sm:$0xff]  }
 0x151   : > { %2175 = vmatprep.mubr.bf16.mxu0 %v10886_v6  ;;  %2368 = vmatprep.mubr.bf16.mxu1 %v10886_v6  ;;  %v8916_v20 = vcombine.low %v1923_v57, %v1926_v25  ;;  %v10741_v57 = vld [vmem:[%s11000_s15 + $0x6c] sm:$0xff]   ;;  %v10742_v25 = vld [vmem:[%s11000_s15 + $0x78] sm:$0xff]  }
 0x158   : > { %8928 = vmatmul.mubr.msk.bf16.gmra.mrb[24].mxu0 %vm752_vm3, %v8911_v51  ;;  %8945 = vmatmul.mubr.msk.bf16.gmra.mrb[24].mxu1 %vm752_vm3, %v8911_v51  ;;  %v1933_v51 = vsel %vm11501_vm7, %v1931_v42, %v1932_v40  ;;  %v9039_v42 = vld [vmem:[%s11000_s15 + $0x10] sm:$0xf] }
 0x159   : > { %2185 = vmatprep.mubr.bf16.mxu0 %v10886_v6  ;;  %2378 = vmatprep.mubr.bf16.mxu1 %v10886_v6  ;;  %v8917_v59 = vcombine.low %v1930_v47, %v1933_v51  ;;  %v3365_v47 = vshll.u32 %v9039_v42, 16  ;;  %v3369_v51 = vshrl.u32 %v9039_v42, 16  ;;  %v9048_v42 = vld [vmem:[%s11000_s15 + $0x34] sm:$0xf] }
 0x15b   : > { %v3367_v54 = vrot.slane %v3365_v47, 5 }
 0x160   : > { %8929 = vmatmul.mubr.msk.bf16.gmra.mrb[28].mxu0 %vm752_vm3, %v8912_v11  ;;  %8946 = vmatmul.mubr.msk.bf16.gmra.mrb[28].mxu1 %vm752_vm3, %v8912_v11  ;;  %v1940_v11 = vsel %vm11501_vm7, %v1938_v1, %v1939_v37  ;;  %v10747_v1 = vld [vmem:[%s11000_s15 + $0xb4] sm:$0xff]  }
 0x161   : > { %2195 = vmatprep.mubr.bf16.mxu0 %v10886_v6  ;;  %2388 = vmatprep.mubr.bf16.mxu1 %v10886_v6  ;;  %v8918_v49 = vcombine.low %v1937_v7, %v1940_v11  ;;  %v9040_v37 = vld [vmem:[%s11000_s15 + $0x14] sm:$0x1]  ;;  %v3380_v11 = vshrl.u32 %v9041_v62, 16  ;;  %v3441_v62 = vshrl.u32 %v9048_v42, 16 }
 0x162   : > { %v3375_v38 = vshll.u32 %v9040_v37, 16  ;;  %v9051_v37 = vld [vmem:[%s11000_s15 + $0x40] sm:$0xf] }
 0x163   : > { %v3443_v19 = vrot.slane %v3441_v62, 4 }
 0x168   : > { %8930 = vmatmul.mubr.msk.bf16.gmra.mrb[32].mxu0 %vm752_vm3, %v8913_v24  ;;  %8947 = vmatmul.mubr.msk.bf16.gmra.mrb[32].mxu1 %vm752_vm3, %v8913_v24  ;;  %v1947_v24 = vsel %vm11501_vm7, %v1945_v61, %v1946_v3  ;;  %v3382_v3 = vrot.slane %v3380_v11, 4 }
 0x169   : > { %2205 = vmatprep.mubr.bf16.mxu0 %v10886_v6  ;;  %2398 = vmatprep.mubr.bf16.mxu1 %v10886_v6  ;;  %v8919_v34 = vcombine.low %v1944_v23, %v1947_v24  ;;  %v3377_v24 = vrot.slane %v3375_v38, 5 }
 0x170   : > { %8931 = vmatmul.mubr.msk.bf16.gmra.mrb[36].mxu0 %vm752_vm3, %v8914_v9  ;;  %8948 = vmatmul.mubr.msk.bf16.gmra.mrb[36].mxu1 %vm752_vm3, %v8914_v9  ;;  %v8920_v9 = vcombine.low %v1951_v32, %v1954_v56  ;;  %v3386_v32 = vor.u32 %v3385_v22, %v3382_v3 }
 0x171   : > { %2215 = vmatprep.mubr.bf16.mxu0 %v10886_v6  ;;  %2408 = vmatprep.mubr.bf16.mxu1 %v10886_v6 }
 0x178   : > { %8932 = vmatmul.mubr.msk.bf16.gmra.mrb[40].mxu0 %vm752_vm3, %v8915_v14  ;;  %8949 = vmatmul.mubr.msk.bf16.gmra.mrb[40].mxu1 %vm752_vm3, %v8915_v14  ;;  %v10736_v14 = vld [vmem:[%s11000_s15 + $0x30] sm:$0xff]  }
 0x179   : > { %2225 = vmatprep.mubr.bf16.mxu0 %v10886_v6  ;;  %2418 = vmatprep.mubr.bf16.mxu1 %v10886_v6 }
 0x180   : > { %8933 = vmatmul.mubr.msk.bf16.gmra.mrb[44].mxu0 %vm752_vm3, %v8916_v20  ;;  %8950 = vmatmul.mubr.msk.bf16.gmra.mrb[44].mxu1 %vm752_vm3, %v8916_v20  ;;  %v9038_v20 = vld [vmem:[%s11000_s15 + $0xc] sm:$0xf] }
 0x181   : > { %2235 = vmatprep.mubr.bf16.mxu0 %v10886_v6  ;;  %2428 = vmatprep.mubr.bf16.mxu1 %v10886_v6  ;;  %v3356_v40 = vshrl.u32 %v9038_v20, 16  ;;  %v3359_v46 = vshll.u32 %v9038_v20, 16  ;;  %v4712_v20 = vsel %vm801_vm2, %v11711_v33, 0 }
 0x183   : > { %v3358_v52 = vrot.slane %v3356_v40, 4  ;;  %v3361_v53 = vrot.slane %v3359_v46, 5 }
 0x185   : > { %v3362_v7 = vor.u32 %v3361_v53, %v3358_v52 }
 0x187   : > { %v3363_v61 = vrot.slane %v3362_v7, 4 }
 0x188   : > { %8934 = vmatmul.mubr.msk.bf16.gmra.mrb[48].mxu0 %vm752_vm3, %v8917_v59  ;;  %8951 = vmatmul.mubr.msk.bf16.gmra.mrb[48].mxu1 %vm752_vm3, %v8917_v59  ;;  %v3371_v59 = vrot.slane %v3369_v51, 4 }
 0x189   : > { %2245 = vmatprep.mubr.bf16.mxu0 %v10886_v6  ;;  %2438 = vmatprep.mubr.bf16.mxu1 %v10886_v6  ;;  %v3368_v27 = vsel %vm11021_vm4, %v3363_v61, %v3367_v54  ;;  %v9049_v61 = vld [vmem:[%s11000_s15 + $0x38] sm:$0x1] }
 0x18a   : > { %v3372_v18 = vor.u32 %v3371_v59, %v3367_v54  ;;  %v3437_v59 = vshll.u32 %v9048_v42, 16 }
 0x18c   : > { %v3373_v23 = vrot.slane %v3372_v18, 4 }
 0x18e   : > { %v3378_v56 = vsel %vm11021_vm4, %v3373_v23, %v3377_v24  ;;  %v3461_v23 = vshll.u32 %v9051_v37, 16  ;;  %v3465_v24 = vshrl.u32 %v9051_v37, 16 }
 0x190   : > { %8935 = vmatmul.mubr.msk.bf16.gmra.mrb[52].mxu0 %vm752_vm3, %v8918_v49  ;;  %8952 = vmatmul.mubr.msk.bf16.gmra.mrb[52].mxu1 %vm752_vm3, %v8918_v49  ;;  %v3389_v49 = vshll.u32 %v9042_v60, 16 }
 0x191   : > { %2255 = vmatprep.mubr.bf16.mxu0 %v10886_v6  ;;  %2448 = vmatprep.mubr.bf16.mxu1 %v10886_v6 }
 0x192   : > { %v3391_v26 = vrot.slane %v3389_v49, 5  ;;  %v3439_v49 = vrot.slane %v3437_v59, 5 }
 0x198   : > { %8936 = vmatmul.mubr.msk.bf16.gmra.mrb[56].mxu0 %vm752_vm3, %v8919_v34  ;;  %8953 = vmatmul.mubr.msk.bf16.gmra.mrb[56].mxu1 %vm752_vm3, %v8919_v34  ;;  %v9043_v34 = vld [vmem:[%s11000_s15 + $0x20] sm:$0x1] }
 0x199   : > { %2265 = vmatprep.mubr.bf16.mxu0 %v10886_v6  ;;  %2458 = vmatprep.mubr.bf16.mxu1 %v10886_v6  ;;  %v3399_v29 = vshll.u32 %v9043_v34, 16  ;;  %v3444_v34 = vor.u32 %v3443_v19, %v3439_v49 }
 0x1a0   : > { %8937 = vmatmul.mubr.msk.bf16.gmra.mrb[60].mxu0 %vm752_vm3, %v8920_v9  ;;  %8954 = vmatmul.mubr.msk.bf16.gmra.mrb[60].mxu1 %vm752_vm3, %v8920_v9  ;;  %v3396_v9 = vor.u32 %v3395_v2, %v3391_v26 }
 0x1a1   : > { %2825 = vmatprep.mubr.bf16.mxu0 %v10886_v6  ;;  %3018 = vmatprep.mubr.bf16.mxu1 %v10886_v6 }
 0x1a8   : > { %9005 = vmatmul.mubr.msk.bf16.vlgmr.msra.gmra.mrb[0].mxu0 %vm752_vm3, %v10733_v21  ;;  %9022 = vmatmul.mubr.msk.bf16.vlgmr.msra.gmra.mrb[0].mxu1 %vm752_vm3, %v10733_v21  ;;  %v3407_v21 = vshll.u32 %v9044_v36, 16  ;;  %v3447_v36 = vshll.u32 %v9049_v61, 16 }
 0x1a9   : > { %3868 = vmatpush1.bf16.msra.mxu0 %v3856_v35  ;;  %4061 = vmatpush1.bf16.msra.mxu1 %v3862_v48  ;;  %v3413_v35 = vshll.u32 %v9045_v43, 16  ;;  %v3417_v48 = vshrl.u32 %v9045_v43, 16 }
 0x1aa   : > { %2835 = vmatprep.mubr.bf16.mxu0 %v10886_v6  ;;  %3028 = vmatprep.mubr.bf16.mxu1 %v10886_v6 }
 0x1ab   : > { %9218 = vmatprep.subr.msk.bf16.mxu0 %vm801_vm2, %v4655_v4  ;;  %9235 = vmatprep.subr.msk.bf16.mxu1 %vm801_vm2, %v4656_v12  ;;  %v9284_v4 = vld [vmem:[%s12966_s1 + $0x30] sm:$0xff]  ;;  %v9087_v12 = vcombine.low %v3368_v27, %v3378_v56  ;;  %v3467_v56 = vrot.slane %v3465_v24, 4  ;;  %v9060_v24 = vld [vmem:[%s11000_s15 + $0x64] sm:$0xf] }
 0x1b0   : > { %9006 = vmatmul.mubr.msk.bf16.gmra.mrb[4].mxu0 %vm752_vm3, %v10734_v63  ;;  %9023 = vmatmul.mubr.msk.bf16.gmra.mrb[4].mxu1 %vm752_vm3, %v10734_v63  ;;  %v3387_v63 = vrot.slane %v3386_v32, 4  ;;  %v3463_v32 = vrot.slane %v3461_v23, 5  ;;  %v9059_v23 = vld [vmem:[%s11000_s15 + $0x60] sm:$0xf] }
 0x1b1   : > { %2845 = vmatprep.mubr.bf16.mxu0 %v10886_v6  ;;  %3038 = vmatprep.mubr.bf16.mxu1 %v10886_v6 }
 0x1b2   : > { %v3392_v40 = vsel %vm11021_vm4, %v3387_v63, %v3391_v26  ;;  %v3468_v63 = vor.u32 %v3467_v56, %v3463_v32  ;;  %v3537_v56 = vshrl.u32 %v9060_v24, 16 }
 0x1b8   : > { %9007 = vmatmul.mubr.msk.bf16.gmra.mrb[8].mxu0 %vm752_vm3, %v10735_v41  ;;  %9024 = vmatmul.mubr.msk.bf16.gmra.mrb[8].mxu1 %vm752_vm3, %v10735_v41  ;;  %v5350_v41 = vcombine.high %v9284_v4, %v9284_v4 }
 0x1b9   : > { %2855 = vmatprep.mubr.bf16.mxu0 %v10886_v6  ;;  %3048 = vmatprep.mubr.bf16.mxu1 %v10886_v6 }
 0x1c0   : > { %9008 = vmatmul.mubr.msk.bf16.gmra.mrb[12].mxu0 %vm752_vm3, %v10736_v14  ;;  %9025 = vmatmul.mubr.msk.bf16.gmra.mrb[12].mxu1 %vm752_vm3, %v10736_v14  ;;  %v3397_v14 = vrot.slane %v3396_v9, 4  ;;  %v9052_v9 = vld [vmem:[%s11000_s15 + $0x44] sm:$0x1] }
 0x1c1   : > { %2865 = vmatprep.mubr.bf16.mxu0 %v10886_v6  ;;  %3058 = vmatprep.mubr.bf16.mxu1 %v10886_v6 }
 0x1c8   : > { %9009 = vmatmul.mubr.msk.bf16.gmra.mrb[16].mxu0 %vm752_vm3, %v10737_v50  ;;  %9026 = vmatmul.mubr.msk.bf16.gmra.mrb[16].mxu1 %vm752_vm3, %v10737_v50  ;;  %v3401_v50 = vrot.slane %v3399_v29, 5 }
 0x1c9   : > { %2875 = vmatprep.mubr.bf16.mxu0 %v10886_v6  ;;  %3068 = vmatprep.mubr.bf16.mxu1 %v10886_v6 }
 0x1d0   : > { %9010 = vmatmul.mubr.msk.bf16.gmra.mrb[20].mxu0 %vm752_vm3, %v10738_v39  ;;  %9027 = vmatmul.mubr.msk.bf16.gmra.mrb[20].mxu1 %vm752_vm3, %v10738_v39  ;;  %v3406_v39 = vrot.slane %v3404_v13, 4  ;;  %v9053_v13 = vld [vmem:[%s11000_s15 + $0x48] sm:$0xf] }
 0x1d1   : > { %2885 = vmatprep.mubr.bf16.mxu0 %v10886_v6  ;;  %3078 = vmatprep.mubr.bf16.mxu1 %v10886_v6 }
 0x1d8   : > { %9011 = vmatmul.mubr.msk.bf16.gmra.mrb[24].mxu0 %vm752_vm3, %v10739_v15  ;;  %9028 = vmatmul.mubr.msk.bf16.gmra.mrb[24].mxu1 %vm752_vm3, %v10739_v15  ;;  %v11818_v15 = vrot.slane %v9284_v4, %v10989_v10  ;;  %v3449_v4 = vrot.slane %v3447_v36, 5 }
 0x1d9   : > { %2895 = vmatprep.mubr.bf16.mxu0 %v10886_v6  ;;  %3088 = vmatprep.mubr.bf16.mxu1 %v10886_v6 }
 0x1da   : > { %v5365_v46 = vcombine.high %v11818_v15, %v11818_v15 }
 0x1e0   : > { %9012 = vmatmul.mubr.msk.bf16.gmra.mrb[28].mxu0 %vm752_vm3, %v10740_v45  ;;  %9029 = vmatmul.mubr.msk.bf16.gmra.mrb[28].mxu1 %vm752_vm3, %v10740_v45  ;;  %v3409_v45 = vrot.slane %v3407_v21, 5  ;;  %v9054_v21 = vld [vmem:[%s11000_s15 + $0x4c] sm:$0xf] }
 0x1e1   : > { %2905 = vmatprep.mubr.bf16.mxu0 %v10886_v6  ;;  %3098 = vmatprep.mubr.bf16.mxu1 %v10886_v6 }
 0x1e2   : > { %v3410_v33 = vor.u32 %v3409_v45, %v3406_v39  ;;  %v3485_v39 = vshll.u32 %v9054_v21, 16  ;;  %v3489_v45 = vshrl.u32 %v9054_v21, 16 }
 0x1e4   : > { %v3411_v7 = vrot.slane %v3410_v33, 4  ;;  %v9056_v33 = vld [vmem:[%s11000_s15 + $0x54] sm:$0xf] }
 0x1e5   : > { %v3503_v37 = vshll.u32 %v9056_v33, 16 }
 0x1e7   : > { %v3505_v19 = vrot.slane %v3503_v37, 5 }
 0x1e8   : > { %9013 = vmatmul.mubr.msk.bf16.gmra.mrb[32].mxu0 %vm752_vm3, %v10741_v57  ;;  %9030 = vmatmul.mubr.msk.bf16.gmra.mrb[32].mxu1 %vm752_vm3, %v10741_v57  ;;  %v3415_v57 = vrot.slane %v3413_v35, 5 }
 0x1e9   : > { %2915 = vmatprep.mubr.bf16.mxu0 %v10886_v6  ;;  %3108 = vmatprep.mubr.bf16.mxu1 %v10886_v6 }
 0x1ea   : > { %v3416_v26 = vsel %vm11021_vm4, %v3411_v7, %v3415_v57 }
 0x1f0   : > { %9014 = vmatmul.mubr.msk.bf16.gmra.mrb[36].mxu0 %vm752_vm3, %v10742_v25  ;;  %9031 = vmatmul.mubr.msk.bf16.gmra.mrb[36].mxu1 %vm752_vm3, %v10742_v25  ;;  %v3419_v25 = vrot.slane %v3417_v48, 4  ;;  %v3445_v48 = vrot.slane %v3444_v34, 4 }
 0x1f1   : > { %2925 = vmatprep.mubr.bf16.mxu0 %v10886_v6  ;;  %3118 = vmatprep.mubr.bf16.mxu1 %v10886_v6 }
 0x1f2   : > { %v3420_v51 = vor.u32 %v3419_v25, %v3415_v57  ;;  %v3450_v25 = vsel %vm11021_vm4, %v3445_v48, %v3449_v4 }
 0x1f4   : > { %v3421_v11 = vrot.slane %v3420_v51, 4  ;;  %v9057_v51 = vld [vmem:[%s11000_s15 + $0x58] sm:$0xf] }
 0x1f5   : > { %v3513_v7 = vshrl.u32 %v9057_v51, 16 }
 0x1f8   : > { %9015 = vmatmul.mubr.msk.bf16.gmra.mrb[40].mxu0 %vm752_vm3, %v10743_v31  ;;  %9032 = vmatmul.mubr.msk.bf16.gmra.mrb[40].mxu1 %vm752_vm3, %v10743_v31  ;;  %v11821_v31 = vrot.slane %v5350_v41, %v10989_v10  ;;  %v3471_v41 = vshll.u32 %v9052_v9, 16  ;;  %v9062_v9 = vld [vmem:[%s11000_s15 + $0x6c] sm:$0xf] }
 0x1f9   : > { %2935 = vmatprep.mubr.bf16.mxu0 %v10886_v6  ;;  %3128 = vmatprep.mubr.bf16.mxu1 %v10886_v6 }
 0x1fa   : > { %v5366_v47 = vcombine.high %v11821_v31, %v11821_v31 }
 0x200   : > { %9016 = vmatmul.mubr.msk.bf16.gmra.mrb[44].mxu0 %vm752_vm3, %v10744_v58  ;;  %9033 = vmatmul.mubr.msk.bf16.gmra.mrb[44].mxu1 %vm752_vm3, %v10744_v58  ;;  %v9046_v58 = vld [vmem:[%s11000_s15 + $0x2c] sm:$0x1] }
 0x201   : > { %2945 = vmatprep.mubr.bf16.mxu0 %v10886_v6  ;;  %3138 = vmatprep.mubr.bf16.mxu1 %v10886_v6  ;;  %v3423_v52 = vshll.u32 %v9046_v58, 16 }
 0x203   : > { %v3425_v16 = vrot.slane %v3423_v52, 5 }
 0x205   : > { %v3426_v2 = vsel %vm11021_vm4, %v3421_v11, %v3425_v16 }
 0x206   : > { %v9089_v29 = vcombine.low %v3416_v26, %v3426_v2 }
 0x208   : > { %9017 = vmatmul.mubr.msk.bf16.gmra.mrb[48].mxu0 %vm752_vm3, %v10745_v8  ;;  %9034 = vmatmul.mubr.msk.bf16.gmra.mrb[48].mxu1 %vm752_vm3, %v10745_v8  ;;  %v4706_v8 = vsel %vm801_vm2, %v11707_v30, 0  ;;  %v3402_v30 = vsel %vm11021_vm4, %v3397_v14, %v3401_v50  ;;  %v3476_v14 = vshrl.u32 %v9053_v13, 16  ;;  %v3479_v50 = vshll.u32 %v9053_v13, 16 }
 0x209   : > { %2955 = vmatprep.mubr.bf16.mxu0 %v10886_v6  ;;  %3148 = vmatprep.mubr.bf16.mxu1 %v10886_v6  ;;  %v9088_v60 = vcombine.low %v3392_v40, %v3402_v30  ;;  %v3487_v40 = vrot.slane %v3485_v39, 5  ;;  %v9055_v30 = vld [vmem:[%s11000_s15 + $0x50] sm:$0x1]  ;;  %v3551_v39 = vshll.u32 %v9062_v9, 16 }
 0x20a   : > { %v3481_v42 = vrot.slane %v3479_v50, 5  ;;  %v3495_v62 = vshll.u32 %v9055_v30, 16  ;;  %v3548_v50 = vshrl.u32 %v9062_v9, 16  ;;  %v9064_v30 = vld [vmem:[%s11000_s15 + $0x74] sm:$0x1] }
 0x20b   : > { %v3567_v37 = vshll.u32 %v9064_v30, 16  ;;  %v9074_v30 = vld [vmem:[%s11000_s15 + $0x9c] sm:$0xf] }
 0x210   : > { %9018 = vmatmul.mubr.msk.bf16.gmra.mrb[52].mxu0 %vm752_vm3, %v10746_v17  ;;  %9035 = vmatmul.mubr.msk.bf16.gmra.mrb[52].mxu1 %vm752_vm3, %v10746_v17  ;;  %v9047_v17 = vld [vmem:[%s11000_s15 + $0x30] sm:$0xf] }
 0x211   : > { %2965 = vmatprep.mubr.bf16.mxu0 %v10886_v6  ;;  %3158 = vmatprep.mubr.bf16.mxu1 %v10886_v6  ;;  %v3428_v53 = vshrl.u32 %v9047_v17, 16  ;;  %v3431_v54 = vshll.u32 %v9047_v17, 16  ;;  %v3478_v17 = vrot.slane %v3476_v14, 4  ;;  %v9061_v14 = vld [vmem:[%s11000_s15 + $0x68] sm:$0x1] }
 0x213   : > { %v3430_v18 = vrot.slane %v3428_v53, 4  ;;  %v3433_v38 = vrot.slane %v3431_v54, 5  ;;  %v3482_v54 = vor.u32 %v3481_v42, %v3478_v17  ;;  %v3543_v17 = vshll.u32 %v9061_v14, 16 }
 0x214   : > { %v3550_v42 = vrot.slane %v3548_v50, 4 }
 0x215   : > { %v3483_v16 = vrot.slane %v3482_v54, 4 }
 0x217   : > { %v3488_v26 = vsel %vm11021_vm4, %v3483_v16, %v3487_v40 }
 0x218   : > { %9019 = vmatmul.mubr.msk.bf16.gmra.mrb[56].mxu0 %vm752_vm3, %v10747_v1  ;;  %9036 = vmatmul.mubr.msk.bf16.gmra.mrb[56].mxu1 %vm752_vm3, %v10747_v1  ;;  %v9050_v1 = vld [vmem:[%s11000_s15 + $0x3c] sm:$0xf] }
 0x219   : > { %2975 = vmatprep.mubr.bf16.mxu0 %v10886_v6  ;;  %3168 = vmatprep.mubr.bf16.mxu1 %v10886_v6  ;;  %v3452_v3 = vshrl.u32 %v9050_v1, 16  ;;  %v3455_v22 = vshll.u32 %v9050_v1, 16  ;;  %v3500_v1 = vshrl.u32 %v9056_v33, 16 }
 0x21b   : > { %v3454_v43 = vrot.slane %v3452_v3, 4  ;;  %v3457_v27 = vrot.slane %v3455_v22, 5  ;;  %v3515_v3 = vrot.slane %v3513_v7, 4  ;;  %v9058_v22 = vld [vmem:[%s11000_s15 + $0x5c] sm:$0x1] }
 0x21c   : > { %v3519_v36 = vshll.u32 %v9058_v22, 16 }
 0x21e   : > { %v3521_v48 = vrot.slane %v3519_v36, 5 }
 0x220   : > { %9020 = vmatmul.mubr.msk.bf16.gmra.mrb[60].mxu0 %vm752_vm3, %v10748_v28  ;;  %9037 = vmatmul.mubr.msk.bf16.gmra.mrb[60].mxu1 %vm752_vm3, %v10748_v28  ;;  %v3434_v28 = vor.u32 %v3433_v38, %v3430_v18  ;;  %v3497_v38 = vrot.slane %v3495_v62, 5 }
 0x221   : > { %3899 = vmatprep.mubr.bf16.mxu0 %v10886_v6  ;;  %4092 = vmatprep.mubr.bf16.mxu1 %v10886_v6 }
 0x222   : > { %v3435_v35 = vrot.slane %v3434_v28, 4 }
 0x224   : > { %v3440_v57 = vsel %vm11021_vm4, %v3435_v35, %v3439_v49  ;;  %v3502_v49 = vrot.slane %v3500_v1, 4 }
 0x226   : > { %v3506_v28 = vor.u32 %v3505_v19, %v3502_v49 }
 0x228   : > { %9104 = vmatmul.mubr.msk.bf16.vlgmr.msra.gmra.mrb[0].mxu0 %vm752_vm3, %v9087_v12  ;;  %9121 = vmatmul.mubr.msk.bf16.vlgmr.msra.gmra.mrb[0].mxu1 %vm752_vm3, %v9087_v12  ;;  %v3458_v12 = vor.u32 %v3457_v27, %v3454_v43  ;;  %v3524_v43 = vshrl.u32 %v9059_v23, 16  ;;  %v3527_v27 = vshll.u32 %v9059_v23, 16  ;;  %v3507_v21 = vrot.slane %v3506_v28, 4  ;;  %v9068_v28 = vld [vmem:[%s11000_s15 + $0x84] sm:$0xf] }
 0x229   : > { %4718 = vmatpush1.bf16.msra.mxu0 %v4706_v8  ;;  %4911 = vmatpush1.bf16.msra.mxu1 %v4712_v20  ;;  %v3469_v8 = vrot.slane %v3468_v63, 4  ;;  %v3473_v20 = vrot.slane %v3471_v41, 5  ;;  %v3539_v41 = vrot.slane %v3537_v56, 4  ;;  %v3596_v9 = vshrl.u32 %v9068_v28, 16 }
 0x22a   : > { %3909 = vmatprep.mubr.bf16.mxu0 %v10886_v6  ;;  %4102 = vmatprep.mubr.bf16.mxu1 %v10886_v6  ;;  %v3459_v58 = vrot.slane %v3458_v12, 4  ;;  %v3526_v4 = vrot.slane %v3524_v43, 4  ;;  %v3529_v12 = vrot.slane %v3527_v27, 5 }
 0x22b   : > { %9301 = vmatprep.subr.msk.bf16.mxu0 %vm801_vm2, %v5365_v46  ;;  %9318 = vmatprep.subr.msk.bf16.mxu1 %vm801_vm2, %v5366_v47  ;;  %v3491_v46 = vrot.slane %v3489_v45, 4  ;;  %v9090_v47 = vcombine.low %v3440_v57, %v3450_v25  ;;  %v3474_v53 = vsel %vm11021_vm4, %v3469_v8, %v3473_v20 }
 0x22c   : > { %v3464_v52 = vsel %vm11021_vm4, %v3459_v58, %v3463_v32  ;;  %v3533_v32 = vshll.u32 %v9060_v24, 16  ;;  %v3530_v8 = vor.u32 %v3529_v12, %v3526_v4 }
 0x22d   : > { %v3492_v59 = vor.u32 %v3491_v46, %v3487_v40  ;;  %v9091_v11 = vcombine.low %v3464_v52, %v3474_v53  ;;  %v3553_v40 = vrot.slane %v3551_v39, 5  ;;  %v9066_v52 = vld [vmem:[%s11000_s15 + $0x7c] sm:$0xf]  ;;  %v9070_v39 = vld [vmem:[%s11000_s15 + $0x8c] sm:$0x1] }
 0x22e   : > { %v3535_v63 = vrot.slane %v3533_v32, 5  ;;  %v3531_v53 = vrot.slane %v3530_v8, 4  ;;  %v3585_v16 = vshrl.u32 %v9066_v52, 16 }
 0x22f   : > { %v3493_v18 = vrot.slane %v3492_v59, 4  ;;  %v3545_v59 = vrot.slane %v3543_v17, 5  ;;  %v3554_v62 = vor.u32 %v3553_v40, %v3550_v42  ;;  %v3615_v17 = vshll.u32 %v9070_v39, 16 }
 0x230   : > { %9105 = vmatmul.mubr.msk.bf16.gmra.mrb[4].mxu0 %vm752_vm3, %v9088_v60  ;;  %9122 = vmatmul.mubr.msk.bf16.gmra.mrb[4].mxu1 %vm752_vm3, %v9088_v60  ;;  %v3509_v60 = vshll.u32 %v9057_v51, 16  ;;  %v3540_v20 = vor.u32 %v3539_v41, %v3535_v63  ;;  %v9065_v51 = vld [vmem:[%s11000_s15 + $0x78] sm:$0xf]  ;;  %v3587_v24 = vrot.slane %v3585_v16, 4 }
 0x231   : > { %3919 = vmatprep.mubr.bf16.mxu0 %v10886_v6  ;;  %4112 = vmatprep.mubr.bf16.mxu1 %v10886_v6  ;;  %v3498_v2 = vsel %vm11021_vm4, %v3493_v18, %v3497_v38  ;;  %v3575_v7 = vshll.u32 %v9065_v51, 16  ;;  %v3536_v18 = vsel %vm11021_vm4, %v3531_v53, %v3535_v63  ;;  %v3555_v49 = vrot.slane %v3554_v62, 4 }
 0x232   : > { %v3511_v61 = vrot.slane %v3509_v60, 5  ;;  %v9092_v13 = vcombine.low %v3488_v26, %v3498_v2  ;;  %v3541_v54 = vrot.slane %v3540_v20, 4  ;;  %v3572_v60 = vshrl.u32 %v9065_v51, 16  ;;  %v9067_v2 = vld [vmem:[%s11000_s15 + $0x80] sm:$0x1] }
 0x233   : > { %v3577_v22 = vrot.slane %v3575_v7, 5  ;;  %v3591_v56 = vshll.u32 %v9067_v2, 16  ;;  %v3598_v63 = vrot.slane %v3596_v9, 4  ;;  %v3644_v7 = vshrl.u32 %v9074_v30, 16  ;;  %v9076_v2 = vld [vmem:[%s11000_s15 + $0xa4] sm:$0x1] }
 0x234   : > { %v3516_v34 = vor.u32 %v3515_v3, %v3511_v61  ;;  %v3512_v25 = vsel %vm11021_vm4, %v3507_v21, %v3511_v61  ;;  %v3546_v38 = vsel %vm11021_vm4, %v3541_v54, %v3545_v59  ;;  %v3569_v61 = vrot.slane %v3567_v37, 5 }
 0x235   : > { %v3574_v3 = vrot.slane %v3572_v60, 4  ;;  %v9094_v26 = vcombine.low %v3536_v18, %v3546_v38  ;;  %v3593_v12 = vrot.slane %v3591_v56, 5  ;;  %v3617_v54 = vrot.slane %v3615_v17, 5  ;;  %v9073_v60 = vld [vmem:[%s11000_s15 + $0x98] sm:$0x1] }
 0x236   : > { %v3517_v35 = vrot.slane %v3516_v34, 4  ;;  %v9069_v34 = vld [vmem:[%s11000_s15 + $0x88] sm:$0xf] }
 0x237   : > { %v3578_v27 = vor.u32 %v3577_v22, %v3574_v3  ;;  %v3609_v21 = vshrl.u32 %v9069_v34, 16  ;;  %v3639_v3 = vshll.u32 %v9073_v60, 16  ;;  %v3646_v22 = vrot.slane %v3644_v7, 4 }
 0x238   : > { %9106 = vmatmul.mubr.msk.bf16.gmra.mrb[8].mxu0 %vm752_vm3, %v9089_v29  ;;  %9123 = vmatmul.mubr.msk.bf16.gmra.mrb[8].mxu1 %vm752_vm3, %v9089_v29  ;;  %v9063_v29 = vld [vmem:[%s11000_s15 + $0x70] sm:$0xf]  ;;  %v3522_v58 = vsel %vm11021_vm4, %v3517_v35, %v3521_v48 }
 0x239   : > { %3929 = vmatprep.mubr.bf16.mxu0 %v10886_v6  ;;  %4122 = vmatprep.mubr.bf16.mxu1 %v10886_v6  ;;  %v3557_v45 = vshll.u32 %v9063_v29, 16  ;;  %v3561_v57 = vshrl.u32 %v9063_v29, 16  ;;  %v9093_v33 = vcombine.low %v3512_v25, %v3522_v58  ;;  %v3599_v29 = vshll.u32 %v9068_v28, 16 }
 0x23a   : > { %v3579_v48 = vrot.slane %v3578_v27, 4  ;;  %v3611_v50 = vrot.slane %v3609_v21, 4 }
 0x23b   : > { %v3559_v46 = vrot.slane %v3557_v45, 5  ;;  %v3601_v41 = vrot.slane %v3599_v29, 5  ;;  %v9071_v45 = vld [vmem:[%s11000_s15 + $0x90] sm:$0xf]  ;;  %v3663_v29 = vshll.u32 %v9076_v2, 16 }
 0x23c   : > { %v3620_v42 = vshrl.u32 %v9071_v45, 16  ;;  %v3623_v40 = vshll.u32 %v9071_v45, 16 }
 0x23d   : > { %v3560_v36 = vsel %vm11021_vm4, %v3555_v49, %v3559_v46  ;;  %v3602_v8 = vor.u32 %v3601_v41, %v3598_v63 }
 0x23e   : > { %v3622_v59 = vrot.slane %v3620_v42, 4  ;;  %v3625_v62 = vrot.slane %v3623_v40, 5 }
 0x240   : > { %9107 = vmatmul.mubr.msk.bf16.gmra.mrb[12].mxu0 %vm752_vm3, %v9090_v47  ;;  %9124 = vmatmul.mubr.msk.bf16.gmra.mrb[12].mxu1 %vm752_vm3, %v9090_v47  ;;  %v3563_v47 = vrot.slane %v3561_v57, 4  ;;  %v9072_v57 = vld [vmem:[%s11000_s15 + $0x94] sm:$0xf] }
 0x241   : > { %3939 = vmatprep.mubr.bf16.mxu0 %v10886_v6  ;;  %4132 = vmatprep.mubr.bf16.mxu1 %v10886_v6 }
 0x242   : > { %v3564_v1 = vor.u32 %v3563_v47, %v3559_v46  ;;  %v3629_v46 = vshll.u32 %v9072_v57, 16  ;;  %v3633_v47 = vshrl.u32 %v9072_v57, 16 }
 0x244   : > { %v3565_v19 = vrot.slane %v3564_v1, 4  ;;  %v3631_v1 = vrot.slane %v3629_v46, 5  ;;  %v3635_v37 = vrot.slane %v3633_v47, 4 }
 0x246   : > { %v3570_v43 = vsel %vm11021_vm4, %v3565_v19, %v3569_v61  ;;  %v3626_v19 = vor.u32 %v3625_v62, %v3622_v59  ;;  %v3636_v61 = vor.u32 %v3635_v37, %v3631_v1 }
 0x247   : > { %v9095_v35 = vcombine.low %v3560_v36, %v3570_v43  ;;  %v9078_v36 = vld [vmem:[%s11000_s15 + $0xac] sm:$0xf] }
 0x248   : > { %9108 = vmatmul.mubr.msk.bf16.gmra.mrb[16].mxu0 %vm752_vm3, %v9091_v11  ;;  %9125 = vmatmul.mubr.msk.bf16.gmra.mrb[16].mxu1 %vm752_vm3, %v9091_v11  ;;  %v3581_v11 = vshll.u32 %v9066_v52, 16  ;;  %v3603_v52 = vrot.slane %v3602_v8, 4  ;;  %v3627_v43 = vrot.slane %v3626_v19, 4  ;;  %v3637_v27 = vrot.slane %v3636_v61, 4  ;;  %v9080_v8 = vld [vmem:[%s11000_s15 + $0xb4] sm:$0xf] }
 0x249   : > { %3949 = vmatprep.mubr.bf16.mxu0 %v10886_v6  ;;  %4142 = vmatprep.mubr.bf16.mxu1 %v10886_v6 }
 0x24a   : > { %v3583_v23 = vrot.slane %v3581_v11, 5  ;;  %v3647_v11 = vshll.u32 %v9074_v30, 16  ;;  %v3692_v30 = vshrl.u32 %v9080_v8, 16 }
 0x24c   : > { %v3588_v32 = vor.u32 %v3587_v24, %v3583_v23  ;;  %v3584_v25 = vsel %vm11021_vm4, %v3579_v48, %v3583_v23  ;;  %v3649_v23 = vrot.slane %v3647_v11, 5  ;;  %v3681_v48 = vshrl.u32 %v9078_v36, 16  ;;  %v9082_v11 = vld [vmem:[%s11000_s15 + $0xbc] sm:$0x1] }
 0x24e   : > { %v3589_v4 = vrot.slane %v3588_v32, 4  ;;  %v3641_v32 = vrot.slane %v3639_v3, 5  ;;  %v3650_v56 = vor.u32 %v3649_v23, %v3646_v22  ;;  %v3683_v57 = vrot.slane %v3681_v48, 4 }
 0x24f   : > { %v3711_v3 = vshll.u32 %v9082_v11, 16  ;;  %v9144_v11 = vld [vmem:[%s11000_s15 + $0x28] sm:$0xf] }
 0x250   : > { %9109 = vmatmul.mubr.msk.bf16.gmra.mrb[20].mxu0 %vm752_vm3, %v9092_v13  ;;  %9126 = vmatmul.mubr.msk.bf16.gmra.mrb[20].mxu1 %vm752_vm3, %v9092_v13  ;;  %v3605_v13 = vshll.u32 %v9069_v34, 16  ;;  %v3594_v58 = vsel %vm11021_vm4, %v3589_v4, %v3593_v12  ;;  %v9077_v34 = vld [vmem:[%s11000_s15 + $0xa8] sm:$0xf]  ;;  %v3632_v4 = vsel %vm11021_vm4, %v3627_v43, %v3631_v1  ;;  %v3642_v12 = vsel %vm11021_vm4, %v3637_v27, %v3641_v32 }
 0x251   : > { %3959 = vmatprep.mubr.bf16.mxu0 %v10886_v6  ;;  %4152 = vmatprep.mubr.bf16.mxu1 %v10886_v6  ;;  %v9096_v51 = vcombine.low %v3584_v25, %v3594_v58  ;;  %v3671_v21 = vshll.u32 %v9077_v34, 16  ;;  %v3651_v63 = vrot.slane %v3650_v56, 4  ;;  %v9098_v25 = vcombine.low %v3632_v4, %v3642_v12  ;;  %v9079_v58 = vld [vmem:[%s11000_s15 + $0xb0] sm:$0x1] }
 0x252   : > { %v3607_v14 = vrot.slane %v3605_v13, 5  ;;  %v3668_v13 = vshrl.u32 %v9077_v34, 16  ;;  %v3687_v47 = vshll.u32 %v9079_v58, 16  ;;  %v3694_v1 = vrot.slane %v3692_v30, 4  ;;  %v9383_v30 = vld [vmem:[%s12966_s1 + $0x38] sm:$0xff] }
 0x253   : > { %v3673_v39 = vrot.slane %v3671_v21, 5 }
 0x254   : > { %v3612_v20 = vor.u32 %v3611_v50, %v3607_v14  ;;  %v3608_v38 = vsel %vm11021_vm4, %v3603_v52, %v3607_v14  ;;  %v3665_v14 = vrot.slane %v3663_v29, 5  ;;  %v3670_v50 = vrot.slane %v3668_v13, 4 }
 0x255   : > { %v3689_v62 = vrot.slane %v3687_v47, 5 }
 0x256   : > { %v3613_v53 = vrot.slane %v3612_v20, 4  ;;  %v9081_v20 = vld [vmem:[%s11000_s15 + $0xb8] sm:$0xf]  ;;  %v3674_v40 = vor.u32 %v3673_v39, %v3670_v50 }
 0x257   : > { %v3705_v52 = vshrl.u32 %v9081_v20, 16 }
 0x258   : > { %9110 = vmatmul.mubr.msk.bf16.gmra.mrb[24].mxu0 %vm752_vm3, %v9093_v33  ;;  %9127 = vmatmul.mubr.msk.bf16.gmra.mrb[24].mxu1 %vm752_vm3, %v9093_v33  ;;  %v9075_v33 = vld [vmem:[%s11000_s15 + $0xa0] sm:$0xf]  ;;  %v3618_v49 = vsel %vm11021_vm4, %v3613_v53, %v3617_v54  ;;  %v3675_v54 = vrot.slane %v3674_v40, 4 }
 0x259   : > { %3969 = vmatprep.mubr.bf16.mxu0 %v10886_v6  ;;  %4162 = vmatprep.mubr.bf16.mxu1 %v10886_v6  ;;  %v3653_v16 = vshll.u32 %v9075_v33, 16  ;;  %v3657_v18 = vshrl.u32 %v9075_v33, 16  ;;  %v9097_v28 = vcombine.low %v3608_v38, %v3618_v49  ;;  %v3695_v33 = vshll.u32 %v9080_v8, 16 }
 0x25a   : > { %v3707_v7 = vrot.slane %v3705_v52, 4  ;;  %v6424_v52 = vcombine.high %v9383_v30, %v9383_v30 }
 0x25b   : > { %v3655_v24 = vrot.slane %v3653_v16, 5  ;;  %v3697_v37 = vrot.slane %v3695_v33, 5  ;;  %v9083_v16 = vld [vmem:[%s11000_s15 + $0xc0] sm:$0xf]  ;;  %v9140_v33 = vld [vmem:[%s11000_s15 + $0x18] sm:$0xe] }
 0x25c   : > { %v3716_v22 = vshrl.u32 %v9083_v16, 16  ;;  %v3719_v23 = vshll.u32 %v9083_v16, 16 }
 0x25d   : > { %v3656_v17 = vsel %vm11021_vm4, %v3651_v63, %v3655_v24  ;;  %v3698_v19 = vor.u32 %v3697_v37, %v3694_v1 }
 0x25e   : > { %v3718_v43 = vrot.slane %v3716_v22, 4  ;;  %v3721_v27 = vrot.slane %v3719_v23, 5 }
 0x260   : > { %9111 = vmatmul.mubr.msk.bf16.gmra.mrb[28].mxu0 %vm752_vm3, %v9094_v26  ;;  %9128 = vmatmul.mubr.msk.bf16.gmra.mrb[28].mxu1 %vm752_vm3, %v9094_v26  ;;  %v3659_v26 = vrot.slane %v3657_v18, 4  ;;  %v9084_v18 = vld [vmem:[%s11000_s15 + $0xc4] sm:$0xf]  ;;  %v3722_v21 = vor.u32 %v3721_v27, %v3718_v43 }
 0x261   : > { %3979 = vmatprep.mubr.bf16.mxu0 %v10886_v6  ;;  %4172 = vmatprep.mubr.bf16.mxu1 %v10886_v6 }
 0x262   : > { %v3660_v9 = vor.u32 %v3659_v26, %v3655_v24  ;;  %v3725_v24 = vshll.u32 %v9084_v18, 16  ;;  %v3729_v26 = vshrl.u32 %v9084_v18, 16  ;;  %v3723_v12 = vrot.slane %v3722_v21, 4 }
 0x264   : > { %v3661_v41 = vrot.slane %v3660_v9, 4  ;;  %v3727_v32 = vrot.slane %v3725_v24, 5  ;;  %v3731_v56 = vrot.slane %v3729_v26, 4  ;;  %v9085_v9 = vld [vmem:[%s11000_s15 + $0xc8] sm:$0x1] }
 0x265   : > { %v3735_v48 = vshll.u32 %v9085_v9, 16  ;;  %v9147_v24 = vld [vmem:[%s11000_s15 + $0x34] sm:$0xf]  ;;  %v9150_v9 = vld [vmem:[%s11000_s15 + $0x40] sm:$0xf] }
 0x266   : > { %v3666_v42 = vsel %vm11021_vm4, %v3661_v41, %v3665_v14  ;;  %v9138_v14 = vld [vmem:[%s11000_s15 + $0x10] sm:$0xf]  ;;  %v3728_v50 = vsel %vm11021_vm4, %v3723_v12, %v3727_v32  ;;  %v4507_v21 = vrot.slane %v9150_v9, 5 }
 0x267   : > { %v9099_v53 = vcombine.low %v3656_v17, %v3666_v42  ;;  %v3737_v41 = vrot.slane %v3735_v48, 5  ;;  %v9141_v42 = vld [vmem:[%s11000_s15 + $0x1c] sm:$0xf]  ;;  %v9151_v48 = vld [vmem:[%s11000_s15 + $0x44] sm:$0x1] }
 0x268   : > { %9112 = vmatmul.mubr.msk.bf16.gmra.mrb[32].mxu0 %vm752_vm3, %v9095_v35  ;;  %9129 = vmatmul.mubr.msk.bf16.gmra.mrb[32].mxu1 %vm752_vm3, %v9095_v35  ;;  %v3677_v35 = vshll.u32 %v9078_v36, 16  ;;  %v3713_v36 = vrot.slane %v3711_v3, 5  ;;  %v4486_v47 = vrot.slane %v9141_v42, 5  ;;  %v9156_v42 = vld [vmem:[%s11000_s15 + $0x58] sm:$0xf] }
 0x269   : > { %3989 = vmatprep.mubr.bf16.mxu0 %v10886_v6  ;;  %4182 = vmatprep.mubr.bf16.mxu1 %v10886_v6 }
 0x26a   : > { %v3679_v45 = vrot.slane %v3677_v35, 5  ;;  %v3732_v35 = vor.u32 %v3731_v56, %v3727_v32  ;;  %v4488_v1 = vrot.slane %v4486_v47, 4 }
 0x26c   : > { %v3684_v46 = vor.u32 %v3683_v57, %v3679_v45  ;;  %v3680_v38 = vsel %vm11021_vm4, %v3675_v54, %v3679_v45  ;;  %v3733_v63 = vrot.slane %v3732_v35, 4  ;;  %v4479_v45 = vrot.slane %v9138_v14, 5  ;;  %v9137_v57 = vld [vmem:[%s11000_s15 + $0xc] sm:$0xe]  ;;  %v9149_v35 = vld [vmem:[%s11000_s15 + $0x3c] sm:$0xe] }
 0x26d   : > { %v9185_v8 = vrot.slane %v9137_v57, 9  ;;  %v9189_v12 = vrot.slane %v9149_v35, 9  ;;  %v9153_v14 = vld [vmem:[%s11000_s15 + $0x4c] sm:$0xf]  ;;  %v9152_v57 = vld [vmem:[%s11000_s15 + $0x48] sm:$0xe] }
 0x26e   : > { %v3685_v59 = vrot.slane %v3684_v46, 4  ;;  %v3738_v39 = vsel %vm11021_vm4, %v3733_v63, %v3737_v41  ;;  %v4509_v63 = vrot.slane %v4507_v21, 4  ;;  %v4510_v41 = vrot.slane %v9151_v48, 5  ;;  %v9168_v35 = vld [vmem:[%s11000_s15 + $0x88] sm:$0xf] }
 0x26f   : > { %v9102_v58 = vcombine.low %v3728_v50, %v3738_v39  ;;  %v4480_v40 = vsel %vm11501_vm7, %v9185_v8, %v4479_v45  ;;  %v4508_v50 = vsel %vm11501_vm7, %v9189_v12, %v4507_v21  ;;  %v9190_v8 = vrot.slane %v9152_v57, 9  ;;  %v9171_v57 = vld [vmem:[%s11000_s15 + $0x94] sm:$0xf] }
 0x270   : > { %9113 = vmatmul.mubr.msk.bf16.gmra.mrb[36].mxu0 %vm752_vm3, %v9096_v51  ;;  %9130 = vmatmul.mubr.msk.bf16.gmra.mrb[36].mxu1 %vm752_vm3, %v9096_v51  ;;  %v3701_v51 = vshll.u32 %v9081_v20, 16  ;;  %v3690_v49 = vsel %vm11021_vm4, %v3685_v59, %v3689_v62  ;;  %v4481_v20 = vrot.slane %v4479_v45, 4  ;;  %v12014_v59 = vrot.slane %v6424_v52, %v10989_v10 }
 0x271   : > { %3999 = vmatprep.mubr.bf16.mxu0 %v10886_v6  ;;  %4192 = vmatprep.mubr.bf16.mxu1 %v10886_v6  ;;  %v9100_v2 = vcombine.low %v3680_v38, %v3690_v49  ;;  %v9186_v62 = vrot.slane %v9140_v33, 9  ;;  %v4493_v38 = vrot.slane %v9144_v11, 5  ;;  %v9143_v49 = vld [vmem:[%s11000_s15 + $0x24] sm:$0xe]  ;;  %v4511_v39 = vsel %vm11501_vm7, %v4509_v63, %v4510_v41  ;;  %v9157_v33 = vld [vmem:[%s11000_s15 + $0x5c] sm:$0x1] }
 0x272   : > { %v3703_v60 = vrot.slane %v3701_v51, 5  ;;  %v9142_v51 = vld [vmem:[%s11000_s15 + $0x20] sm:$0x1]  ;;  %v6440_v18 = vcombine.high %v12014_v59, %v12014_v59  ;;  %v9187_v3 = vrot.slane %v9143_v49, 9  ;;  %v4514_v45 = vrot.slane %v9153_v14, 5 }
 0x273   : > { %v4489_v37 = vrot.slane %v9142_v51, 5  ;;  %v4495_v22 = vrot.slane %v4493_v38, 4  ;;  %v9158_v11 = vld [vmem:[%s11000_s15 + $0x60] sm:$0xe]  ;;  %v9162_v49 = vld [vmem:[%s11000_s15 + $0x70] sm:$0xf] }
 0x274   : > { %v3708_v61 = vor.u32 %v3707_v7, %v3703_v60  ;;  %v5422_v7 = vsel %vm801_vm2, %v11821_v31, 0  ;;  %v4494_v26 = vsel %vm11501_vm7, %v9187_v3, %v4493_v38  ;;  %v4535_v3 = vrot.slane %v9162_v49, 5  ;;  %v9167_v63 = vld [vmem:[%s11000_s15 + $0x84] sm:$0xe]  ;;  %v9169_v41 = vld [vmem:[%s11000_s15 + $0x8c] sm:$0x1] }
 0x275   : > { %v4490_v31 = vsel %vm11501_vm7, %v4488_v1, %v4489_v37  ;;  %v9159_v1 = vld [vmem:[%s11000_s15 + $0x64] sm:$0xf]  ;;  %v4549_v12 = vrot.slane %v9168_v35, 5 }
 0x276   : > { %v3709_v34 = vrot.slane %v3708_v61, 4 }
 0x278   : > { %9114 = vmatmul.mubr.msk.bf16.gmra.mrb[40].mxu0 %vm752_vm3, %v9097_v28  ;;  %9131 = vmatmul.mubr.msk.bf16.gmra.mrb[40].mxu1 %vm752_vm3, %v9097_v28  ;;  %v3699_v28 = vrot.slane %v3698_v19, 4  ;;  %v3714_v13 = vsel %vm11021_vm4, %v3709_v34, %v3713_v36  ;;  %v9145_v19 = vld [vmem:[%s11000_s15 + $0x2c] sm:$0x1]  ;;  %v9146_v34 = vld [vmem:[%s11000_s15 + $0x30] sm:$0xe] }
 0x279   : > { %4009 = vmatprep.mubr.bf16.mxu0 %v10886_v6  ;;  %4202 = vmatprep.mubr.bf16.mxu1 %v10886_v6  ;;  %v4496_v23 = vrot.slane %v9145_v19, 5  ;;  %v9148_v36 = vld [vmem:[%s11000_s15 + $0x38] sm:$0x1]  ;;  %v9188_v27 = vrot.slane %v9146_v34, 9  ;;  %v9165_v34 = vld [vmem:[%s11000_s15 + $0x7c] sm:$0xf] }
 0x27a   : > { %v3704_v29 = vsel %vm11021_vm4, %v3699_v28, %v3703_v60  ;;  %v5416_v60 = vsel %vm801_vm2, %v11818_v15, 0  ;;  %v4487_v15 = vsel %vm11501_vm7, %v9186_v62, %v4486_v47  ;;  %v4500_v28 = vrot.slane %v9147_v24, 5 }
 0x27b   : > { %v9101_v4 = vcombine.low %v3704_v29, %v3714_v13  ;;  %v9203_v61 = vcombine.low %v4487_v15, %v4490_v31  ;;  %v4503_v56 = vrot.slane %v9148_v36, 5  ;;  %v4521_v47 = vrot.slane %v9156_v42, 5 }
 0x27c   : > { %v4502_v32 = vrot.slane %v4500_v28, 4  ;;  %v4501_v29 = vsel %vm11501_vm7, %v9188_v27, %v4500_v28  ;;  %v4524_v62 = vrot.slane %v9157_v33, 5  ;;  %v9192_v15 = vrot.slane %v9158_v11, 9  ;;  %v9177_v11 = vld [vmem:[%s11000_s15 + $0xac] sm:$0xf] }
 0x27d   : > { %v4542_v27 = vrot.slane %v9165_v34, 5 }
 0x27e   : > { %v4504_v13 = vsel %vm11501_vm7, %v4502_v32, %v4503_v56  ;;  %v9164_v32 = vld [vmem:[%s11000_s15 + $0x78] sm:$0xe]  ;;  %v9166_v56 = vld [vmem:[%s11000_s15 + $0x80] sm:$0x1] }
 0x27f   : > { %v4545_v21 = vrot.slane %v9166_v56, 5 }
 0x280   : > { %9115 = vmatmul.mubr.msk.bf16.gmra.mrb[44].mxu0 %vm752_vm3, %v9098_v25  ;;  %9132 = vmatmul.mubr.msk.bf16.gmra.mrb[44].mxu1 %vm752_vm3, %v9098_v25  ;;  %v9139_v25 = vld [vmem:[%s11000_s15 + $0x14] sm:$0x1] }
 0x281   : > { %4019 = vmatprep.mubr.bf16.mxu0 %v10886_v6  ;;  %4212 = vmatprep.mubr.bf16.mxu1 %v10886_v6  ;;  %v4482_v17 = vrot.slane %v9139_v25, 5  ;;  %v9154_v25 = vld [vmem:[%s11000_s15 + $0x50] sm:$0x1] }
 0x283   : > { %v4483_v46 = vsel %vm11501_vm7, %v4481_v20, %v4482_v17  ;;  %v4516_v20 = vrot.slane %v4514_v45, 4  ;;  %v4517_v17 = vrot.slane %v9154_v25, 5 }
 0x284   : > { %v9202_v54 = vcombine.low %v4480_v40, %v4483_v46  ;;  %v4515_v40 = vsel %vm11501_vm7, %v9190_v8, %v4514_v45  ;;  %v4552_v45 = vrot.slane %v9169_v41, 5  ;;  %v4556_v8 = vrot.slane %v9171_v57, 5  ;;  %v10752_v57 = vld [vmem:[%s11000_s15 + $0x18] sm:$0xff]  }
 0x285   : > { %v4518_v46 = vsel %vm11501_vm7, %v4516_v20, %v4517_v17  ;;  %v9170_v20 = vld [vmem:[%s11000_s15 + $0x90] sm:$0xe]  ;;  %v9172_v17 = vld [vmem:[%s11000_s15 + $0x98] sm:$0x1] }
 0x286   : > { %v9207_v51 = vcombine.low %v4515_v40, %v4518_v46  ;;  %v9196_v40 = vrot.slane %v9170_v20, 9  ;;  %v4558_v46 = vrot.slane %v4556_v8, 4 }
 0x288   : > { %9116 = vmatmul.mubr.msk.bf16.gmra.mrb[48].mxu0 %vm752_vm3, %v9099_v53  ;;  %9133 = vmatmul.mubr.msk.bf16.gmra.mrb[48].mxu1 %vm752_vm3, %v9099_v53  ;;  %v12011_v53 = vrot.slane %v9383_v30, %v10989_v10  ;;  %v9155_v30 = vld [vmem:[%s11000_s15 + $0x54] sm:$0xe]  ;;  %v4557_v33 = vsel %vm11501_vm7, %v9196_v40, %v4556_v8  ;;  %v6496_v8 = vsel %vm801_vm2, %v12014_v59, 0  ;;  %v10755_v59 = vld [vmem:[%s11000_s15 + $0x3c] sm:$0xff]  }
 0x289   : > { %4029 = vmatprep.mubr.bf16.mxu0 %v10886_v6  ;;  %4222 = vmatprep.mubr.bf16.mxu1 %v10886_v6  ;;  %v9191_v52 = vrot.slane %v9155_v30, 9  ;;  %v9174_v30 = vld [vmem:[%s11000_s15 + $0xa0] sm:$0xf]  ;;  %v10757_v40 = vld [vmem:[%s11000_s15 + $0x54] sm:$0xff]  }
 0x28a   : > { %v6439_v16 = vcombine.high %v12011_v53, %v12011_v53 }
 0x28b   : > { %v4522_v37 = vsel %vm11501_vm7, %v9191_v52, %v4521_v47  ;;  %v4563_v52 = vrot.slane %v9174_v30, 5  ;;  %v10760_v30 = vld [vmem:[%s11000_s15 + $0x78] sm:$0xff]  }
 0x290   : > { %9117 = vmatmul.mubr.msk.bf16.gmra.mrb[52].mxu0 %vm752_vm3, %v9100_v2  ;;  %9134 = vmatmul.mubr.msk.bf16.gmra.mrb[52].mxu1 %vm752_vm3, %v9100_v2  ;;  %v4497_v2 = vsel %vm11501_vm7, %v4495_v22, %v4496_v23  ;;  %v9161_v22 = vld [vmem:[%s11000_s15 + $0x6c] sm:$0xe]  ;;  %v9163_v23 = vld [vmem:[%s11000_s15 + $0x74] sm:$0x1] }
 0x291   : > { %4039 = vmatprep.mubr.bf16.mxu0 %v10886_v6  ;;  %4232 = vmatprep.mubr.bf16.mxu1 %v10886_v6  ;;  %v9204_v43 = vcombine.low %v4494_v26, %v4497_v2  ;;  %v9193_v26 = vrot.slane %v9161_v22, 9  ;;  %v4537_v2 = vrot.slane %v4535_v3, 4  ;;  %v4538_v28 = vrot.slane %v9163_v23, 5  ;;  %v9180_v22 = vld [vmem:[%s11000_s15 + $0xb8] sm:$0xf] }
 0x293   : > { %v4536_v36 = vsel %vm11501_vm7, %v9193_v26, %v4535_v3  ;;  %v4577_v26 = vrot.slane %v9180_v22, 5 }
 0x298   : > { %9118 = vmatmul.mubr.msk.bf16.gmra.mrb[56].mxu0 %vm752_vm3, %v9101_v4  ;;  %9135 = vmatmul.mubr.msk.bf16.gmra.mrb[56].mxu1 %vm752_vm3, %v9101_v4  ;;  %v9205_v4 = vcombine.low %v4501_v29, %v4504_v13  ;;  %v9194_v29 = vrot.slane %v9164_v32, 9  ;;  %v4544_v13 = vrot.slane %v4542_v27, 4  ;;  %v9183_v32 = vld [vmem:[%s11000_s15 + $0xc4] sm:$0xf] }
 0x299   : > { %4049 = vmatprep.mubr.bf16.mxu0 %v10886_v6  ;;  %4242 = vmatprep.mubr.bf16.mxu1 %v10886_v6 }
 0x29a   : > { %v4543_v48 = vsel %vm11501_vm7, %v9194_v29, %v4542_v27  ;;  %v4584_v29 = vrot.slane %v9183_v32, 5 }
 0x2a0   : > { %9119 = vmatmul.mubr.msk.bf16.gmra.mrb[60].mxu0 %vm752_vm3, %v9102_v58  ;;  %9136 = vmatmul.mubr.msk.bf16.gmra.mrb[60].mxu1 %vm752_vm3, %v9102_v58  ;;  %v9206_v58 = vcombine.low %v4508_v50, %v4511_v39  ;;  %v9195_v50 = vrot.slane %v9167_v63, 9  ;;  %v4551_v39 = vrot.slane %v4549_v12, 4 }
 0x2a1   : > { %4749 = vmatprep.mubr.bf16.mxu0 %v10886_v6  ;;  %4942 = vmatprep.mubr.bf16.mxu1 %v10886_v6 }
 0x2a2   : > { %v4550_v25 = vsel %vm11501_vm7, %v9195_v50, %v4549_v12  ;;  %v9498_v50 = vld [vmem:[%s12966_s1 + $0x40] sm:$0xff] }
 0x2a8   : > { %9219 = vmatmul.mubr.msk.bf16.vlgmr.msra.gmra.mrb[0].mxu0 %vm752_vm3, %v9202_v54  ;;  %9236 = vmatmul.mubr.msk.bf16.vlgmr.msra.gmra.mrb[0].mxu1 %vm752_vm3, %v9202_v54  ;;  %v4523_v54 = vrot.slane %v4521_v47, 4  ;;  %v4559_v47 = vrot.slane %v9172_v17, 5 }
 0x2a9   : > { %5428 = vmatpush1.bf16.msra.mxu0 %v5416_v60  ;;  %5621 = vmatpush1.bf16.msra.mxu1 %v5422_v7  ;;  %v4528_v7 = vrot.slane %v9159_v1, 5 }
 0x2aa   : > { %4759 = vmatprep.mubr.bf16.mxu0 %v10886_v6  ;;  %4952 = vmatprep.mubr.bf16.mxu1 %v10886_v6  ;;  %v4525_v60 = vsel %vm11501_vm7, %v4523_v54, %v4524_v62  ;;  %v9173_v54 = vld [vmem:[%s11000_s15 + $0x9c] sm:$0xe]  ;;  %v9175_v62 = vld [vmem:[%s11000_s15 + $0xa4] sm:$0x1] }
 0x2ab   : > { %9400 = vmatprep.subr.msk.bf16.mxu0 %vm801_vm2, %v6439_v16  ;;  %9417 = vmatprep.subr.msk.bf16.mxu1 %vm801_vm2, %v6440_v18  ;;  %v9160_v16 = vld [vmem:[%s11000_s15 + $0x68] sm:$0x1]  ;;  %v9208_v18 = vcombine.low %v4522_v37, %v4525_v60  ;;  %v4530_v31 = vrot.slane %v4528_v7, 4  ;;  %v4529_v19 = vsel %vm11501_vm7, %v9192_v15, %v4528_v7  ;;  %v9197_v37 = vrot.slane %v9173_v54, 9 }
 0x2ac   : > { %v4531_v38 = vrot.slane %v9160_v16, 5  ;;  %v4565_v60 = vrot.slane %v4563_v52, 4  ;;  %v4566_v7 = vrot.slane %v9175_v62, 5  ;;  %v4570_v15 = vrot.slane %v9177_v11, 5  ;;  %v10764_v54 = vld [vmem:[%s11000_s15 + $0xa8] sm:$0xff]  }
 0x2ad   : > { %v4564_v16 = vsel %vm11501_vm7, %v9197_v37, %v4563_v52  ;;  %v10763_v52 = vld [vmem:[%s11000_s15 + $0x9c] sm:$0xff]   ;;  %v9335_v62 = vld [vmem:[%s11000_s15 + $0x18] sm:$0xf] }
 0x2ae   : > { %v10765_v37 = vld [vmem:[%s11000_s15 + $0xb4] sm:$0xff]  }
 0x2b0   : > { %9220 = vmatmul.mubr.msk.bf16.gmra.mrb[4].mxu0 %vm752_vm3, %v9203_v61  ;;  %9237 = vmatmul.mubr.msk.bf16.gmra.mrb[4].mxu1 %vm752_vm3, %v9203_v61  ;;  %v4532_v61 = vsel %vm11501_vm7, %v4530_v31, %v4531_v38  ;;  %v9176_v31 = vld [vmem:[%s11000_s15 + $0xa8] sm:$0xe]  ;;  %v9178_v38 = vld [vmem:[%s11000_s15 + $0xb0] sm:$0x1] }
 0x2b1   : > { %4769 = vmatprep.mubr.bf16.mxu0 %v10886_v6  ;;  %4962 = vmatprep.mubr.bf16.mxu1 %v10886_v6  ;;  %v9209_v24 = vcombine.low %v4529_v19, %v4532_v61  ;;  %v9198_v19 = vrot.slane %v9176_v31, 9  ;;  %v4572_v61 = vrot.slane %v4570_v15, 4  ;;  %v4573_v3 = vrot.slane %v9178_v38, 5 }
 0x2b3   : > { %v4571_v23 = vsel %vm11501_vm7, %v9198_v19, %v4570_v15  ;;  %v10766_v19 = vld [vmem:[%s11000_s15 + $0xc0] sm:$0xff]  }
 0x2b8   : > { %9221 = vmatmul.mubr.msk.bf16.gmra.mrb[8].mxu0 %vm752_vm3, %v9204_v43  ;;  %9238 = vmatmul.mubr.msk.bf16.gmra.mrb[8].mxu1 %vm752_vm3, %v9204_v43  ;;  %v4539_v43 = vsel %vm11501_vm7, %v4537_v2, %v4538_v28  ;;  %v9179_v2 = vld [vmem:[%s11000_s15 + $0xb4] sm:$0xe]  ;;  %v9181_v28 = vld [vmem:[%s11000_s15 + $0xbc] sm:$0x1] }
 0x2b9   : > { %4779 = vmatprep.mubr.bf16.mxu0 %v10886_v6  ;;  %4972 = vmatprep.mubr.bf16.mxu1 %v10886_v6  ;;  %v9210_v9 = vcombine.low %v4536_v36, %v4539_v43  ;;  %v9199_v36 = vrot.slane %v9179_v2, 9  ;;  %v4579_v43 = vrot.slane %v4577_v26, 4  ;;  %v4580_v27 = vrot.slane %v9181_v28, 5 }
 0x2bb   : > { %v4578_v56 = vsel %vm11501_vm7, %v9199_v36, %v4577_v26 }
 0x2c0   : > { %9222 = vmatmul.mubr.msk.bf16.gmra.mrb[12].mxu0 %vm752_vm3, %v9205_v4  ;;  %9239 = vmatmul.mubr.msk.bf16.gmra.mrb[12].mxu1 %vm752_vm3, %v9205_v4  ;;  %v4546_v4 = vsel %vm11501_vm7, %v4544_v13, %v4545_v21  ;;  %v9182_v13 = vld [vmem:[%s11000_s15 + $0xc0] sm:$0xe]  ;;  %v9184_v21 = vld [vmem:[%s11000_s15 + $0xc8] sm:$0x1] }
 0x2c1   : > { %4789 = vmatprep.mubr.bf16.mxu0 %v10886_v6  ;;  %4982 = vmatprep.mubr.bf16.mxu1 %v10886_v6  ;;  %v9211_v14 = vcombine.low %v4543_v48, %v4546_v4  ;;  %v9200_v48 = vrot.slane %v9182_v13, 9  ;;  %v4586_v4 = vrot.slane %v4584_v29, 4  ;;  %v4587_v12 = vrot.slane %v9184_v21, 5  ;;  %v10767_v13 = vld [vmem:[%s11000_s15 + $0xcc] sm:$0xff]  }
 0x2c2   : > { %v9340_v21 = vld [vmem:[%s11000_s15 + $0x2c] sm:$0x1] }
 0x2c3   : > { %v4585_v63 = vsel %vm11501_vm7, %v9200_v48, %v4584_v29  ;;  %v4588_v41 = vsel %vm11501_vm7, %v4586_v4, %v4587_v12  ;;  %v9342_v48 = vld [vmem:[%s11000_s15 + $0x34] sm:$0xf] }
 0x2c8   : > { %9223 = vmatmul.mubr.msk.bf16.gmra.mrb[16].mxu0 %vm752_vm3, %v9206_v58  ;;  %9240 = vmatmul.mubr.msk.bf16.gmra.mrb[16].mxu1 %vm752_vm3, %v9206_v58  ;;  %v4553_v58 = vsel %vm11501_vm7, %v4551_v39, %v4552_v45  ;;  %v7274_v39 = vcombine.high %v9498_v50, %v9498_v50  ;;  %v12196_v45 = vrot.slane %v9498_v50, %v10989_v10 }
 0x2c9   : > { %4799 = vmatprep.mubr.bf16.mxu0 %v10886_v6  ;;  %4992 = vmatprep.mubr.bf16.mxu1 %v10886_v6  ;;  %v9212_v42 = vcombine.low %v4550_v25, %v4553_v58  ;;  %v6490_v58 = vsel %vm801_vm2, %v12011_v53, 0  ;;  %v10754_v53 = vld [vmem:[%s11000_s15 + $0x30] sm:$0xff]  }
 0x2ca   : > { %v12200_v25 = vrot.slane %v7274_v39, %v10989_v10  ;;  %v7289_v20 = vcombine.high %v12196_v45, %v12196_v45  ;;  %v10753_v10 = vld [vmem:[%s11000_s15 + $0x24] sm:$0xff]  }
 0x2cc   : > { %v7290_v17 = vcombine.high %v12200_v25, %v12200_v25 }
 0x2d0   : > { %9224 = vmatmul.mubr.msk.bf16.gmra.mrb[20].mxu0 %vm752_vm3, %v9207_v51  ;;  %9241 = vmatmul.mubr.msk.bf16.gmra.mrb[20].mxu1 %vm752_vm3, %v9207_v51  ;;  %v4560_v51 = vsel %vm11501_vm7, %v4558_v46, %v4559_v47  ;;  %v10758_v46 = vld [vmem:[%s11000_s15 + $0x60] sm:$0xff]   ;;  %v10759_v47 = vld [vmem:[%s11000_s15 + $0x6c] sm:$0xff]  }
 0x2d1   : > { %4809 = vmatprep.mubr.bf16.mxu0 %v10886_v6  ;;  %5002 = vmatprep.mubr.bf16.mxu1 %v10886_v6  ;;  %v9213_v1 = vcombine.low %v4557_v33, %v4560_v51  ;;  %v10761_v33 = vld [vmem:[%s11000_s15 + $0x84] sm:$0xff]   ;;  %v10762_v51 = vld [vmem:[%s11000_s15 + $0x90] sm:$0xff]  }
 0x2d8   : > { %9225 = vmatmul.mubr.msk.bf16.gmra.mrb[24].mxu0 %vm752_vm3, %v9208_v18  ;;  %9242 = vmatmul.mubr.msk.bf16.gmra.mrb[24].mxu1 %vm752_vm3, %v9208_v18  ;;  %v4567_v18 = vsel %vm11501_vm7, %v4565_v60, %v4566_v7  ;;  %v5990_v60 = vshrl.u32 %v9335_v62, 16  ;;  %v5993_v7 = vshll.u32 %v9335_v62, 16 }
 0x2d9   : > { %4819 = vmatprep.mubr.bf16.mxu0 %v10886_v6  ;;  %5012 = vmatprep.mubr.bf16.mxu1 %v10886_v6  ;;  %v9214_v49 = vcombine.low %v4564_v16, %v4567_v18 }
 0x2da   : > { %v5992_v18 = vrot.slane %v5990_v60, 4  ;;  %v5995_v15 = vrot.slane %v5993_v7, 5 }
 0x2dc   : > { %v5996_v22 = vor.u32 %v5995_v15, %v5992_v18 }
 0x2de   : > { %v5997_v36 = vrot.slane %v5996_v22, 4  ;;  %v9346_v22 = vld [vmem:[%s11000_s15 + $0x44] sm:$0x1] }
 0x2e0   : > { %9226 = vmatmul.mubr.msk.bf16.gmra.mrb[28].mxu0 %vm752_vm3, %v9209_v24  ;;  %9243 = vmatmul.mubr.msk.bf16.gmra.mrb[28].mxu1 %vm752_vm3, %v9209_v24  ;;  %v4574_v24 = vsel %vm11501_vm7, %v4572_v61, %v4573_v3  ;;  %v9338_v61 = vld [vmem:[%s11000_s15 + $0x24] sm:$0xf]  ;;  %v9339_v3 = vld [vmem:[%s11000_s15 + $0x28] sm:$0xf] }
 0x2e1   : > { %4829 = vmatprep.mubr.bf16.mxu0 %v10886_v6  ;;  %5022 = vmatprep.mubr.bf16.mxu1 %v10886_v6  ;;  %v9215_v34 = vcombine.low %v4571_v23, %v4574_v24  ;;  %v6014_v26 = vshrl.u32 %v9338_v61, 16  ;;  %v6017_v2 = vshll.u32 %v9338_v61, 16  ;;  %v6023_v28 = vshll.u32 %v9339_v3, 16 }
 0x2e3   : > { %v6016_v32 = vrot.slane %v6014_v26, 4 }
 0x2e8   : > { %9227 = vmatmul.mubr.msk.bf16.gmra.mrb[32].mxu0 %vm752_vm3, %v9210_v9  ;;  %9244 = vmatmul.mubr.msk.bf16.gmra.mrb[32].mxu1 %vm752_vm3, %v9210_v9  ;;  %v4581_v9 = vsel %vm11501_vm7, %v4579_v43, %v4580_v27 }
 0x2e9   : > { %4839 = vmatprep.mubr.bf16.mxu0 %v10886_v6  ;;  %5032 = vmatprep.mubr.bf16.mxu1 %v10886_v6  ;;  %v9216_v35 = vcombine.low %v4578_v56, %v4581_v9  ;;  %v6019_v56 = vrot.slane %v6017_v2, 5  ;;  %v6025_v9 = vrot.slane %v6023_v28, 5 }
 0x2f0   : > { %9228 = vmatmul.mubr.msk.bf16.gmra.mrb[36].mxu0 %vm752_vm3, %v9211_v14  ;;  %9245 = vmatmul.mubr.msk.bf16.gmra.mrb[36].mxu1 %vm752_vm3, %v9211_v14  ;;  %v9217_v14 = vcombine.low %v4585_v63, %v4588_v41  ;;  %v6020_v63 = vor.u32 %v6019_v56, %v6016_v32 }
 0x2f1   : > { %4849 = vmatprep.mubr.bf16.mxu0 %v10886_v6  ;;  %5042 = vmatprep.mubr.bf16.mxu1 %v10886_v6 }
 0x2f8   : > { %9229 = vmatmul.mubr.msk.bf16.gmra.mrb[40].mxu0 %vm752_vm3, %v9212_v42  ;;  %9246 = vmatmul.mubr.msk.bf16.gmra.mrb[40].mxu1 %vm752_vm3, %v9212_v42  ;;  %v10756_v42 = vld [vmem:[%s11000_s15 + $0x48] sm:$0xff]  }
 0x2f9   : > { %4859 = vmatprep.mubr.bf16.mxu0 %v10886_v6  ;;  %5052 = vmatprep.mubr.bf16.mxu1 %v10886_v6 }
 0x300   : > { %9230 = vmatmul.mubr.msk.bf16.gmra.mrb[44].mxu0 %vm752_vm3, %v9213_v1  ;;  %9247 = vmatmul.mubr.msk.bf16.gmra.mrb[44].mxu1 %vm752_vm3, %v9213_v1  ;;  %v9336_v1 = vld [vmem:[%s11000_s15 + $0x1c] sm:$0xf] }
 0x301   : > { %4869 = vmatprep.mubr.bf16.mxu0 %v10886_v6  ;;  %5062 = vmatprep.mubr.bf16.mxu1 %v10886_v6  ;;  %v5999_v11 = vshll.u32 %v9336_v1, 16  ;;  %v6003_v16 = vshrl.u32 %v9336_v1, 16 }
 0x303   : > { %v6001_v31 = vrot.slane %v5999_v11, 5  ;;  %v6005_v38 = vrot.slane %v6003_v16, 4  ;;  %v9347_v11 = vld [vmem:[%s11000_s15 + $0x48] sm:$0xf]  ;;  %v9348_v16 = vld [vmem:[%s11000_s15 + $0x4c] sm:$0xf] }
 0x304   : > { %v6095_v26 = vshll.u32 %v9348_v16, 16  ;;  %v6099_v2 = vshrl.u32 %v9348_v16, 16 }
 0x305   : > { %v6006_v23 = vor.u32 %v6005_v38, %v6001_v31  ;;  %v6002_v4 = vsel %vm11021_vm4, %v5997_v36, %v6001_v31 }
 0x307   : > { %v6007_v43 = vrot.slane %v6006_v23, 4  ;;  %v6086_v23 = vshrl.u32 %v9347_v11, 16 }
 0x308   : > { %9231 = vmatmul.mubr.msk.bf16.gmra.mrb[48].mxu0 %vm752_vm3, %v9214_v49  ;;  %9248 = vmatmul.mubr.msk.bf16.gmra.mrb[48].mxu1 %vm752_vm3, %v9214_v49  ;;  %v9337_v49 = vld [vmem:[%s11000_s15 + $0x20] sm:$0x1] }
 0x309   : > { %4879 = vmatprep.mubr.bf16.mxu0 %v10886_v6  ;;  %5072 = vmatprep.mubr.bf16.mxu1 %v10886_v6  ;;  %v6009_v24 = vshll.u32 %v9337_v49, 16  ;;  %v6088_v32 = vrot.slane %v6086_v23, 4  ;;  %v9357_v23 = vld [vmem:[%s11000_s15 + $0x70] sm:$0xf] }
 0x30b   : > { %v6011_v27 = vrot.slane %v6009_v24, 5  ;;  %v6089_v24 = vshll.u32 %v9347_v11, 16 }
 0x30d   : > { %v6012_v12 = vsel %vm11021_vm4, %v6007_v43, %v6011_v27  ;;  %v6081_v27 = vshll.u32 %v9346_v22, 16  ;;  %v6091_v56 = vrot.slane %v6089_v24, 5  ;;  %v9356_v22 = vld [vmem:[%s11000_s15 + $0x6c] sm:$0xf] }
 0x310   : > { %9232 = vmatmul.mubr.msk.bf16.gmra.mrb[52].mxu0 %vm752_vm3, %v9215_v34  ;;  %9249 = vmatmul.mubr.msk.bf16.gmra.mrb[52].mxu1 %vm752_vm3, %v9215_v34  ;;  %v6027_v34 = vshrl.u32 %v9339_v3, 16 }
 0x311   : > { %4889 = vmatprep.mubr.bf16.mxu0 %v10886_v6  ;;  %5082 = vmatprep.mubr.bf16.mxu1 %v10886_v6 }
 0x312   : > { %v6029_v29 = vrot.slane %v6027_v34, 4 }
 0x314   : > { %v6030_v41 = vor.u32 %v6029_v29, %v6025_v9  ;;  %v6101_v29 = vrot.slane %v6099_v2, 4 }
 0x318   : > { %9233 = vmatmul.mubr.msk.bf16.gmra.mrb[56].mxu0 %vm752_vm3, %v9216_v35  ;;  %9250 = vmatmul.mubr.msk.bf16.gmra.mrb[56].mxu1 %vm752_vm3, %v9216_v35  ;;  %v9341_v35 = vld [vmem:[%s11000_s15 + $0x30] sm:$0xf] }
 0x319   : > { %4899 = vmatprep.mubr.bf16.mxu0 %v10886_v6  ;;  %5092 = vmatprep.mubr.bf16.mxu1 %v10886_v6  ;;  %v6038_v50 = vshrl.u32 %v9341_v35, 16  ;;  %v6041_v39 = vshll.u32 %v9341_v35, 16  ;;  %v9350_v35 = vld [vmem:[%s11000_s15 + $0x54] sm:$0xf] }
 0x320   : > { %9234 = vmatmul.mubr.msk.bf16.gmra.mrb[60].mxu0 %vm752_vm3, %v9217_v14  ;;  %9251 = vmatmul.mubr.msk.bf16.gmra.mrb[60].mxu1 %vm752_vm3, %v9217_v14  ;;  %v6033_v14 = vshll.u32 %v9340_v21, 16 }
 0x321   : > { %5459 = vmatprep.mubr.bf16.mxu0 %v10886_v6  ;;  %5652 = vmatprep.mubr.bf16.mxu1 %v10886_v6 }
 0x328   : > { %9302 = vmatmul.mubr.msk.bf16.vlgmr.msra.gmra.mrb[0].mxu0 %vm752_vm3, %v10752_v57  ;;  %9319 = vmatmul.mubr.msk.bf16.vlgmr.msra.gmra.mrb[0].mxu1 %vm752_vm3, %v10752_v57  ;;  %v6047_v57 = vshll.u32 %v9342_v48, 16 }
 0x329   : > { %6502 = vmatpush1.bf16.msra.mxu0 %v6490_v58  ;;  %6695 = vmatpush1.bf16.msra.mxu1 %v6496_v8  ;;  %v6051_v58 = vshrl.u32 %v9342_v48, 16  ;;  %v9384_v8 = vcombine.low %v6002_v4, %v6012_v12  ;;  %v9351_v48 = vld [vmem:[%s11000_s15 + $0x58] sm:$0xf] }
 0x32a   : > { %5469 = vmatprep.mubr.bf16.mxu0 %v10886_v6  ;;  %5662 = vmatprep.mubr.bf16.mxu1 %v10886_v6 }
 0x32b   : > { %9515 = vmatprep.subr.msk.bf16.mxu0 %vm801_vm2, %v7289_v20  ;;  %9532 = vmatprep.subr.msk.bf16.mxu1 %vm801_vm2, %v7290_v17  ;;  %v6021_v20 = vrot.slane %v6020_v63, 4  ;;  %v6031_v17 = vrot.slane %v6030_v41, 4  ;;  %v6083_v63 = vrot.slane %v6081_v27, 5  ;;  %v6092_v41 = vor.u32 %v6091_v56, %v6088_v32  ;;  %v9359_v56 = vld [vmem:[%s11000_s15 + $0x78] sm:$0xf] }
 0x32c   : > { %v6167_v27 = vshll.u32 %v9357_v23, 16  ;;  %v6171_v32 = vshrl.u32 %v9357_v23, 16  ;;  %v9365_v23 = vld [vmem:[%s11000_s15 + $0x90] sm:$0xf] }
 0x330   : > { %9303 = vmatmul.mubr.msk.bf16.gmra.mrb[4].mxu0 %vm752_vm3, %v10753_v10  ;;  %9320 = vmatmul.mubr.msk.bf16.gmra.mrb[4].mxu1 %vm752_vm3, %v10753_v10  ;;  %v6035_v10 = vrot.slane %v6033_v14, 5 }
 0x331   : > { %5479 = vmatprep.mubr.bf16.mxu0 %v10886_v6  ;;  %5672 = vmatprep.mubr.bf16.mxu1 %v10886_v6 }
 0x338   : > { %9304 = vmatmul.mubr.msk.bf16.gmra.mrb[8].mxu0 %vm752_vm3, %v10754_v53  ;;  %9321 = vmatmul.mubr.msk.bf16.gmra.mrb[8].mxu1 %vm752_vm3, %v10754_v53  ;;  %v6040_v53 = vrot.slane %v6038_v50, 4 }
 0x339   : > { %5489 = vmatprep.mubr.bf16.mxu0 %v10886_v6  ;;  %5682 = vmatprep.mubr.bf16.mxu1 %v10886_v6 }
 0x340   : > { %9305 = vmatmul.mubr.msk.bf16.gmra.mrb[12].mxu0 %vm752_vm3, %v10755_v59  ;;  %9322 = vmatmul.mubr.msk.bf16.gmra.mrb[12].mxu1 %vm752_vm3, %v10755_v59  ;;  %v6043_v59 = vrot.slane %v6041_v39, 5  ;;  %v6110_v39 = vshrl.u32 %v9350_v35, 16 }
 0x341   : > { %5499 = vmatprep.mubr.bf16.mxu0 %v10886_v6  ;;  %5692 = vmatprep.mubr.bf16.mxu1 %v10886_v6 }
 0x342   : > { %v6044_v62 = vor.u32 %v6043_v59, %v6040_v53 }
 0x344   : > { %v6045_v15 = vrot.slane %v6044_v62, 4 }
 0x348   : > { %9306 = vmatmul.mubr.msk.bf16.gmra.mrb[16].mxu0 %vm752_vm3, %v10756_v42  ;;  %9323 = vmatmul.mubr.msk.bf16.gmra.mrb[16].mxu1 %vm752_vm3, %v10756_v42  ;;  %v6049_v42 = vrot.slane %v6047_v57, 5  ;;  %v6113_v57 = vshll.u32 %v9350_v35, 16 }
 0x349   : > { %5509 = vmatprep.mubr.bf16.mxu0 %v10886_v6  ;;  %5702 = vmatprep.mubr.bf16.mxu1 %v10886_v6 }
 0x34a   : > { %v6050_v28 = vsel %vm11021_vm4, %v6045_v15, %v6049_v42 }
 0x350   : > { %9307 = vmatmul.mubr.msk.bf16.gmra.mrb[20].mxu0 %vm752_vm3, %v10757_v40  ;;  %9324 = vmatmul.mubr.msk.bf16.gmra.mrb[20].mxu1 %vm752_vm3, %v10757_v40  ;;  %v6053_v40 = vrot.slane %v6051_v58, 4  ;;  %v6119_v58 = vshll.u32 %v9351_v48, 16 }
 0x351   : > { %5519 = vmatprep.mubr.bf16.mxu0 %v10886_v6  ;;  %5712 = vmatprep.mubr.bf16.mxu1 %v10886_v6 }
 0x352   : > { %v6054_v1 = vor.u32 %v6053_v40, %v6049_v42  ;;  %v6112_v42 = vrot.slane %v6110_v39, 4  ;;  %v6115_v40 = vrot.slane %v6113_v57, 5 }
 0x354   : > { %v6055_v31 = vrot.slane %v6054_v1, 4  ;;  %v6116_v1 = vor.u32 %v6115_v40, %v6112_v42 }
 0x358   : > { %9308 = vmatmul.mubr.msk.bf16.gmra.mrb[24].mxu0 %vm752_vm3, %v10758_v46  ;;  %9325 = vmatmul.mubr.msk.bf16.gmra.mrb[24].mxu1 %vm752_vm3, %v10758_v46  ;;  %v9343_v46 = vld [vmem:[%s11000_s15 + $0x38] sm:$0x1] }
 0x359   : > { %5529 = vmatprep.mubr.bf16.mxu0 %v10886_v6  ;;  %5722 = vmatprep.mubr.bf16.mxu1 %v10886_v6 }
 0x360   : > { %9309 = vmatmul.mubr.msk.bf16.gmra.mrb[28].mxu0 %vm752_vm3, %v10759_v47  ;;  %9326 = vmatmul.mubr.msk.bf16.gmra.mrb[28].mxu1 %vm752_vm3, %v10759_v47  ;;  %v7340_v47 = vsel %vm801_vm2, %v12196_v45, 0  ;;  %v6057_v45 = vshll.u32 %v9343_v46, 16  ;;  %v6121_v46 = vrot.slane %v6119_v58, 5 }
 0x361   : > { %5539 = vmatprep.mubr.bf16.mxu0 %v10886_v6  ;;  %5732 = vmatprep.mubr.bf16.mxu1 %v10886_v6 }
 0x362   : > { %v6059_v38 = vrot.slane %v6057_v45, 5 }
 0x364   : > { %v6060_v34 = vsel %vm11021_vm4, %v6055_v31, %v6059_v38 }
 0x365   : > { %v9386_v21 = vcombine.low %v6050_v28, %v6060_v34 }
 0x368   : > { %9310 = vmatmul.mubr.msk.bf16.gmra.mrb[32].mxu0 %vm752_vm3, %v10760_v30  ;;  %9327 = vmatmul.mubr.msk.bf16.gmra.mrb[32].mxu1 %vm752_vm3, %v10760_v30  ;;  %v7346_v30 = vsel %vm801_vm2, %v12200_v25, 0 }
 0x369   : > { %5549 = vmatprep.mubr.bf16.mxu0 %v10886_v6  ;;  %5742 = vmatprep.mubr.bf16.mxu1 %v10886_v6 }
 0x370   : > { %9311 = vmatmul.mubr.msk.bf16.gmra.mrb[36].mxu0 %vm752_vm3, %v10761_v33  ;;  %9328 = vmatmul.mubr.msk.bf16.gmra.mrb[36].mxu1 %vm752_vm3, %v10761_v33  ;;  %v9344_v33 = vld [vmem:[%s11000_s15 + $0x3c] sm:$0xf] }
 0x371   : > { %5559 = vmatprep.mubr.bf16.mxu0 %v10886_v6  ;;  %5752 = vmatprep.mubr.bf16.mxu1 %v10886_v6  ;;  %v6062_v25 = vshrl.u32 %v9344_v33, 16 }
 0x373   : > { %v6064_v49 = vrot.slane %v6062_v25, 4 }
 0x378   : > { %9312 = vmatmul.mubr.msk.bf16.gmra.mrb[40].mxu0 %vm752_vm3, %v10762_v51  ;;  %9329 = vmatmul.mubr.msk.bf16.gmra.mrb[40].mxu1 %vm752_vm3, %v10762_v51  ;;  %v9345_v51 = vld [vmem:[%s11000_s15 + $0x40] sm:$0xf] }
 0x379   : > { %5569 = vmatprep.mubr.bf16.mxu0 %v10886_v6  ;;  %5762 = vmatprep.mubr.bf16.mxu1 %v10886_v6  ;;  %v6071_v60 = vshll.u32 %v9345_v51, 16  ;;  %v6075_v7 = vshrl.u32 %v9345_v51, 16  ;;  %v9353_v51 = vld [vmem:[%s11000_s15 + $0x60] sm:$0xf] }
 0x37b   : > { %v6073_v61 = vrot.slane %v6071_v60, 5  ;;  %v6077_v3 = vrot.slane %v6075_v7, 4  ;;  %v6137_v60 = vshll.u32 %v9353_v51, 16 }
 0x37d   : > { %v6078_v43 = vor.u32 %v6077_v3, %v6073_v61  ;;  %v9355_v3 = vld [vmem:[%s11000_s15 + $0x68] sm:$0x1] }
 0x37e   : > { %v6153_v34 = vshll.u32 %v9355_v3, 16 }
 0x37f   : > { %v6079_v12 = vrot.slane %v6078_v43, 4  ;;  %v6161_v43 = vshll.u32 %v9356_v22, 16 }
 0x380   : > { %9313 = vmatmul.mubr.msk.bf16.gmra.mrb[44].mxu0 %vm752_vm3, %v10763_v52  ;;  %9330 = vmatmul.mubr.msk.bf16.gmra.mrb[44].mxu1 %vm752_vm3, %v10763_v52  ;;  %v6026_v52 = vsel %vm11021_vm4, %v6021_v20, %v6025_v9  ;;  %v6097_v9 = vrot.slane %v6095_v26, 5  ;;  %v6155_v35 = vrot.slane %v6153_v34, 5 }
 0x381   : > { %5579 = vmatprep.mubr.bf16.mxu0 %v10886_v6  ;;  %5772 = vmatprep.mubr.bf16.mxu1 %v10886_v6 }
 0x382   : > { %v6102_v14 = vor.u32 %v6101_v29, %v6097_v9 }
 0x384   : > { %v6103_v53 = vrot.slane %v6102_v14, 4  ;;  %v6182_v14 = vshrl.u32 %v9359_v56, 16 }
 0x388   : > { %9314 = vmatmul.mubr.msk.bf16.gmra.mrb[48].mxu0 %vm752_vm3, %v10764_v54  ;;  %9331 = vmatmul.mubr.msk.bf16.gmra.mrb[48].mxu1 %vm752_vm3, %v10764_v54  ;;  %v6036_v54 = vsel %vm11021_vm4, %v6031_v17, %v6035_v10  ;;  %v6084_v17 = vsel %vm11021_vm4, %v6079_v12, %v6083_v63  ;;  %v6093_v10 = vrot.slane %v6092_v41, 4  ;;  %v6169_v12 = vrot.slane %v6167_v27, 5  ;;  %v9358_v41 = vld [vmem:[%s11000_s15 + $0x74] sm:$0x1] }
 0x389   : > { %5589 = vmatprep.mubr.bf16.mxu0 %v10886_v6  ;;  %5782 = vmatprep.mubr.bf16.mxu1 %v10886_v6  ;;  %v9385_v18 = vcombine.low %v6026_v52, %v6036_v54  ;;  %v9354_v52 = vld [vmem:[%s11000_s15 + $0x64] sm:$0xf]  ;;  %v6173_v63 = vrot.slane %v6171_v32, 4  ;;  %v6233_v27 = vshll.u32 %v9365_v23, 16 }
 0x38a   : > { %v6098_v54 = vsel %vm11021_vm4, %v6093_v10, %v6097_v9  ;;  %v6143_v7 = vshll.u32 %v9354_v52, 16  ;;  %v6147_v11 = vshrl.u32 %v9354_v52, 16  ;;  %v9360_v9 = vld [vmem:[%s11000_s15 + $0x7c] sm:$0xf]  ;;  %v6177_v10 = vshll.u32 %v9358_v41, 16 }
 0x38b   : > { %v6191_v39 = vshll.u32 %v9360_v9, 16  ;;  %v6195_v57 = vshrl.u32 %v9360_v9, 16  ;;  %v9368_v41 = vld [vmem:[%s11000_s15 + $0x9c] sm:$0xf] }
 0x38d   : > { %v6193_v42 = vrot.slane %v6191_v39, 5  ;;  %v6197_v40 = vrot.slane %v6195_v57, 4 }
 0x390   : > { %9315 = vmatmul.mubr.msk.bf16.gmra.mrb[52].mxu0 %vm752_vm3, %v10765_v37  ;;  %9332 = vmatmul.mubr.msk.bf16.gmra.mrb[52].mxu1 %vm752_vm3, %v10765_v37  ;;  %v6065_v37 = vshll.u32 %v9344_v33, 16  ;;  %v9352_v33 = vld [vmem:[%s11000_s15 + $0x5c] sm:$0x1] }
 0x391   : > { %5599 = vmatprep.mubr.bf16.mxu0 %v10886_v6  ;;  %5792 = vmatprep.mubr.bf16.mxu1 %v10886_v6  ;;  %v6129_v25 = vshll.u32 %v9352_v33, 16  ;;  %v9363_v33 = vld [vmem:[%s11000_s15 + $0x88] sm:$0xf] }
 0x393   : > { %v6131_v31 = vrot.slane %v6129_v25, 5 }
 0x398   : > { %9316 = vmatmul.mubr.msk.bf16.gmra.mrb[56].mxu0 %vm752_vm3, %v10766_v19  ;;  %9333 = vmatmul.mubr.msk.bf16.gmra.mrb[56].mxu1 %vm752_vm3, %v10766_v19  ;;  %v6067_v19 = vrot.slane %v6065_v37, 5  ;;  %v6134_v37 = vshrl.u32 %v9353_v51, 16 }
 0x399   : > { %5609 = vmatprep.mubr.bf16.mxu0 %v10886_v6  ;;  %5802 = vmatprep.mubr.bf16.mxu1 %v10886_v6 }
 0x39a   : > { %v6068_v36 = vor.u32 %v6067_v19, %v6064_v49  ;;  %v6136_v38 = vrot.slane %v6134_v37, 4  ;;  %v6139_v49 = vrot.slane %v6137_v60, 5  ;;  %v6145_v19 = vrot.slane %v6143_v7, 5 }
 0x39b   : > { %v6215_v60 = vshll.u32 %v9363_v33, 16  ;;  %v6219_v7 = vshrl.u32 %v9363_v33, 16 }
 0x39c   : > { %v6069_v4 = vrot.slane %v6068_v36, 4  ;;  %v6140_v2 = vor.u32 %v6139_v49, %v6136_v38  ;;  %v6158_v36 = vshrl.u32 %v9356_v22, 16  ;;  %v9364_v22 = vld [vmem:[%s11000_s15 + $0x8c] sm:$0x1] }
 0x39e   : > { %v6074_v20 = vsel %vm11021_vm4, %v6069_v4, %v6073_v61  ;;  %v6149_v61 = vrot.slane %v6147_v11, 4  ;;  %v6163_v4 = vrot.slane %v6161_v43, 5  ;;  %v6230_v43 = vshrl.u32 %v9365_v23, 16 }
 0x3a0   : > { %9317 = vmatmul.mubr.msk.bf16.gmra.mrb[60].mxu0 %vm752_vm3, %v10767_v13  ;;  %9334 = vmatmul.mubr.msk.bf16.gmra.mrb[60].mxu1 %vm752_vm3, %v10767_v13  ;;  %v9349_v13 = vld [vmem:[%s11000_s15 + $0x50] sm:$0x1]  ;;  %v6150_v28 = vor.u32 %v6149_v61, %v6145_v19  ;;  %v6221_v61 = vrot.slane %v6219_v7, 4 }
 0x3a1   : > { %6533 = vmatprep.mubr.bf16.mxu0 %v10886_v6  ;;  %6726 = vmatprep.mubr.bf16.mxu1 %v10886_v6  ;;  %v6105_v50 = vshll.u32 %v9349_v13, 16  ;;  %v6141_v13 = vrot.slane %v6140_v2, 4 }
 0x3a3   : > { %v6107_v59 = vrot.slane %v6105_v50, 5  ;;  %v6185_v50 = vshll.u32 %v9359_v56, 16  ;;  %v6146_v58 = vsel %vm11021_vm4, %v6141_v13, %v6145_v19  ;;  %v6217_v19 = vrot.slane %v6215_v60, 5 }
 0x3a5   : > { %v6108_v62 = vsel %vm11021_vm4, %v6103_v53, %v6107_v59  ;;  %v6184_v53 = vrot.slane %v6182_v14, 4  ;;  %v6187_v59 = vrot.slane %v6185_v50, 5  ;;  %v6222_v34 = vor.u32 %v6221_v61, %v6217_v19  ;;  %v9369_v14 = vld [vmem:[%s11000_s15 + $0xa0] sm:$0xf] }
 0x3a6   : > { %v9388_v16 = vcombine.low %v6098_v54, %v6108_v62  ;;  %v6179_v54 = vrot.slane %v6177_v10, 5  ;;  %v6263_v10 = vshll.u32 %v9369_v14, 16 }
 0x3a7   : > { %v6188_v62 = vor.u32 %v6187_v59, %v6184_v53  ;;  %v6223_v13 = vrot.slane %v6222_v34, 4  ;;  %v6267_v53 = vshrl.u32 %v9369_v14, 16  ;;  %v9371_v59 = vld [vmem:[%s11000_s15 + $0xa8] sm:$0xf]  ;;  %v9377_v14 = vld [vmem:[%s11000_s15 + $0xc0] sm:$0xf] }
 0x3a8   : > { %9401 = vmatmul.mubr.msk.bf16.vlgmr.msra.gmra.mrb[0].mxu0 %vm752_vm3, %v9384_v8  ;;  %9418 = vmatmul.mubr.msk.bf16.vlgmr.msra.gmra.mrb[0].mxu1 %vm752_vm3, %v9384_v8  ;;  %v6123_v8 = vshrl.u32 %v9351_v48, 16  ;;  %v6160_v48 = vrot.slane %v6158_v36, 4  ;;  %v6225_v36 = vshll.u32 %v9364_v22, 16  ;;  %v9375_v22 = vld [vmem:[%s11000_s15 + $0xb8] sm:$0xf] }
 0x3a9   : > { %7352 = vmatpush1.bf16.msra.mxu0 %v7340_v47  ;;  %7545 = vmatpush1.bf16.msra.mxu1 %v7346_v30  ;;  %v9387_v30 = vcombine.low %v6074_v20, %v6084_v17  ;;  %v6174_v17 = vor.u32 %v6173_v63, %v6169_v12  ;;  %v9367_v63 = vld [vmem:[%s11000_s15 + $0x98] sm:$0x1] }
 0x3aa   : > { %6543 = vmatprep.mubr.bf16.mxu0 %v10886_v6  ;;  %6736 = vmatprep.mubr.bf16.mxu1 %v10886_v6  ;;  %v6125_v47 = vrot.slane %v6123_v8, 4  ;;  %v6164_v20 = vor.u32 %v6163_v4, %v6160_v48  ;;  %v6235_v48 = vrot.slane %v6233_v27, 5  ;;  %v6311_v27 = vshll.u32 %v9375_v22, 16 }
 0x3ab   : > { %v6175_v52 = vrot.slane %v6174_v17, 4  ;;  %v6257_v17 = vshll.u32 %v9368_v41, 16 }
 0x3ac   : > { %v6126_v45 = vor.u32 %v6125_v47, %v6121_v46  ;;  %v6165_v51 = vrot.slane %v6164_v20, 4  ;;  %v6254_v20 = vshrl.u32 %v9368_v41, 16  ;;  %v9376_v41 = vld [vmem:[%s11000_s15 + $0xbc] sm:$0x1] }
 0x3ae   : > { %v6127_v15 = vrot.slane %v6126_v45, 4  ;;  %v6170_v11 = vsel %vm11021_vm4, %v6165_v51, %v6169_v12  ;;  %v6256_v33 = vrot.slane %v6254_v20, 4  ;;  %v6259_v51 = vrot.slane %v6257_v17, 5 }
 0x3af   : > { %v6321_v20 = vshll.u32 %v9376_v41, 16  ;;  %v6326_v17 = vshrl.u32 %v9377_v14, 16 }
 0x3b0   : > { %9402 = vmatmul.mubr.msk.bf16.gmra.mrb[4].mxu0 %vm752_vm3, %v9385_v18  ;;  %9419 = vmatmul.mubr.msk.bf16.gmra.mrb[4].mxu1 %vm752_vm3, %v9385_v18  ;;  %v6117_v18 = vrot.slane %v6116_v1, 4  ;;  %v6132_v26 = vsel %vm11021_vm4, %v6127_v15, %v6131_v31  ;;  %v6198_v1 = vor.u32 %v6197_v40, %v6193_v42 }
 0x3b1   : > { %6553 = vmatprep.mubr.bf16.mxu0 %v10886_v6  ;;  %6746 = vmatprep.mubr.bf16.mxu1 %v10886_v6 }
 0x3b2   : > { %v6122_v24 = vsel %vm11021_vm4, %v6117_v18, %v6121_v46  ;;  %v9361_v46 = vld [vmem:[%s11000_s15 + $0x80] sm:$0x1]  ;;  %v6189_v18 = vrot.slane %v6188_v62, 4  ;;  %v6199_v15 = vrot.slane %v6198_v1, 4  ;;  %v9370_v62 = vld [vmem:[%s11000_s15 + $0xa4] sm:$0x1] }
 0x3b3   : > { %v9389_v29 = vcombine.low %v6122_v24, %v6132_v26  ;;  %v6201_v45 = vshll.u32 %v9361_v46, 16  ;;  %v9366_v24 = vld [vmem:[%s11000_s15 + $0x94] sm:$0xf]  ;;  %v6278_v1 = vshrl.u32 %v9371_v59, 16 }
 0x3b4   : > { %v6194_v26 = vsel %vm11021_vm4, %v6189_v18, %v6193_v42  ;;  %v6239_v32 = vshll.u32 %v9366_v24, 16  ;;  %v6243_v56 = vshrl.u32 %v9366_v24, 16  ;;  %v9372_v42 = vld [vmem:[%s11000_s15 + $0xac] sm:$0xf]  ;;  %v6273_v18 = vshll.u32 %v9370_v62, 16 }
 0x3b5   : > { %v6203_v31 = vrot.slane %v6201_v45, 5  ;;  %v6281_v45 = vshll.u32 %v9371_v59, 16  ;;  %v9380_v62 = vld [vmem:[%s11000_s15 + $0xcc] sm:$0xf] }
 0x3b6   : > { %v6241_v4 = vrot.slane %v6239_v32, 5  ;;  %v6245_v12 = vrot.slane %v6243_v56, 4  ;;  %v6315_v32 = vshrl.u32 %v9375_v22, 16 }
 0x3b7   : > { %v6204_v2 = vsel %vm11021_vm4, %v6199_v15, %v6203_v31  ;;  %v6280_v15 = vrot.slane %v6278_v1, 4  ;;  %v6283_v31 = vrot.slane %v6281_v45, 5  ;;  %v9381_v1 = vld [vmem:[%s11000_s15 + $0xd0] sm:$0xf] }
 0x3b8   : > { %9403 = vmatmul.mubr.msk.bf16.gmra.mrb[8].mxu0 %vm752_vm3, %v9386_v21  ;;  %9420 = vmatmul.mubr.msk.bf16.gmra.mrb[8].mxu1 %vm752_vm3, %v9386_v21  ;;  %v6151_v21 = vrot.slane %v6150_v28, 4  ;;  %v9392_v9 = vcombine.low %v6194_v26, %v6204_v2  ;;  %v6275_v26 = vrot.slane %v6273_v18, 5  ;;  %v6359_v18 = vshll.u32 %v9381_v1, 16 }
 0x3b9   : > { %6563 = vmatprep.mubr.bf16.mxu0 %v10886_v6  ;;  %6756 = vmatprep.mubr.bf16.mxu1 %v10886_v6  ;;  %v6284_v2 = vor.u32 %v6283_v31, %v6280_v15  ;;  %v6363_v15 = vshrl.u32 %v9381_v1, 16 }
 0x3ba   : > { %v6156_v8 = vsel %vm11021_vm4, %v6151_v21, %v6155_v35  ;;  %v6227_v21 = vrot.slane %v6225_v36, 5  ;;  %v6232_v35 = vrot.slane %v6230_v43, 4  ;;  %v6361_v22 = vrot.slane %v6359_v18, 5  ;;  %v9447_v18 = vld [vmem:[%s11000_s15 + $0x4c] sm:$0xf] }
 0x3bb   : > { %v9390_v47 = vcombine.low %v6146_v58, %v6156_v8  ;;  %v6246_v58 = vor.u32 %v6245_v12, %v6241_v4  ;;  %v6249_v8 = vshll.u32 %v9367_v63, 16  ;;  %v6317_v12 = vrot.slane %v6315_v32, 4 }
 0x3bc   : > { %v6228_v39 = vsel %vm11021_vm4, %v6223_v13, %v6227_v21  ;;  %v6236_v57 = vor.u32 %v6235_v48, %v6232_v35 }
 0x3be   : > { %v6237_v46 = vrot.slane %v6236_v57, 4 }
 0x3c0   : > { %9404 = vmatmul.mubr.msk.bf16.gmra.mrb[12].mxu0 %vm752_vm3, %v9387_v30  ;;  %9421 = vmatmul.mubr.msk.bf16.gmra.mrb[12].mxu1 %vm752_vm3, %v9387_v30  ;;  %v9362_v30 = vld [vmem:[%s11000_s15 + $0x84] sm:$0xf]  ;;  %v6242_v60 = vsel %vm11021_vm4, %v6237_v46, %v6241_v4  ;;  %v6313_v4 = vrot.slane %v6311_v27, 5 }
 0x3c1   : > { %6573 = vmatprep.mubr.bf16.mxu0 %v10886_v6  ;;  %6766 = vmatprep.mubr.bf16.mxu1 %v10886_v6  ;;  %v6206_v25 = vshrl.u32 %v9362_v30, 16  ;;  %v6209_v37 = vshll.u32 %v9362_v30, 16  ;;  %v6251_v30 = vrot.slane %v6249_v8, 5 }
 0x3c2   : > { %v6318_v8 = vor.u32 %v6317_v12, %v6313_v4 }
 0x3c3   : > { %v6208_v38 = vrot.slane %v6206_v25, 4  ;;  %v6211_v49 = vrot.slane %v6209_v37, 5  ;;  %v6287_v25 = vshll.u32 %v9372_v42, 16  ;;  %v6291_v37 = vshrl.u32 %v9372_v42, 16 }
 0x3c4   : > { %v6319_v46 = vrot.slane %v6318_v8, 4 }
 0x3c5   : > { %v6212_v28 = vor.u32 %v6211_v49, %v6208_v38  ;;  %v6289_v38 = vrot.slane %v6287_v25, 5  ;;  %v6293_v49 = vrot.slane %v6291_v37, 4 }
 0x3c8   : > { %9405 = vmatmul.mubr.msk.bf16.gmra.mrb[16].mxu0 %vm752_vm3, %v9388_v16  ;;  %9422 = vmatmul.mubr.msk.bf16.gmra.mrb[16].mxu1 %vm752_vm3, %v9388_v16  ;;  %v6180_v16 = vsel %vm11021_vm4, %v6175_v52, %v6179_v54  ;;  %v6265_v52 = vrot.slane %v6263_v10, 5  ;;  %v6269_v54 = vrot.slane %v6267_v53, 4  ;;  %v6329_v10 = vshll.u32 %v9377_v14, 16  ;;  %v9438_v14 = vld [vmem:[%s11000_s15 + $0x28] sm:$0xf] }
 0x3c9   : > { %6583 = vmatprep.mubr.bf16.mxu0 %v10886_v6  ;;  %6776 = vmatprep.mubr.bf16.mxu1 %v10886_v6  ;;  %v9391_v3 = vcombine.low %v6170_v11, %v6180_v16  ;;  %v6260_v11 = vor.u32 %v6259_v51, %v6256_v33 }
 0x3ca   : > { %v6270_v16 = vor.u32 %v6269_v54, %v6265_v52  ;;  %v6331_v33 = vrot.slane %v6329_v10, 5  ;;  %v9379_v54 = vld [vmem:[%s11000_s15 + $0xc8] sm:$0x1] }
 0x3cb   : > { %v6261_v23 = vrot.slane %v6260_v11, 4  ;;  %v6350_v11 = vshrl.u32 %v9380_v62, 16 }
 0x3cc   : > { %v6271_v24 = vrot.slane %v6270_v16, 4  ;;  %v6353_v16 = vshll.u32 %v9380_v62, 16 }
 0x3cd   : > { %v6266_v56 = vsel %vm11021_vm4, %v6261_v23, %v6265_v52  ;;  %v6365_v23 = vrot.slane %v6363_v15, 4 }
 0x3d0   : > { %9406 = vmatmul.mubr.msk.bf16.gmra.mrb[20].mxu0 %vm752_vm3, %v9389_v29  ;;  %9423 = vmatmul.mubr.msk.bf16.gmra.mrb[20].mxu1 %vm752_vm3, %v9389_v29  ;;  %v6213_v29 = vrot.slane %v6212_v28, 4  ;;  %v6294_v28 = vor.u32 %v6293_v49, %v6289_v38 }
 0x3d1   : > { %6593 = vmatprep.mubr.bf16.mxu0 %v10886_v6  ;;  %6786 = vmatprep.mubr.bf16.mxu1 %v10886_v6 }
 0x3d2   : > { %v6218_v50 = vsel %vm11021_vm4, %v6213_v29, %v6217_v19  ;;  %v9373_v19 = vld [vmem:[%s11000_s15 + $0xb0] sm:$0x1]  ;;  %v6285_v29 = vrot.slane %v6284_v2, 4  ;;  %v6295_v13 = vrot.slane %v6294_v28, 4 }
 0x3d3   : > { %v9393_v40 = vcombine.low %v6218_v50, %v6228_v39  ;;  %v6297_v34 = vshll.u32 %v9373_v19, 16  ;;  %v9378_v50 = vld [vmem:[%s11000_s15 + $0xc4] sm:$0xf] }
 0x3d4   : > { %v6290_v39 = vsel %vm11021_vm4, %v6285_v29, %v6289_v38  ;;  %v6335_v53 = vshll.u32 %v9378_v50, 16  ;;  %v6339_v59 = vshrl.u32 %v9378_v50, 16 }
 0x3d5   : > { %v6299_v21 = vrot.slane %v6297_v34, 5  ;;  %v6366_v34 = vor.u32 %v6365_v23, %v6361_v22 }
 0x3d6   : > { %v6337_v51 = vrot.slane %v6335_v53, 5  ;;  %v6341_v52 = vrot.slane %v6339_v59, 4  ;;  %v9441_v53 = vld [vmem:[%s11000_s15 + $0x34] sm:$0xf] }
 0x3d7   : > { %v6300_v57 = vsel %vm11021_vm4, %v6295_v13, %v6299_v21  ;;  %v6367_v32 = vrot.slane %v6366_v34, 4  ;;  %v9449_v34 = vld [vmem:[%s11000_s15 + $0x54] sm:$0xe] }
 0x3d8   : > { %9407 = vmatmul.mubr.msk.bf16.gmra.mrb[24].mxu0 %vm752_vm3, %v9390_v47  ;;  %9424 = vmatmul.mubr.msk.bf16.gmra.mrb[24].mxu1 %vm752_vm3, %v9390_v47  ;;  %v6247_v47 = vrot.slane %v6246_v58, 4  ;;  %v9396_v42 = vcombine.low %v6290_v39, %v6300_v57  ;;  %v7120_v39 = vrot.slane %v9438_v14, 5  ;;  %v9437_v57 = vld [vmem:[%s11000_s15 + $0x24] sm:$0xe]  ;;  %v9456_v14 = vld [vmem:[%s11000_s15 + $0x70] sm:$0xf] }
 0x3d9   : > { %6603 = vmatprep.mubr.bf16.mxu0 %v10886_v6  ;;  %6796 = vmatprep.mubr.bf16.mxu1 %v10886_v6 }
 0x3da   : > { %v6252_v7 = vsel %vm11021_vm4, %v6247_v47, %v6251_v30  ;;  %v6323_v47 = vrot.slane %v6321_v20, 5  ;;  %v6328_v30 = vrot.slane %v6326_v17, 4  ;;  %v9483_v20 = vrot.slane %v9437_v57, 9  ;;  %v9455_v57 = vld [vmem:[%s11000_s15 + $0x6c] sm:$0xe] }
 0x3db   : > { %v9394_v61 = vcombine.low %v6242_v60, %v6252_v7  ;;  %v6342_v60 = vor.u32 %v6341_v52, %v6337_v51  ;;  %v6345_v7 = vshll.u32 %v9379_v54, 16  ;;  %v7122_v17 = vrot.slane %v7120_v39, 4  ;;  %v9444_v54 = vld [vmem:[%s11000_s15 + $0x40] sm:$0xf] }
 0x3dc   : > { %v6324_v25 = vsel %vm11021_vm4, %v6319_v46, %v6323_v47  ;;  %v6332_v37 = vor.u32 %v6331_v33, %v6328_v30  ;;  %v7121_v59 = vsel %vm11501_vm7, %v9483_v20, %v7120_v39  ;;  %v9440_v46 = vld [vmem:[%s11000_s15 + $0x30] sm:$0xe]  ;;  %v9442_v47 = vld [vmem:[%s11000_s15 + $0x38] sm:$0x1]  ;;  %v7162_v39 = vrot.slane %v9456_v14, 5 }
 0x3dd   : > { %v6343_v49 = vrot.slane %v6342_v60, 4  ;;  %v6347_v19 = vrot.slane %v6345_v7, 5  ;;  %v9484_v33 = vrot.slane %v9440_v46, 9  ;;  %v7130_v52 = vrot.slane %v9442_v47, 5  ;;  %v9458_v46 = vld [vmem:[%s11000_s15 + $0x78] sm:$0xe] }
 0x3de   : > { %v6333_v38 = vrot.slane %v6332_v37, 4  ;;  %v9445_v37 = vld [vmem:[%s11000_s15 + $0x44] sm:$0x1]  ;;  %v9489_v20 = vrot.slane %v9455_v57, 9  ;;  %v9460_v47 = vld [vmem:[%s11000_s15 + $0x80] sm:$0x1] }
 0x3df   : > { %v6348_v2 = vsel %vm11021_vm4, %v6343_v49, %v6347_v19  ;;  %v9446_v49 = vld [vmem:[%s11000_s15 + $0x48] sm:$0xe]  ;;  %v9448_v19 = vld [vmem:[%s11000_s15 + $0x50] sm:$0x1]  ;;  %v9474_v14 = vld [vmem:[%s11000_s15 + $0xb8] sm:$0xf] }
 0x3e0   : > { %9408 = vmatmul.mubr.msk.bf16.gmra.mrb[28].mxu0 %vm752_vm3, %v9391_v3  ;;  %9425 = vmatmul.mubr.msk.bf16.gmra.mrb[28].mxu1 %vm752_vm3, %v9391_v3  ;;  %v9374_v3 = vld [vmem:[%s11000_s15 + $0xb4] sm:$0xf]  ;;  %v7144_v23 = vrot.slane %v9448_v19, 5  ;;  %v9466_v19 = vld [vmem:[%s11000_s15 + $0x98] sm:$0x1] }
 0x3e1   : > { %6613 = vmatprep.mubr.bf16.mxu0 %v10886_v6  ;;  %6806 = vmatprep.mubr.bf16.mxu1 %v10886_v6  ;;  %v6302_v36 = vshrl.u32 %v9374_v3, 16  ;;  %v6305_v43 = vshll.u32 %v9374_v3, 16  ;;  %v6355_v3 = vrot.slane %v6353_v16, 5  ;;  %v7137_v16 = vrot.slane %v9445_v37, 5  ;;  %v9463_v37 = vld [vmem:[%s11000_s15 + $0x8c] sm:$0x1] }
 0x3e2   : > { %v9473_v57 = vld [vmem:[%s11000_s15 + $0xb4] sm:$0xe] }
 0x3e3   : > { %v6304_v35 = vrot.slane %v6302_v36, 4  ;;  %v6307_v48 = vrot.slane %v6305_v43, 5 }
 0x3e5   : > { %v6308_v58 = vor.u32 %v6307_v48, %v6304_v35  ;;  %v9434_v35 = vld [vmem:[%s11000_s15 + $0x18] sm:$0xe]  ;;  %v9436_v48 = vld [vmem:[%s11000_s15 + $0x20] sm:$0x1] }
 0x3e6   : > { %v9482_v12 = vrot.slane %v9434_v35, 9  ;;  %v7116_v41 = vrot.slane %v9436_v48, 5  ;;  %v9452_v35 = vld [vmem:[%s11000_s15 + $0x60] sm:$0xe]  ;;  %v9454_v48 = vld [vmem:[%s11000_s15 + $0x68] sm:$0x1] }
 0x3e8   : > { %9409 = vmatmul.mubr.msk.bf16.gmra.mrb[32].mxu0 %vm752_vm3, %v9392_v9  ;;  %9426 = vmatmul.mubr.msk.bf16.gmra.mrb[32].mxu1 %vm752_vm3, %v9392_v9  ;;  %v6276_v9 = vsel %vm11021_vm4, %v6271_v24, %v6275_v26  ;;  %v9382_v24 = vld [vmem:[%s11000_s15 + $0xd4] sm:$0x1]  ;;  %v6338_v26 = vsel %vm11021_vm4, %v6333_v38, %v6337_v51  ;;  %v7141_v38 = vrot.slane %v9447_v18, 5 }
 0x3e9   : > { %6623 = vmatprep.mubr.bf16.mxu0 %v10886_v6  ;;  %6816 = vmatprep.mubr.bf16.mxu1 %v10886_v6  ;;  %v9395_v63 = vcombine.low %v6266_v56, %v6276_v9  ;;  %v6369_v36 = vshll.u32 %v9382_v24, 16  ;;  %v9398_v43 = vcombine.low %v6338_v26, %v6348_v2  ;;  %v9435_v9 = vld [vmem:[%s11000_s15 + $0x1c] sm:$0xf]  ;;  %v9450_v24 = vld [vmem:[%s11000_s15 + $0x58] sm:$0xf] }
 0x3ea   : > { %v7113_v21 = vrot.slane %v9435_v9, 5  ;;  %v9453_v9 = vld [vmem:[%s11000_s15 + $0x64] sm:$0xf]  ;;  %v9465_v18 = vld [vmem:[%s11000_s15 + $0x94] sm:$0xf] }
 0x3eb   : > { %v6371_v56 = vrot.slane %v6369_v36, 5  ;;  %v9451_v36 = vld [vmem:[%s11000_s15 + $0x5c] sm:$0x1] }
 0x3ec   : > { %v7114_v44 = vsel %vm11501_vm7, %v9482_v12, %v7113_v21  ;;  %v9488_v12 = vrot.slane %v9452_v35, 9  ;;  %v9470_v35 = vld [vmem:[%s11000_s15 + $0xa8] sm:$0xe] }
 0x3ed   : > { %v6372_v13 = vsel %vm11021_vm4, %v6367_v32, %v6371_v56  ;;  %v7151_v56 = vrot.slane %v9451_v36, 5  ;;  %v9469_v36 = vld [vmem:[%s11000_s15 + $0xa4] sm:$0x1] }
 0x3f0   : > { %9410 = vmatmul.mubr.msk.bf16.gmra.mrb[36].mxu0 %vm752_vm3, %v9393_v40  ;;  %9427 = vmatmul.mubr.msk.bf16.gmra.mrb[36].mxu1 %vm752_vm3, %v9393_v40  ;;  %v6309_v40 = vrot.slane %v6308_v58, 4  ;;  %v9439_v58 = vld [vmem:[%s11000_s15 + $0x2c] sm:$0x1] }
 0x3f1   : > { %6633 = vmatprep.mubr.bf16.mxu0 %v10886_v6  ;;  %6826 = vmatprep.mubr.bf16.mxu1 %v10886_v6  ;;  %v7123_v10 = vrot.slane %v9439_v58, 5  ;;  %v9457_v58 = vld [vmem:[%s11000_s15 + $0x74] sm:$0x1] }
 0x3f2   : > { %v6314_v45 = vsel %vm11021_vm4, %v6309_v40, %v6313_v4  ;;  %v7127_v40 = vrot.slane %v9441_v53, 5  ;;  %v9459_v53 = vld [vmem:[%s11000_s15 + $0x7c] sm:$0xf] }
 0x3f3   : > { %v9397_v31 = vcombine.low %v6314_v45, %v6324_v25  ;;  %v7134_v45 = vrot.slane %v9444_v54, 5  ;;  %v9443_v25 = vld [vmem:[%s11000_s15 + $0x3c] sm:$0xe]  ;;  %v9462_v54 = vld [vmem:[%s11000_s15 + $0x88] sm:$0xf] }
 0x3f4   : > { %v7129_v51 = vrot.slane %v7127_v40, 4  ;;  %v7128_v62 = vsel %vm11501_vm7, %v9484_v33, %v7127_v40  ;;  %v9485_v7 = vrot.slane %v9443_v25, 9  ;;  %v7169_v40 = vrot.slane %v9459_v53, 5  ;;  %v9461_v25 = vld [vmem:[%s11000_s15 + $0x84] sm:$0xe] }
 0x3f5   : > { %v9490_v33 = vrot.slane %v9458_v46, 9  ;;  %v9477_v53 = vld [vmem:[%s11000_s15 + $0xc4] sm:$0xf]  ;;  %v9476_v46 = vld [vmem:[%s11000_s15 + $0xc0] sm:$0xe] }
 0x3f6   : > { %v7131_v1 = vsel %vm11501_vm7, %v7129_v51, %v7130_v52  ;;  %v7135_v15 = vsel %vm11501_vm7, %v9485_v7, %v7134_v45  ;;  %v7171_v51 = vrot.slane %v7169_v40, 4  ;;  %v7172_v52 = vrot.slane %v9460_v47, 5  ;;  %v9478_v47 = vld [vmem:[%s11000_s15 + $0xc8] sm:$0x1] }
 0x3f7   : > { %v9501_v60 = vcombine.low %v7128_v62, %v7131_v1  ;;  %v7170_v62 = vsel %vm11501_vm7, %v9490_v33, %v7169_v40  ;;  %v9491_v7 = vrot.slane %v9461_v25, 9  ;;  %v7211_v40 = vrot.slane %v9477_v53, 5  ;;  %v9479_v25 = vld [vmem:[%s11000_s15 + $0xcc] sm:$0xe] }
 0x3f8   : > { %9411 = vmatmul.mubr.msk.bf16.gmra.mrb[40].mxu0 %vm752_vm3, %v9394_v61  ;;  %9428 = vmatmul.mubr.msk.bf16.gmra.mrb[40].mxu1 %vm752_vm3, %v9394_v61  ;;  %v6352_v61 = vrot.slane %v6350_v11, 4  ;;  %v7136_v11 = vrot.slane %v7134_v45, 4  ;;  %v7173_v1 = vsel %vm11501_vm7, %v7171_v51, %v7172_v52  ;;  %v7176_v45 = vrot.slane %v9462_v54, 5  ;;  %v9480_v54 = vld [vmem:[%s11000_s15 + $0xd0] sm:$0xf] }
 0x3f9   : > { %6643 = vmatprep.mubr.bf16.mxu0 %v10886_v6  ;;  %6836 = vmatprep.mubr.bf16.mxu1 %v10886_v6  ;;  %v9496_v33 = vrot.slane %v9476_v46, 9  ;;  %v7213_v51 = vrot.slane %v7211_v40, 4  ;;  %v7214_v52 = vrot.slane %v9478_v47, 5 }
 0x3fa   : > { %v6356_v28 = vor.u32 %v6355_v3, %v6352_v61  ;;  %v9486_v3 = vrot.slane %v9446_v49, 9  ;;  %v9464_v49 = vld [vmem:[%s11000_s15 + $0x90] sm:$0xe] }
 0x3fc   : > { %v6357_v27 = vrot.slane %v6356_v28, 4  ;;  %v7142_v26 = vsel %vm11501_vm7, %v9486_v3, %v7141_v38  ;;  %v7148_v28 = vrot.slane %v9450_v24, 5  ;;  %v9492_v3 = vrot.slane %v9464_v49, 9  ;;  %v9468_v24 = vld [vmem:[%s11000_s15 + $0xa0] sm:$0xf] }
 0x3fd   : > { %v10770_v49 = vld [vmem:[%s12968_s3] sm:$0xff]  }
 0x3fe   : > { %v6362_v29 = vsel %vm11021_vm4, %v6357_v27, %v6361_v22  ;;  %v7143_v22 = vrot.slane %v7141_v38, 4  ;;  %v9487_v27 = vrot.slane %v9449_v34, 9  ;;  %v7150_v32 = vrot.slane %v7148_v28, 4  ;;  %v9467_v34 = vld [vmem:[%s11000_s15 + $0x9c] sm:$0xe] }
 0x3ff   : > { %v9399_v4 = vcombine.low %v6362_v29, %v6372_v13  ;;  %v7183_v38 = vrot.slane %v9465_v18, 5 }
 0x400   : > { %9412 = vmatmul.mubr.msk.bf16.gmra.mrb[44].mxu0 %vm752_vm3, %v9395_v63  ;;  %9429 = vmatmul.mubr.msk.bf16.gmra.mrb[44].mxu1 %vm752_vm3, %v9395_v63  ;;  %v7115_v63 = vrot.slane %v7113_v21, 4  ;;  %v7145_v2 = vsel %vm11501_vm7, %v7143_v22, %v7144_v23  ;;  %v7149_v29 = vsel %vm11501_vm7, %v9487_v27, %v7148_v28  ;;  %v7152_v13 = vsel %vm11501_vm7, %v7150_v32, %v7151_v56 }
 0x401   : > { %6653 = vmatprep.mubr.bf16.mxu0 %v10886_v6  ;;  %6846 = vmatprep.mubr.bf16.mxu1 %v10886_v6  ;;  %v7155_v21 = vrot.slane %v9453_v9, 5  ;;  %v7185_v22 = vrot.slane %v7183_v38, 4  ;;  %v7186_v23 = vrot.slane %v9466_v19, 5  ;;  %v7190_v28 = vrot.slane %v9468_v24, 5  ;;  %v9471_v9 = vld [vmem:[%s11000_s15 + $0xac] sm:$0xf] }
 0x402   : > { %v7117_v50 = vsel %vm11501_vm7, %v7115_v63, %v7116_v41  ;;  %v7158_v41 = vrot.slane %v9454_v48, 5  ;;  %v9493_v27 = vrot.slane %v9467_v34, 9  ;;  %v7193_v56 = vrot.slane %v9469_v36, 5  ;;  %v9472_v48 = vld [vmem:[%s11000_s15 + $0xb0] sm:$0x1]  ;;  %v10773_v19 = vld [vmem:[%s12968_s3 + $0x48] sm:$0xff]  }
 0x403   : > { %v9499_v8 = vcombine.low %v7114_v44, %v7117_v50  ;;  %v7157_v63 = vrot.slane %v7155_v21, 4  ;;  %v7156_v44 = vsel %vm11501_vm7, %v9488_v12, %v7155_v21  ;;  %v7192_v32 = vrot.slane %v7190_v28, 4  ;;  %v10778_v24 = vld [vmem:[%s12968_s3 + $0x10] sm:$0xff]   ;;  %v10782_v34 = vld [vmem:[%s12968_s3 + $0x18] sm:$0xff]  }
 0x404   : > { %v7197_v21 = vrot.slane %v9471_v9, 5  ;;  %v9494_v12 = vrot.slane %v9470_v35, 9  ;;  %v10783_v36 = vld [vmem:[%s12968_s3 + $0xd8] sm:$0xff]   ;;  %v10788_v9 = vld [vmem:[%s12968_s3 + $0xa0] sm:$0xff]   ;;  %v7877_v35 = vsub.s32 2, %v10983_v5 }
 0x405   : > { %v7159_v50 = vsel %vm11501_vm7, %v7157_v63, %v7158_v41  ;;  %v7200_v41 = vrot.slane %v9472_v48, 5  ;;  %v7865_v48 = vld [vmem:[%s12967_s2] sm:$0xf] }
 0x406   : > { %v7199_v63 = vrot.slane %v7197_v21, 4 }
 0x408   : > { %9413 = vmatmul.mubr.msk.bf16.gmra.mrb[48].mxu0 %vm752_vm3, %v9396_v42  ;;  %9430 = vmatmul.mubr.msk.bf16.gmra.mrb[48].mxu1 %vm752_vm3, %v9396_v42  ;;  %v7124_v42 = vsel %vm11501_vm7, %v7122_v17, %v7123_v10  ;;  %v7164_v17 = vrot.slane %v7162_v39, 4  ;;  %v7165_v10 = vrot.slane %v9457_v58, 5  ;;  %v9475_v58 = vld [vmem:[%s11000_s15 + $0xbc] sm:$0x1] }
 0x409   : > { %6663 = vmatprep.mubr.bf16.mxu0 %v10886_v6  ;;  %6856 = vmatprep.mubr.bf16.mxu1 %v10886_v6  ;;  %v9500_v30 = vcombine.low %v7121_v59, %v7124_v42  ;;  %v7163_v59 = vsel %vm11501_vm7, %v9489_v20, %v7162_v39  ;;  %v7204_v39 = vrot.slane %v9474_v14, 5  ;;  %v9495_v20 = vrot.slane %v9473_v57, 9  ;;  %v10791_v14 = vld [vmem:[%s12968_s3 + $0xe8] sm:$0xff]  }
 0x40a   : > { %v7166_v42 = vsel %vm11501_vm7, %v7164_v17, %v7165_v10  ;;  %v7207_v10 = vrot.slane %v9475_v58, 5 }
 0x40b   : > { %v7206_v17 = vrot.slane %v7204_v39, 4 }
 0x410   : > { %9414 = vmatmul.mubr.msk.bf16.gmra.mrb[52].mxu0 %vm752_vm3, %v9397_v31  ;;  %9431 = vmatmul.mubr.msk.bf16.gmra.mrb[52].mxu1 %vm752_vm3, %v9397_v31  ;;  %v7138_v31 = vsel %vm11501_vm7, %v7136_v11, %v7137_v16  ;;  %v7178_v11 = vrot.slane %v7176_v45, 4  ;;  %v7179_v16 = vrot.slane %v9463_v37, 5  ;;  %v9481_v37 = vld [vmem:[%s11000_s15 + $0xd4] sm:$0x1]  ;;  %s8696_s15 = scalar_lea.sflag [#allocation4], %s227_s29 }
 0x411   : > { %6673 = vmatprep.mubr.bf16.mxu0 %v10886_v6  ;;  %6866 = vmatprep.mubr.bf16.mxu1 %v10886_v6  ;;  %v9502_v61 = vcombine.low %v7135_v15, %v7138_v31  ;;  %v7177_v15 = vsel %vm11501_vm7, %v9491_v7, %v7176_v45  ;;  %v7218_v45 = vrot.slane %v9480_v54, 5  ;;  %v9497_v7 = vrot.slane %v9479_v25, 9 }
 0x412   : > { %v7180_v31 = vsel %vm11501_vm7, %v7178_v11, %v7179_v16  ;;  %v7221_v16 = vrot.slane %v9481_v37, 5 }
 0x413   : > { %v7220_v11 = vrot.slane %v7218_v45, 4  ;;  %v7219_v18 = vsel %vm11501_vm7, %v9497_v7, %v7218_v45 }
 0x418   : > { %9415 = vmatmul.mubr.msk.bf16.gmra.mrb[56].mxu0 %vm752_vm3, %v9398_v43  ;;  %9432 = vmatmul.mubr.msk.bf16.gmra.mrb[56].mxu1 %vm752_vm3, %v9398_v43  ;;  %v9503_v43 = vcombine.low %v7142_v26, %v7145_v2  ;;  %v7184_v26 = vsel %vm11501_vm7, %v9492_v3, %v7183_v38  ;;  %v7187_v2 = vsel %vm11501_vm7, %v7185_v22, %v7186_v23  ;;  %v10769_v38 = vld [vmem:[%s12968_s3 + $0x40] sm:$0xff]   ;;  %v10775_v3 = vld [vmem:[%s12968_s3 + $0xc8] sm:$0xff]   ;;  %v10777_v23 = vld [vmem:[%s12968_s3 + $0x50] sm:$0xff]  }
 0x419   : > { %6683 = vmatprep.mubr.bf16.mxu0 %v10886_v6  ;;  %6876 = vmatprep.mubr.bf16.mxu1 %v10886_v6  ;;  %v10776_v22 = vld [vmem:[%s12968_s3 + $0x88] sm:$0xff]  }
 0x41a   : > { %9584 = vmatprep.subr.bf16.mxu0 %v10769_v38 }
 0x420   : > { %9416 = vmatmul.mubr.msk.bf16.gmra.mrb[60].mxu0 %vm752_vm3, %v9399_v4  ;;  %9433 = vmatmul.mubr.msk.bf16.gmra.mrb[60].mxu1 %vm752_vm3, %v9399_v4  ;;  %v9504_v4 = vcombine.low %v7149_v29, %v7152_v13  ;;  %v7191_v29 = vsel %vm11501_vm7, %v9493_v27, %v7190_v28  ;;  %v7194_v13 = vsel %vm11501_vm7, %v7192_v32, %v7193_v56  ;;  %v10781_v28 = vld [vmem:[%s12968_s3 + $0x58] sm:$0xff]   ;;  %v10785_v27 = vld [vmem:[%s12968_s3 + $0x60] sm:$0xff]  }
 0x421   : > { %7383 = vmatprep.mubr.bf16.mxu0 %v10886_v6  ;;  %7576 = vmatprep.mubr.bf16.mxu1 %v10886_v6  ;;  %v10786_v32 = vld [vmem:[%s12968_s3 + $0x20] sm:$0xff]  }
 0x422   : > { %v10787_v56 = vld [vmem:[%s12968_s3 + $0xe0] sm:$0xff]  }
 0x428   : > { %9516 = vmatmul.mubr.msk.bf16.vlgmr.msra.gmra.mrb[0].mxu0 %vm752_vm3, %v9499_v8  ;;  %9533 = vmatmul.mubr.msk.bf16.vlgmr.msra.gmra.mrb[0].mxu1 %vm752_vm3, %v9499_v8  ;;  %v9505_v8 = vcombine.low %v7156_v44, %v7159_v50  ;;  %v7198_v44 = vsel %vm11501_vm7, %v9494_v12, %v7197_v21  ;;  %v7201_v50 = vsel %vm11501_vm7, %v7199_v63, %v7200_v41  ;;  %v7869_v21 = vsub.s32 0, %v10983_v5 }
 0x429   : > { %7393 = vmatprep.mubr.bf16.mxu0 %v10886_v6  ;;  %7586 = vmatprep.mubr.bf16.mxu1 %v10886_v6  ;;  %v7873_v12 = vsub.s32 1, %v10983_v5  ;;  %v12724_v41 = vrot.slane %v7865_v48, %v7877_v35 }
 0x42a   : > { %9585 = vmatpush3.bf16.msra.mxu0 %v10770_v49  ;;  %v12720_v63 = vrot.slane %v7865_v48, %v7869_v21 }
 0x42b   : > { %9586 = vmatprep.subr.bf16.mxu0 %v10773_v19 }
 0x430   : > { %9517 = vmatmul.mubr.msk.bf16.gmra.mrb[4].mxu0 %vm752_vm3, %v9500_v30  ;;  %9534 = vmatmul.mubr.msk.bf16.gmra.mrb[4].mxu1 %vm752_vm3, %v9500_v30  ;;  %v9506_v30 = vcombine.low %v7163_v59, %v7166_v42  ;;  %v7205_v59 = vsel %vm11501_vm7, %v9495_v20, %v7204_v39  ;;  %v7208_v42 = vsel %vm11501_vm7, %v7206_v17, %v7207_v10  ;;  %v10792_v39 = vld [vmem:[%s12968_s3 + $0xa8] sm:$0xff]  }
 0x431   : > { %7403 = vmatprep.mubr.bf16.mxu0 %v10886_v6  ;;  %7596 = vmatprep.mubr.bf16.mxu1 %v10886_v6 }
 0x438   : > { %9518 = vmatmul.mubr.msk.bf16.gmra.mrb[8].mxu0 %vm752_vm3, %v9501_v60  ;;  %9535 = vmatmul.mubr.msk.bf16.gmra.mrb[8].mxu1 %vm752_vm3, %v9501_v60  ;;  %v9507_v60 = vcombine.low %v7170_v62, %v7173_v1  ;;  %v7212_v62 = vsel %vm11501_vm7, %v9496_v33, %v7211_v40  ;;  %v7215_v1 = vsel %vm11501_vm7, %v7213_v51, %v7214_v52 }
 0x439   : > { %7413 = vmatprep.mubr.bf16.mxu0 %v10886_v6  ;;  %7606 = vmatprep.mubr.bf16.mxu1 %v10886_v6 }
 0x440   : > { %9519 = vmatmul.mubr.msk.bf16.gmra.mrb[12].mxu0 %vm752_vm3, %v9502_v61  ;;  %9536 = vmatmul.mubr.msk.bf16.gmra.mrb[12].mxu1 %vm752_vm3, %v9502_v61  ;;  %v9508_v61 = vcombine.low %v7177_v15, %v7180_v31  ;;  %v7222_v15 = vsel %vm11501_vm7, %v7220_v11, %v7221_v16 }
 0x441   : > { %7423 = vmatprep.mubr.bf16.mxu0 %v10886_v6  ;;  %7616 = vmatprep.mubr.bf16.mxu1 %v10886_v6  ;;  %v9514_v31 = vcombine.low %v7219_v18, %v7222_v15 }
 0x448   : > { %9520 = vmatmul.mubr.msk.bf16.gmra.mrb[16].mxu0 %vm752_vm3, %v9503_v43  ;;  %9537 = vmatmul.mubr.msk.bf16.gmra.mrb[16].mxu1 %vm752_vm3, %v9503_v43  ;;  %v9509_v43 = vcombine.low %v7184_v26, %v7187_v2  ;;  %v10779_v26 = vld [vmem:[%s12968_s3 + $0xd0] sm:$0xff]  }
 0x449   : > { %7433 = vmatprep.mubr.bf16.mxu0 %v10886_v6  ;;  %7626 = vmatprep.mubr.bf16.mxu1 %v10886_v6  ;;  %v10780_v2 = vld [vmem:[%s12968_s3 + $0x90] sm:$0xff]  }
 0x450   : > { %9521 = vmatmul.mubr.msk.bf16.gmra.mrb[20].mxu0 %vm752_vm3, %v9504_v4  ;;  %9538 = vmatmul.mubr.msk.bf16.gmra.mrb[20].mxu1 %vm752_vm3, %v9504_v4  ;;  %v9510_v4 = vcombine.low %v7191_v29, %v7194_v13  ;;  %v10789_v29 = vld [vmem:[%s12968_s3 + $0x68] sm:$0xff]  }
 0x451   : > { %7443 = vmatprep.mubr.bf16.mxu0 %v10886_v6  ;;  %7636 = vmatprep.mubr.bf16.mxu1 %v10886_v6  ;;  %v10790_v13 = vld [vmem:[%s12968_s3 + $0x28] sm:$0xff]  }
 0x458   : > { %9522 = vmatmul.mubr.msk.bf16.gmra.mrb[24].mxu0 %vm752_vm3, %v9505_v8  ;;  %9539 = vmatmul.mubr.msk.bf16.gmra.mrb[24].mxu1 %vm752_vm3, %v9505_v8  ;;  %v9511_v8 = vcombine.low %v7198_v44, %v7201_v50  ;;  %v12735_v50 = vrot.slane %v7865_v48, %v7873_v12 }
 0x459   : > { %7453 = vmatprep.mubr.bf16.mxu0 %v10886_v6  ;;  %7646 = vmatprep.mubr.bf16.mxu1 %v10886_v6 }
 0x460   : > { %9523 = vmatmul.mubr.msk.bf16.gmra.mrb[28].mxu0 %vm752_vm3, %v9506_v30  ;;  %9540 = vmatmul.mubr.msk.bf16.gmra.mrb[28].mxu1 %vm752_vm3, %v9506_v30  ;;  %v9512_v30 = vcombine.low %v7205_v59, %v7208_v42 }
 0x461   : > { %7463 = vmatprep.mubr.bf16.mxu0 %v10886_v6  ;;  %7656 = vmatprep.mubr.bf16.mxu1 %v10886_v6 }
 0x468   : > { %9524 = vmatmul.mubr.msk.bf16.gmra.mrb[32].mxu0 %vm752_vm3, %v9507_v60  ;;  %9541 = vmatmul.mubr.msk.bf16.gmra.mrb[32].mxu1 %vm752_vm3, %v9507_v60  ;;  %v9513_v60 = vcombine.low %v7212_v62, %v7215_v1 }
 0x469   : > { %7473 = vmatprep.mubr.bf16.mxu0 %v10886_v6  ;;  %7666 = vmatprep.mubr.bf16.mxu1 %v10886_v6 }
 0x470   : > { %9525 = vmatmul.mubr.msk.bf16.gmra.mrb[36].mxu0 %vm752_vm3, %v9508_v61  ;;  %9542 = vmatmul.mubr.msk.bf16.gmra.mrb[36].mxu1 %vm752_vm3, %v9508_v61  ;;  %v10774_v61 = vld [vmem:[%s12968_s3 + $0x8] sm:$0xff]  }
 0x471   : > { %7483 = vmatprep.mubr.bf16.mxu0 %v10886_v6  ;;  %7676 = vmatprep.mubr.bf16.mxu1 %v10886_v6 }
 0x472   : > { %9587 = vmatpush3.bf16.msra.mxu0 %v10774_v61 }
 0x473   : > { %9588 = vmatprep.subr.bf16.mxu0 %v10777_v23 }
 0x476   : > { %9589 = vmatpush3.bf16.msra.mxu0 %v10778_v24 }
 0x477   : > { %9590 = vmatprep.subr.bf16.mxu0 %v10781_v28 }
 0x478   : > { %9526 = vmatmul.mubr.msk.bf16.gmra.mrb[40].mxu0 %vm752_vm3, %v9509_v43  ;;  %9543 = vmatmul.mubr.msk.bf16.gmra.mrb[40].mxu1 %vm752_vm3, %v9509_v43  ;;  %v10784_v43 = vld [vmem:[%s12968_s3 + $0x98] sm:$0xff]  }
 0x479   : > { %7493 = vmatprep.mubr.bf16.mxu0 %v10886_v6  ;;  %7686 = vmatprep.mubr.bf16.mxu1 %v10886_v6 }
 0x47a   : > { %9591 = vmatpush3.bf16.msra.mxu0 %v10782_v34 }
 0x47b   : > { %9592 = vmatprep.subr.bf16.mxu0 %v10785_v27 }
 0x47e   : > { %9593 = vmatpush3.bf16.msra.mxu0 %v10786_v32 }
 0x47f   : > { %9594 = vmatprep.subr.bf16.mxu0 %v10789_v29 }
 0x480   : > { %9527 = vmatmul.mubr.msk.bf16.gmra.mrb[44].mxu0 %vm752_vm3, %v9510_v4  ;;  %9544 = vmatmul.mubr.msk.bf16.gmra.mrb[44].mxu1 %vm752_vm3, %v9510_v4  ;;  %v7881_v4 = vsub.s32 3, %v10983_v5 }
 0x481   : > { %7503 = vmatprep.mubr.bf16.mxu0 %v10886_v6  ;;  %7696 = vmatprep.mubr.bf16.mxu1 %v10886_v6 }
 0x482   : > { %9595 = vmatpush3.bf16.msra.mxu0 %v10790_v13  ;;  %v12731_v44 = vrot.slane %v7865_v48, %v7881_v4 }
 0x488   : > { %9528 = vmatmul.mubr.msk.bf16.gmra.mrb[48].mxu0 %vm752_vm3, %v9511_v8  ;;  %9545 = vmatmul.mubr.msk.bf16.gmra.mrb[48].mxu1 %vm752_vm3, %v9511_v8 }
 0x489   : > { %7513 = vmatprep.mubr.bf16.mxu0 %v10886_v6  ;;  %7706 = vmatprep.mubr.bf16.mxu1 %v10886_v6 }
 0x490   : > { %9529 = vmatmul.mubr.msk.bf16.gmra.mrb[52].mxu0 %vm752_vm3, %v9512_v30  ;;  %9546 = vmatmul.mubr.msk.bf16.gmra.mrb[52].mxu1 %vm752_vm3, %v9512_v30 }
 0x491   : > { %7523 = vmatprep.mubr.bf16.mxu0 %v10886_v6  ;;  %7716 = vmatprep.mubr.bf16.mxu1 %v10886_v6 }
 0x498   : > { %9530 = vmatmul.mubr.msk.bf16.gmra.mrb[56].mxu0 %vm752_vm3, %v9513_v60  ;;  %9547 = vmatmul.mubr.msk.bf16.gmra.mrb[56].mxu1 %vm752_vm3, %v9513_v60 }
 0x499   : > { %7533 = vmatprep.mubr.bf16.mxu0 %v10886_v6  ;;  %7726 = vmatprep.mubr.bf16.mxu1 %v10886_v6  ;;  %v10771_v6 = vld [vmem:[%s12968_s3 + $0xc0] sm:$0xff]  }
 0x49a   : > { %9606 = vmatprep.subr.bf16.mxu1 %v10771_v6 }
 0x49b   : > { %9607 = vmatpush3.bf16.msra.mxu1 %v10772_v55 }
 0x49c   : > { %9608 = vmatprep.subr.bf16.mxu1 %v10775_v3 }
 0x49f   : > { %9609 = vmatpush3.bf16.msra.mxu1 %v10776_v22 }
 0x4a0   : > { %9531 = vmatmul.mubr.msk.bf16.gmra.mrb[60].mxu0 %vm752_vm3, %v9514_v31  ;;  %9548 = vmatmul.mubr.msk.bf16.gmra.mrb[60].mxu1 %vm752_vm3, %v9514_v31 }
 0x4a1   : > { %9610 = vmatprep.subr.bf16.mxu1 %v10779_v26 }
 0x4a3   : > { %9611 = vmatpush3.bf16.msra.mxu1 %v10780_v2 }
 0x4a4   : > { %9612 = vmatprep.subr.bf16.mxu1 %v10783_v36 }
 0x4a7   : > { %9613 = vmatpush3.bf16.msra.mxu1 %v10784_v43 }
 0x4a8   : > { %9614 = vmatprep.subr.bf16.mxu1 %v10787_v56 }
 0x4ab   : > { %9615 = vmatpush3.bf16.msra.mxu1 %v10788_v9 }
 0x4ac   : > { %9616 = vmatprep.subr.bf16.mxu1 %v10791_v14 }
 0x4af   : > { %9617 = vmatpush3.bf16.msra.mxu1 %v10792_v39 }
 0x4fb   : > { %v7385_v57 = vpop.f32.mrb[0].mxu0  ;;  %v7578_v58 = vpop.f32.mrb[0].mxu1 }
 0x4fc   : > { %v7887_v8 = vadd.f32 %v12720_v63, %v7385_v57  ;;  %v7889_v20 = vadd.f32 %v12724_v41, %v7578_v58  ;;  %v7387_v17 = vpop.f32.mrb[1].mxu0  ;;  %v7580_v10 = vpop.f32.mrb[1].mxu1 }
 0x4fd   : > { %v7888_v53 = vadd.f32 %v12735_v50, %v7387_v17  ;;  %v7890_v59 = vadd.f32 %v12731_v44, %v7580_v10  ;;  %v7389_v42 = vpop.f32.mrb[2].mxu0  ;;  %v7582_v40 = vpop.f32.mrb[2].mxu1 }
 0x4fe   : > { %v7891_v46 = vadd.f32 %v12720_v63, %v7389_v42  ;;  %v7893_v47 = vadd.f32 %v12724_v41, %v7582_v40  ;;  %v7391_v30 = vpop.f32.mrb[3].mxu0  ;;  %v7584_v33 = vpop.f32.mrb[3].mxu1  ;;  %v8015_v54 = vmax.f32 %v7887_v8, 0.0  ;;  %v8017_v62 = vmax.f32 %v7889_v20, 0.0 }
 0x4ff   : > { %v7892_v51 = vadd.f32 %v12735_v50, %v7391_v30  ;;  %v7894_v52 = vadd.f32 %v12731_v44, %v7584_v33  ;;  %v8016_v25 = vmax.f32 %v7888_v53, 0.0  ;;  %v8018_v37 = vmax.f32 %v7890_v59, 0.0 }
 0x500   : > { %v8019_v1 = vmax.f32 %v7891_v46, 0.0  ;;  %v8021_v45 = vmax.f32 %v7893_v47, 0.0  ;;  %v10887_v33 = vmov 0.0  }
 0x501   : > { %v8020_v60 = vmax.f32 %v7892_v51, 0.0  ;;  %v8022_v7 = vmax.f32 %v7894_v52, 0.0  ;;  %243 = vst.msk [vmem:[#allocation2] sm:$0xf] %vm12757_vm8, %v10887_v33  ;;  %v10800_v33 = vld [vmem:[%s12968_s3 + $0xb8] sm:$0xff]  }
 0x502   : > { %v8144_v11 = vadd.f32 %v8019_v1, %v8015_v54  ;;  %v8218_v16 = vadd.f32 %v8021_v45, %v8017_v62 }
 0x503   : > { %v8181_v18 = vadd.f32 %v8020_v60, %v8016_v25  ;;  %v8255_v15 = vadd.f32 %v8022_v7, %v8018_v37  ;;  %v7395_v31 = vpop.f32.mrb[4].mxu0  ;;  %v7588_v38 = vpop.f32.mrb[4].mxu1 }
 0x504   : > { %v7895_v49 = vadd.f32 %v12720_v63, %v7395_v31  ;;  %v7897_v6 = vadd.f32 %v12724_v41, %v7588_v38  ;;  %v7397_v55 = vpop.f32.mrb[5].mxu0  ;;  %v7590_v19 = vpop.f32.mrb[5].mxu1 }
 0x505   : > { %v7896_v61 = vadd.f32 %v12735_v50, %v7397_v55  ;;  %v7898_v3 = vadd.f32 %v12731_v44, %v7590_v19  ;;  %v7399_v22 = vpop.f32.mrb[6].mxu0  ;;  %v7592_v23 = vpop.f32.mrb[6].mxu1 }
 0x506   : > { %v8023_v24 = vmax.f32 %v7895_v49, 0.0  ;;  %v8025_v26 = vmax.f32 %v7897_v6, 0.0  ;;  %v7899_v2 = vadd.f32 %v12720_v63, %v7399_v22  ;;  %v7901_v28 = vadd.f32 %v12724_v41, %v7592_v23  ;;  %v7401_v34 = vpop.f32.mrb[7].mxu0  ;;  %v7594_v36 = vpop.f32.mrb[7].mxu1 }
 0x507   : > { %v8024_v43 = vmax.f32 %v7896_v61, 0.0  ;;  %v8026_v27 = vmax.f32 %v7898_v3, 0.0  ;;  %v7900_v32 = vadd.f32 %v12735_v50, %v7401_v34  ;;  %v7902_v56 = vadd.f32 %v12731_v44, %v7594_v36  ;;  %v10794_v34 = vld [vmem:[%s12968_s3 + $0x30] sm:$0xff]  }
 0x508   : > { %v8145_v9 = vadd.f32 %v8144_v11, %v8023_v24  ;;  %v8219_v29 = vadd.f32 %v8218_v16, %v8025_v26  ;;  %v8027_v13 = vmax.f32 %v7899_v2, 0.0  ;;  %v8029_v48 = vmax.f32 %v7901_v28, 0.0  ;;  %v10793_v28 = vld [vmem:[%s12968_s3 + $0x70] sm:$0xff]  }
 0x509   : > { %v8182_v14 = vadd.f32 %v8181_v18, %v8024_v43  ;;  %v8256_v39 = vadd.f32 %v8255_v15, %v8026_v27  ;;  %v8028_v57 = vmax.f32 %v7900_v32, 0.0  ;;  %v8030_v58 = vmax.f32 %v7902_v56, 0.0  ;;  %v10795_v56 = vld [vmem:[%s12968_s3 + $0xf0] sm:$0xff]   ;;  %9596 = vmatprep.subr.bf16.mxu0 %v10793_v28 }
 0x50a   : > { %v8146_v8 = vadd.f32 %v8145_v9, %v8027_v13  ;;  %v8220_v20 = vadd.f32 %v8219_v29, %v8029_v48  ;;  %v10796_v9 = vld [vmem:[%s12968_s3 + $0xb0] sm:$0xff]   ;;  %v10797_v29 = vld [vmem:[%s12968_s3 + $0x78] sm:$0xff]   ;;  %9597 = vmatpush3.bf16.msra.mxu0 %v10794_v34  ;;  %9618 = vmatprep.subr.bf16.mxu1 %v10795_v56 }
 0x50b   : > { %v8183_v10 = vadd.f32 %v8182_v14, %v8028_v57  ;;  %v8257_v53 = vadd.f32 %v8256_v39, %v8030_v58  ;;  %v7405_v59 = vpop.f32.mrb[8].mxu0  ;;  %v7598_v42 = vpop.f32.mrb[8].mxu1  ;;  %v10799_v57 = vld [vmem:[%s12968_s3 + $0xf8] sm:$0xff]   ;;  %9619 = vmatpush3.bf16.msra.mxu1 %v10796_v9  ;;  %9598 = vmatprep.subr.bf16.mxu0 %v10797_v29 }
 0x50c   : > { %v7903_v40 = vadd.f32 %v12720_v63, %v7405_v59  ;;  %v7905_v46 = vadd.f32 %v12724_v41, %v7598_v42  ;;  %v7407_v47 = vpop.f32.mrb[9].mxu0  ;;  %v7600_v30 = vpop.f32.mrb[9].mxu1  ;;  %v10798_v42 = vld [vmem:[%s12968_s3 + $0x38] sm:$0xff]   ;;  %9620 = vmatprep.subr.bf16.mxu1 %v10799_v57 }
 0x50d   : > { %v7904_v51 = vadd.f32 %v12735_v50, %v7407_v47  ;;  %v7906_v0 = vadd.f32 %v12731_v44, %v7600_v30  ;;  %v7409_v52 = vpop.f32.mrb[10].mxu0  ;;  %v7602_v54 = vpop.f32.mrb[10].mxu1 }
 0x50e   : > { %v8031_v62 = vmax.f32 %v7903_v40, 0.0  ;;  %v8033_v1 = vmax.f32 %v7905_v46, 0.0  ;;  %v7907_v45 = vadd.f32 %v12720_v63, %v7409_v52  ;;  %v7909_v25 = vadd.f32 %v12724_v41, %v7602_v54  ;;  %v7411_v37 = vpop.f32.mrb[11].mxu0  ;;  %v7604_v60 = vpop.f32.mrb[11].mxu1  ;;  %9599 = vmatpush3.bf16.msra.mxu0 %v10798_v42 }
 0x50f   : > { %v8032_v7 = vmax.f32 %v7904_v51, 0.0  ;;  %v8034_v11 = vmax.f32 %v7906_v0, 0.0  ;;  %v7908_v16 = vadd.f32 %v12735_v50, %v7411_v37  ;;  %v7910_v18 = vadd.f32 %v12731_v44, %v7604_v60  ;;  %9621 = vmatpush3.bf16.msra.mxu1 %v10800_v33 }
 0x510   : > { %v8147_v15 = vadd.f32 %v8146_v8, %v8031_v62  ;;  %v8221_v31 = vadd.f32 %v8220_v20, %v8033_v1  ;;  %v8035_v38 = vmax.f32 %v7907_v45, 0.0  ;;  %v8037_v49 = vmax.f32 %v7909_v25, 0.0 }
 0x511   : > { %v8184_v6 = vadd.f32 %v8183_v10, %v8032_v7  ;;  %v8258_v55 = vadd.f32 %v8257_v53, %v8034_v11  ;;  %v8036_v19 = vmax.f32 %v7908_v16, 0.0  ;;  %v8038_v61 = vmax.f32 %v7910_v18, 0.0 }
 0x512   : > { %v8148_v3 = vadd.f32 %v8147_v15, %v8035_v38  ;;  %v8222_v22 = vadd.f32 %v8221_v31, %v8037_v49 }
 0x513   : > { %v8185_v23 = vadd.f32 %v8184_v6, %v8036_v19  ;;  %v8259_v24 = vadd.f32 %v8258_v55, %v8038_v61  ;;  %v7415_v26 = vpop.f32.mrb[12].mxu0  ;;  %v7608_v2 = vpop.f32.mrb[12].mxu1 }
 0x514   : > { %v7911_v36 = vadd.f32 %v12720_v63, %v7415_v26  ;;  %v7913_v43 = vadd.f32 %v12724_v41, %v7608_v2  ;;  %v7417_v27 = vpop.f32.mrb[13].mxu0  ;;  %v7610_v32 = vpop.f32.mrb[13].mxu1 }
 0x515   : > { %v7912_v13 = vadd.f32 %v12735_v50, %v7417_v27  ;;  %v7914_v48 = vadd.f32 %v12731_v44, %v7610_v32  ;;  %v7419_v14 = vpop.f32.mrb[14].mxu0  ;;  %v7612_v39 = vpop.f32.mrb[14].mxu1 }
 0x516   : > { %v8039_v58 = vmax.f32 %v7911_v36, 0.0  ;;  %v8041_v8 = vmax.f32 %v7913_v43, 0.0  ;;  %v7915_v20 = vadd.f32 %v12720_v63, %v7419_v14  ;;  %v7917_v10 = vadd.f32 %v12724_v41, %v7612_v39  ;;  %v7421_v53 = vpop.f32.mrb[15].mxu0  ;;  %v7614_v59 = vpop.f32.mrb[15].mxu1 }
 0x517   : > { %v8040_v40 = vmax.f32 %v7912_v13, 0.0  ;;  %v8042_v46 = vmax.f32 %v7914_v48, 0.0  ;;  %v7916_v47 = vadd.f32 %v12735_v50, %v7421_v53  ;;  %v7918_v30 = vadd.f32 %v12731_v44, %v7614_v59 }
 0x518   : > { %v8149_v51 = vadd.f32 %v8148_v3, %v8039_v58  ;;  %v8223_v0 = vadd.f32 %v8222_v22, %v8041_v8  ;;  %v8043_v52 = vmax.f32 %v7915_v20, 0.0  ;;  %v8045_v54 = vmax.f32 %v7917_v10, 0.0 }
 0x519   : > { %v8186_v62 = vadd.f32 %v8185_v23, %v8040_v40  ;;  %v8260_v1 = vadd.f32 %v8259_v24, %v8042_v46  ;;  %v8044_v45 = vmax.f32 %v7916_v47, 0.0  ;;  %v8046_v25 = vmax.f32 %v7918_v30, 0.0 }
 0x51a   : > { %v8150_v37 = vadd.f32 %v8149_v51, %v8043_v52  ;;  %v8224_v60 = vadd.f32 %v8223_v0, %v8045_v54 }
 0x51b   : > { %v8187_v7 = vadd.f32 %v8186_v62, %v8044_v45  ;;  %v8261_v11 = vadd.f32 %v8260_v1, %v8046_v25  ;;  %v7425_v16 = vpop.f32.mrb[16].mxu0  ;;  %v7618_v18 = vpop.f32.mrb[16].mxu1 }
 0x51c   : > { %v7919_v15 = vadd.f32 %v12720_v63, %v7425_v16  ;;  %v7921_v31 = vadd.f32 %v12724_v41, %v7618_v18  ;;  %v7427_v38 = vpop.f32.mrb[17].mxu0  ;;  %v7620_v49 = vpop.f32.mrb[17].mxu1 }
 0x51d   : > { %v7920_v6 = vadd.f32 %v12735_v50, %v7427_v38  ;;  %v7922_v55 = vadd.f32 %v12731_v44, %v7620_v49  ;;  %v7429_v19 = vpop.f32.mrb[18].mxu0  ;;  %v7622_v61 = vpop.f32.mrb[18].mxu1 }
 0x51e   : > { %v8047_v3 = vmax.f32 %v7919_v15, 0.0  ;;  %v8049_v22 = vmax.f32 %v7921_v31, 0.0  ;;  %v7923_v23 = vadd.f32 %v12720_v63, %v7429_v19  ;;  %v7925_v24 = vadd.f32 %v12724_v41, %v7622_v61  ;;  %v7431_v26 = vpop.f32.mrb[19].mxu0  ;;  %v7624_v2 = vpop.f32.mrb[19].mxu1 }
 0x51f   : > { %v8048_v28 = vmax.f32 %v7920_v6, 0.0  ;;  %v8050_v34 = vmax.f32 %v7922_v55, 0.0  ;;  %v7924_v36 = vadd.f32 %v12735_v50, %v7431_v26  ;;  %v7926_v43 = vadd.f32 %v12731_v44, %v7624_v2 }
 0x520   : > { %v8151_v27 = vadd.f32 %v8150_v37, %v8047_v3  ;;  %v8225_v32 = vadd.f32 %v8224_v60, %v8049_v22  ;;  %v8051_v56 = vmax.f32 %v7923_v23, 0.0  ;;  %v8053_v9 = vmax.f32 %v7925_v24, 0.0 }
 0x521   : > { %v8188_v29 = vadd.f32 %v8187_v7, %v8048_v28  ;;  %v8262_v13 = vadd.f32 %v8261_v11, %v8050_v34  ;;  %v8052_v48 = vmax.f32 %v7924_v36, 0.0  ;;  %v8054_v14 = vmax.f32 %v7926_v43, 0.0 }
 0x522   : > { %v8152_v39 = vadd.f32 %v8151_v27, %v8051_v56  ;;  %v8226_v57 = vadd.f32 %v8225_v32, %v8053_v9 }
 0x523   : > { %v8189_v58 = vadd.f32 %v8188_v29, %v8052_v48  ;;  %v8263_v8 = vadd.f32 %v8262_v13, %v8054_v14  ;;  %v7435_v20 = vpop.f32.mrb[20].mxu0  ;;  %v7628_v10 = vpop.f32.mrb[20].mxu1 }
 0x524   : > { %v7927_v53 = vadd.f32 %v12720_v63, %v7435_v20  ;;  %v7929_v59 = vadd.f32 %v12724_v41, %v7628_v10  ;;  %v7437_v42 = vpop.f32.mrb[21].mxu0  ;;  %v7630_v40 = vpop.f32.mrb[21].mxu1 }
 0x525   : > { %v7928_v46 = vadd.f32 %v12735_v50, %v7437_v42  ;;  %v7930_v47 = vadd.f32 %v12731_v44, %v7630_v40  ;;  %v7439_v30 = vpop.f32.mrb[22].mxu0  ;;  %v7632_v33 = vpop.f32.mrb[22].mxu1 }
 0x526   : > { %v8055_v51 = vmax.f32 %v7927_v53, 0.0  ;;  %v8057_v0 = vmax.f32 %v7929_v59, 0.0  ;;  %v7931_v52 = vadd.f32 %v12720_v63, %v7439_v30  ;;  %v7933_v54 = vadd.f32 %v12724_v41, %v7632_v33  ;;  %v7441_v62 = vpop.f32.mrb[23].mxu0  ;;  %v7634_v1 = vpop.f32.mrb[23].mxu1 }
 0x527   : > { %v8056_v45 = vmax.f32 %v7928_v46, 0.0  ;;  %v8058_v25 = vmax.f32 %v7930_v47, 0.0  ;;  %v7932_v37 = vadd.f32 %v12735_v50, %v7441_v62  ;;  %v7934_v60 = vadd.f32 %v12731_v44, %v7634_v1 }
 0x528   : > { %v8153_v7 = vadd.f32 %v8152_v39, %v8055_v51  ;;  %v8227_v11 = vadd.f32 %v8226_v57, %v8057_v0  ;;  %v8059_v16 = vmax.f32 %v7931_v52, 0.0  ;;  %v8061_v18 = vmax.f32 %v7933_v54, 0.0 }
 0x529   : > { %v8190_v15 = vadd.f32 %v8189_v58, %v8056_v45  ;;  %v8264_v31 = vadd.f32 %v8263_v8, %v8058_v25  ;;  %v8060_v38 = vmax.f32 %v7932_v37, 0.0  ;;  %v8062_v49 = vmax.f32 %v7934_v60, 0.0 }
 0x52a   : > { %v8154_v6 = vadd.f32 %v8153_v7, %v8059_v16  ;;  %v8228_v55 = vadd.f32 %v8227_v11, %v8061_v18 }
 0x52b   : > { %v8191_v19 = vadd.f32 %v8190_v15, %v8060_v38  ;;  %v8265_v61 = vadd.f32 %v8264_v31, %v8062_v49  ;;  %v7445_v3 = vpop.f32.mrb[24].mxu0  ;;  %v7638_v22 = vpop.f32.mrb[24].mxu1 }
 0x52c   : > { %v7935_v23 = vadd.f32 %v12720_v63, %v7445_v3  ;;  %v7937_v24 = vadd.f32 %v12724_v41, %v7638_v22  ;;  %v7447_v26 = vpop.f32.mrb[25].mxu0  ;;  %v7640_v2 = vpop.f32.mrb[25].mxu1 }
 0x52d   : > { %v7936_v28 = vadd.f32 %v12735_v50, %v7447_v26  ;;  %v7938_v34 = vadd.f32 %v12731_v44, %v7640_v2  ;;  %v7449_v36 = vpop.f32.mrb[26].mxu0  ;;  %v7642_v43 = vpop.f32.mrb[26].mxu1 }
 0x52e   : > { %v8063_v27 = vmax.f32 %v7935_v23, 0.0  ;;  %v8065_v32 = vmax.f32 %v7937_v24, 0.0  ;;  %v7939_v56 = vadd.f32 %v12720_v63, %v7449_v36  ;;  %v7941_v9 = vadd.f32 %v12724_v41, %v7642_v43  ;;  %v7451_v29 = vpop.f32.mrb[27].mxu0  ;;  %v7644_v13 = vpop.f32.mrb[27].mxu1 }
 0x52f   : > { %v8064_v48 = vmax.f32 %v7936_v28, 0.0  ;;  %v8066_v14 = vmax.f32 %v7938_v34, 0.0  ;;  %v7940_v39 = vadd.f32 %v12735_v50, %v7451_v29  ;;  %v7942_v57 = vadd.f32 %v12731_v44, %v7644_v13 }
 0x530   : > { %v8155_v58 = vadd.f32 %v8154_v6, %v8063_v27  ;;  %v8229_v8 = vadd.f32 %v8228_v55, %v8065_v32  ;;  %v8067_v20 = vmax.f32 %v7939_v56, 0.0  ;;  %v8069_v10 = vmax.f32 %v7941_v9, 0.0 }
 0x531   : > { %v8192_v53 = vadd.f32 %v8191_v19, %v8064_v48  ;;  %v8266_v59 = vadd.f32 %v8265_v61, %v8066_v14  ;;  %v8068_v42 = vmax.f32 %v7940_v39, 0.0  ;;  %v8070_v40 = vmax.f32 %v7942_v57, 0.0 }
 0x532   : > { %v8156_v46 = vadd.f32 %v8155_v58, %v8067_v20  ;;  %v8230_v47 = vadd.f32 %v8229_v8, %v8069_v10 }
 0x533   : > { %v8193_v30 = vadd.f32 %v8192_v53, %v8068_v42  ;;  %v8267_v33 = vadd.f32 %v8266_v59, %v8070_v40  ;;  %v7455_v51 = vpop.f32.mrb[28].mxu0  ;;  %v7648_v0 = vpop.f32.mrb[28].mxu1 }
 0x534   : > { %v7943_v52 = vadd.f32 %v12720_v63, %v7455_v51  ;;  %v7945_v54 = vadd.f32 %v12724_v41, %v7648_v0  ;;  %v7457_v62 = vpop.f32.mrb[29].mxu0  ;;  %v7650_v1 = vpop.f32.mrb[29].mxu1 }
 0x535   : > { %v7944_v45 = vadd.f32 %v12735_v50, %v7457_v62  ;;  %v7946_v25 = vadd.f32 %v12731_v44, %v7650_v1  ;;  %v7459_v37 = vpop.f32.mrb[30].mxu0  ;;  %v7652_v60 = vpop.f32.mrb[30].mxu1 }
 0x536   : > { %v8071_v7 = vmax.f32 %v7943_v52, 0.0  ;;  %v8073_v11 = vmax.f32 %v7945_v54, 0.0  ;;  %v7947_v16 = vadd.f32 %v12720_v63, %v7459_v37  ;;  %v7949_v18 = vadd.f32 %v12724_v41, %v7652_v60  ;;  %v7461_v15 = vpop.f32.mrb[31].mxu0  ;;  %v7654_v31 = vpop.f32.mrb[31].mxu1 }
 0x537   : > { %v8072_v38 = vmax.f32 %v7944_v45, 0.0  ;;  %v8074_v49 = vmax.f32 %v7946_v25, 0.0  ;;  %v7948_v6 = vadd.f32 %v12735_v50, %v7461_v15  ;;  %v7950_v55 = vadd.f32 %v12731_v44, %v7654_v31 }
 0x538   : > { %v8157_v19 = vadd.f32 %v8156_v46, %v8071_v7  ;;  %v8231_v61 = vadd.f32 %v8230_v47, %v8073_v11  ;;  %v8075_v3 = vmax.f32 %v7947_v16, 0.0  ;;  %v8077_v22 = vmax.f32 %v7949_v18, 0.0 }
 0x539   : > { %v8194_v23 = vadd.f32 %v8193_v30, %v8072_v38  ;;  %v8268_v24 = vadd.f32 %v8267_v33, %v8074_v49  ;;  %v8076_v26 = vmax.f32 %v7948_v6, 0.0  ;;  %v8078_v2 = vmax.f32 %v7950_v55, 0.0 }
 0x53a   : > { %v8158_v28 = vadd.f32 %v8157_v19, %v8075_v3  ;;  %v8232_v34 = vadd.f32 %v8231_v61, %v8077_v22 }
 0x53b   : > { %v8195_v36 = vadd.f32 %v8194_v23, %v8076_v26  ;;  %v8269_v43 = vadd.f32 %v8268_v24, %v8078_v2  ;;  %v7465_v27 = vpop.f32.mrb[32].mxu0  ;;  %v7658_v32 = vpop.f32.mrb[32].mxu1 }
 0x53c   : > { %v7951_v56 = vadd.f32 %v12720_v63, %v7465_v27  ;;  %v7953_v9 = vadd.f32 %v12724_v41, %v7658_v32  ;;  %v7467_v29 = vpop.f32.mrb[33].mxu0  ;;  %v7660_v13 = vpop.f32.mrb[33].mxu1 }
 0x53d   : > { %v7952_v48 = vadd.f32 %v12735_v50, %v7467_v29  ;;  %v7954_v14 = vadd.f32 %v12731_v44, %v7660_v13  ;;  %v7469_v39 = vpop.f32.mrb[34].mxu0  ;;  %v7662_v57 = vpop.f32.mrb[34].mxu1 }
 0x53e   : > { %v8079_v58 = vmax.f32 %v7951_v56, 0.0  ;;  %v8081_v8 = vmax.f32 %v7953_v9, 0.0  ;;  %v7955_v20 = vadd.f32 %v12720_v63, %v7469_v39  ;;  %v7957_v10 = vadd.f32 %v12724_v41, %v7662_v57  ;;  %v7471_v53 = vpop.f32.mrb[35].mxu0  ;;  %v7664_v59 = vpop.f32.mrb[35].mxu1 }
 0x53f   : > { %v8080_v42 = vmax.f32 %v7952_v48, 0.0  ;;  %v8082_v40 = vmax.f32 %v7954_v14, 0.0  ;;  %v7956_v46 = vadd.f32 %v12735_v50, %v7471_v53  ;;  %v7958_v47 = vadd.f32 %v12731_v44, %v7664_v59 }
 0x540   : > { %v8159_v30 = vadd.f32 %v8158_v28, %v8079_v58  ;;  %v8233_v33 = vadd.f32 %v8232_v34, %v8081_v8  ;;  %v8083_v51 = vmax.f32 %v7955_v20, 0.0  ;;  %v8085_v0 = vmax.f32 %v7957_v10, 0.0 }
 0x541   : > { %v8196_v52 = vadd.f32 %v8195_v36, %v8080_v42  ;;  %v8270_v54 = vadd.f32 %v8269_v43, %v8082_v40  ;;  %v8084_v62 = vmax.f32 %v7956_v46, 0.0  ;;  %v8086_v1 = vmax.f32 %v7958_v47, 0.0 }
 0x542   : > { %v8160_v45 = vadd.f32 %v8159_v30, %v8083_v51  ;;  %v8234_v25 = vadd.f32 %v8233_v33, %v8085_v0 }
 0x543   : > { %v8197_v37 = vadd.f32 %v8196_v52, %v8084_v62  ;;  %v8271_v60 = vadd.f32 %v8270_v54, %v8086_v1  ;;  %v7475_v7 = vpop.f32.mrb[36].mxu0  ;;  %v7668_v11 = vpop.f32.mrb[36].mxu1 }
 0x544   : > { %v7959_v16 = vadd.f32 %v12720_v63, %v7475_v7  ;;  %v7961_v18 = vadd.f32 %v12724_v41, %v7668_v11  ;;  %v7477_v15 = vpop.f32.mrb[37].mxu0  ;;  %v7670_v31 = vpop.f32.mrb[37].mxu1 }
 0x545   : > { %v7960_v38 = vadd.f32 %v12735_v50, %v7477_v15  ;;  %v7962_v49 = vadd.f32 %v12731_v44, %v7670_v31  ;;  %v7479_v6 = vpop.f32.mrb[38].mxu0  ;;  %v7672_v55 = vpop.f32.mrb[38].mxu1 }
 0x546   : > { %v8087_v19 = vmax.f32 %v7959_v16, 0.0  ;;  %v8089_v61 = vmax.f32 %v7961_v18, 0.0  ;;  %v7963_v3 = vadd.f32 %v12720_v63, %v7479_v6  ;;  %v7965_v22 = vadd.f32 %v12724_v41, %v7672_v55  ;;  %v7481_v23 = vpop.f32.mrb[39].mxu0  ;;  %v7674_v24 = vpop.f32.mrb[39].mxu1 }
 0x547   : > { %v8088_v26 = vmax.f32 %v7960_v38, 0.0  ;;  %v8090_v2 = vmax.f32 %v7962_v49, 0.0  ;;  %v7964_v28 = vadd.f32 %v12735_v50, %v7481_v23  ;;  %v7966_v34 = vadd.f32 %v12731_v44, %v7674_v24 }
 0x548   : > { %v8161_v36 = vadd.f32 %v8160_v45, %v8087_v19  ;;  %v8235_v43 = vadd.f32 %v8234_v25, %v8089_v61  ;;  %v8091_v27 = vmax.f32 %v7963_v3, 0.0  ;;  %v8093_v32 = vmax.f32 %v7965_v22, 0.0 }
 0x549   : > { %v8198_v56 = vadd.f32 %v8197_v37, %v8088_v26  ;;  %v8272_v9 = vadd.f32 %v8271_v60, %v8090_v2  ;;  %v8092_v29 = vmax.f32 %v7964_v28, 0.0  ;;  %v8094_v13 = vmax.f32 %v7966_v34, 0.0 }
 0x54a   : > { %v8162_v48 = vadd.f32 %v8161_v36, %v8091_v27  ;;  %v8236_v14 = vadd.f32 %v8235_v43, %v8093_v32 }
 0x54b   : > { %v8199_v39 = vadd.f32 %v8198_v56, %v8092_v29  ;;  %v8273_v57 = vadd.f32 %v8272_v9, %v8094_v13  ;;  %v7485_v58 = vpop.f32.mrb[40].mxu0  ;;  %v7678_v8 = vpop.f32.mrb[40].mxu1 }
 0x54c   : > { %v7967_v20 = vadd.f32 %v12720_v63, %v7485_v58  ;;  %v7969_v10 = vadd.f32 %v12724_v41, %v7678_v8  ;;  %v7487_v53 = vpop.f32.mrb[41].mxu0  ;;  %v7680_v59 = vpop.f32.mrb[41].mxu1 }
 0x54d   : > { %v7968_v42 = vadd.f32 %v12735_v50, %v7487_v53  ;;  %v7970_v40 = vadd.f32 %v12731_v44, %v7680_v59  ;;  %v7489_v46 = vpop.f32.mrb[42].mxu0  ;;  %v7682_v47 = vpop.f32.mrb[42].mxu1 }
 0x54e   : > { %v8095_v30 = vmax.f32 %v7967_v20, 0.0  ;;  %v8097_v33 = vmax.f32 %v7969_v10, 0.0  ;;  %v7971_v51 = vadd.f32 %v12720_v63, %v7489_v46  ;;  %v7973_v0 = vadd.f32 %v12724_v41, %v7682_v47  ;;  %v7491_v52 = vpop.f32.mrb[43].mxu0  ;;  %v7684_v54 = vpop.f32.mrb[43].mxu1 }
 0x54f   : > { %v8096_v62 = vmax.f32 %v7968_v42, 0.0  ;;  %v8098_v1 = vmax.f32 %v7970_v40, 0.0  ;;  %v7972_v45 = vadd.f32 %v12735_v50, %v7491_v52  ;;  %v7974_v25 = vadd.f32 %v12731_v44, %v7684_v54 }
 0x550   : > { %v8163_v37 = vadd.f32 %v8162_v48, %v8095_v30  ;;  %v8237_v60 = vadd.f32 %v8236_v14, %v8097_v33  ;;  %v8099_v7 = vmax.f32 %v7971_v51, 0.0  ;;  %v8101_v11 = vmax.f32 %v7973_v0, 0.0 }
 0x551   : > { %v8200_v16 = vadd.f32 %v8199_v39, %v8096_v62  ;;  %v8274_v18 = vadd.f32 %v8273_v57, %v8098_v1  ;;  %v8100_v15 = vmax.f32 %v7972_v45, 0.0  ;;  %v8102_v31 = vmax.f32 %v7974_v25, 0.0 }
 0x552   : > { %v8164_v38 = vadd.f32 %v8163_v37, %v8099_v7  ;;  %v8238_v49 = vadd.f32 %v8237_v60, %v8101_v11 }
 0x553   : > { %v8201_v6 = vadd.f32 %v8200_v16, %v8100_v15  ;;  %v8275_v55 = vadd.f32 %v8274_v18, %v8102_v31  ;;  %v7495_v19 = vpop.f32.mrb[44].mxu0  ;;  %v7688_v61 = vpop.f32.mrb[44].mxu1 }
 0x554   : > { %v7975_v3 = vadd.f32 %v12720_v63, %v7495_v19  ;;  %v7977_v22 = vadd.f32 %v12724_v41, %v7688_v61  ;;  %v7497_v23 = vpop.f32.mrb[45].mxu0  ;;  %v7690_v24 = vpop.f32.mrb[45].mxu1 }
 0x555   : > { %v7976_v26 = vadd.f32 %v12735_v50, %v7497_v23  ;;  %v7978_v2 = vadd.f32 %v12731_v44, %v7690_v24  ;;  %v7499_v28 = vpop.f32.mrb[46].mxu0  ;;  %v7692_v34 = vpop.f32.mrb[46].mxu1 }
 0x556   : > { %v8103_v36 = vmax.f32 %v7975_v3, 0.0  ;;  %v8105_v43 = vmax.f32 %v7977_v22, 0.0  ;;  %v7979_v27 = vadd.f32 %v12720_v63, %v7499_v28  ;;  %v7981_v32 = vadd.f32 %v12724_v41, %v7692_v34  ;;  %v7501_v56 = vpop.f32.mrb[47].mxu0  ;;  %v7694_v9 = vpop.f32.mrb[47].mxu1 }
 0x557   : > { %v8104_v29 = vmax.f32 %v7976_v26, 0.0  ;;  %v8106_v13 = vmax.f32 %v7978_v2, 0.0  ;;  %v7980_v48 = vadd.f32 %v12735_v50, %v7501_v56  ;;  %v7982_v14 = vadd.f32 %v12731_v44, %v7694_v9 }
 0x558   : > { %v8165_v39 = vadd.f32 %v8164_v38, %v8103_v36  ;;  %v8239_v57 = vadd.f32 %v8238_v49, %v8105_v43  ;;  %v8107_v58 = vmax.f32 %v7979_v27, 0.0  ;;  %v8109_v8 = vmax.f32 %v7981_v32, 0.0 }
 0x559   : > { %v8202_v20 = vadd.f32 %v8201_v6, %v8104_v29  ;;  %v8276_v10 = vadd.f32 %v8275_v55, %v8106_v13  ;;  %v8108_v53 = vmax.f32 %v7980_v48, 0.0  ;;  %v8110_v59 = vmax.f32 %v7982_v14, 0.0 }
 0x55a   : > { %v8166_v42 = vadd.f32 %v8165_v39, %v8107_v58  ;;  %v8240_v40 = vadd.f32 %v8239_v57, %v8109_v8 }
 0x55b   : > { %v8203_v46 = vadd.f32 %v8202_v20, %v8108_v53  ;;  %v8277_v47 = vadd.f32 %v8276_v10, %v8110_v59  ;;  %v7505_v30 = vpop.f32.mrb[48].mxu0  ;;  %v7698_v33 = vpop.f32.mrb[48].mxu1 }
 0x55c   : > { %v7983_v51 = vadd.f32 %v12720_v63, %v7505_v30  ;;  %v7985_v0 = vadd.f32 %v12724_v41, %v7698_v33  ;;  %v7507_v52 = vpop.f32.mrb[49].mxu0  ;;  %v7700_v54 = vpop.f32.mrb[49].mxu1 }
 0x55d   : > { %v7984_v62 = vadd.f32 %v12735_v50, %v7507_v52  ;;  %v7986_v1 = vadd.f32 %v12731_v44, %v7700_v54  ;;  %v7509_v45 = vpop.f32.mrb[50].mxu0  ;;  %v7702_v25 = vpop.f32.mrb[50].mxu1 }
 0x55e   : > { %v8111_v37 = vmax.f32 %v7983_v51, 0.0  ;;  %v8113_v60 = vmax.f32 %v7985_v0, 0.0  ;;  %v7987_v7 = vadd.f32 %v12720_v63, %v7509_v45  ;;  %v7989_v11 = vadd.f32 %v12724_v41, %v7702_v25  ;;  %v7511_v16 = vpop.f32.mrb[51].mxu0  ;;  %v7704_v18 = vpop.f32.mrb[51].mxu1 }
 0x55f   : > { %v8112_v15 = vmax.f32 %v7984_v62, 0.0  ;;  %v8114_v31 = vmax.f32 %v7986_v1, 0.0  ;;  %v7988_v38 = vadd.f32 %v12735_v50, %v7511_v16  ;;  %v7990_v49 = vadd.f32 %v12731_v44, %v7704_v18 }
 0x560   : > { %v8167_v6 = vadd.f32 %v8166_v42, %v8111_v37  ;;  %v8241_v55 = vadd.f32 %v8240_v40, %v8113_v60  ;;  %v8115_v19 = vmax.f32 %v7987_v7, 0.0  ;;  %v8117_v61 = vmax.f32 %v7989_v11, 0.0 }
 0x561   : > { %v8204_v3 = vadd.f32 %v8203_v46, %v8112_v15  ;;  %v8278_v22 = vadd.f32 %v8277_v47, %v8114_v31  ;;  %v8116_v23 = vmax.f32 %v7988_v38, 0.0  ;;  %v8118_v24 = vmax.f32 %v7990_v49, 0.0 }
 0x562   : > { %v8168_v26 = vadd.f32 %v8167_v6, %v8115_v19  ;;  %v8242_v2 = vadd.f32 %v8241_v55, %v8117_v61 }
 0x563   : > { %v8205_v28 = vadd.f32 %v8204_v3, %v8116_v23  ;;  %v8279_v34 = vadd.f32 %v8278_v22, %v8118_v24  ;;  %v7515_v36 = vpop.f32.mrb[52].mxu0  ;;  %v7708_v43 = vpop.f32.mrb[52].mxu1 }
 0x564   : > { %v7991_v27 = vadd.f32 %v12720_v63, %v7515_v36  ;;  %v7993_v32 = vadd.f32 %v12724_v41, %v7708_v43  ;;  %v7517_v56 = vpop.f32.mrb[53].mxu0  ;;  %v7710_v9 = vpop.f32.mrb[53].mxu1 }
 0x565   : > { %v7992_v29 = vadd.f32 %v12735_v50, %v7517_v56  ;;  %v7994_v13 = vadd.f32 %v12731_v44, %v7710_v9  ;;  %v7519_v48 = vpop.f32.mrb[54].mxu0  ;;  %v7712_v14 = vpop.f32.mrb[54].mxu1 }
 0x566   : > { %v8119_v39 = vmax.f32 %v7991_v27, 0.0  ;;  %v8121_v57 = vmax.f32 %v7993_v32, 0.0  ;;  %v7995_v58 = vadd.f32 %v12720_v63, %v7519_v48  ;;  %v7997_v8 = vadd.f32 %v12724_v41, %v7712_v14  ;;  %v7521_v20 = vpop.f32.mrb[55].mxu0  ;;  %v7714_v10 = vpop.f32.mrb[55].mxu1 }
 0x567   : > { %v8120_v53 = vmax.f32 %v7992_v29, 0.0  ;;  %v8122_v59 = vmax.f32 %v7994_v13, 0.0  ;;  %v7996_v42 = vadd.f32 %v12735_v50, %v7521_v20  ;;  %v7998_v40 = vadd.f32 %v12731_v44, %v7714_v10 }
 0x568   : > { %v8169_v46 = vadd.f32 %v8168_v26, %v8119_v39  ;;  %v8243_v47 = vadd.f32 %v8242_v2, %v8121_v57  ;;  %v8123_v30 = vmax.f32 %v7995_v58, 0.0  ;;  %v8125_v33 = vmax.f32 %v7997_v8, 0.0 }
 0x569   : > { %v8206_v51 = vadd.f32 %v8205_v28, %v8120_v53  ;;  %v8280_v0 = vadd.f32 %v8279_v34, %v8122_v59  ;;  %v8124_v52 = vmax.f32 %v7996_v42, 0.0  ;;  %v8126_v54 = vmax.f32 %v7998_v40, 0.0 }
 0x56a   : > { %v8170_v62 = vadd.f32 %v8169_v46, %v8123_v30  ;;  %v8244_v1 = vadd.f32 %v8243_v47, %v8125_v33 }
 0x56b   : > { %v8207_v45 = vadd.f32 %v8206_v51, %v8124_v52  ;;  %v8281_v25 = vadd.f32 %v8280_v0, %v8126_v54  ;;  %v7525_v37 = vpop.f32.mrb[56].mxu0  ;;  %v7718_v60 = vpop.f32.mrb[56].mxu1 }
 0x56c   : > { %v7999_v7 = vadd.f32 %v12720_v63, %v7525_v37  ;;  %v8001_v11 = vadd.f32 %v12724_v41, %v7718_v60  ;;  %v7527_v16 = vpop.f32.mrb[57].mxu0  ;;  %v7720_v18 = vpop.f32.mrb[57].mxu1 }
 0x56d   : > { %v8000_v15 = vadd.f32 %v12735_v50, %v7527_v16  ;;  %v8002_v31 = vadd.f32 %v12731_v44, %v7720_v18  ;;  %v7529_v38 = vpop.f32.mrb[58].mxu0  ;;  %v7722_v49 = vpop.f32.mrb[58].mxu1 }
 0x56e   : > { %v8127_v6 = vmax.f32 %v7999_v7, 0.0  ;;  %v8129_v55 = vmax.f32 %v8001_v11, 0.0  ;;  %v8003_v19 = vadd.f32 %v12720_v63, %v7529_v38  ;;  %v8005_v61 = vadd.f32 %v12724_v41, %v7722_v49  ;;  %v7531_v3 = vpop.f32.mrb[59].mxu0  ;;  %v7724_v22 = vpop.f32.mrb[59].mxu1 }
 0x56f   : > { %v8128_v23 = vmax.f32 %v8000_v15, 0.0  ;;  %v8130_v24 = vmax.f32 %v8002_v31, 0.0  ;;  %v8004_v26 = vadd.f32 %v12735_v50, %v7531_v3  ;;  %v8006_v2 = vadd.f32 %v12731_v44, %v7724_v22 }
 0x570   : > { %v8171_v28 = vadd.f32 %v8170_v62, %v8127_v6  ;;  %v8245_v34 = vadd.f32 %v8244_v1, %v8129_v55  ;;  %v8131_v36 = vmax.f32 %v8003_v19, 0.0  ;;  %v8133_v43 = vmax.f32 %v8005_v61, 0.0 }
 0x571   : > { %v8208_v27 = vadd.f32 %v8207_v45, %v8128_v23  ;;  %v8282_v32 = vadd.f32 %v8281_v25, %v8130_v24  ;;  %v8132_v56 = vmax.f32 %v8004_v26, 0.0  ;;  %v8134_v9 = vmax.f32 %v8006_v2, 0.0 }
 0x572   : > { %v8172_v29 = vadd.f32 %v8171_v28, %v8131_v36  ;;  %v8246_v13 = vadd.f32 %v8245_v34, %v8133_v43 }
 0x573   : > { %v8209_v48 = vadd.f32 %v8208_v27, %v8132_v56  ;;  %v8283_v14 = vadd.f32 %v8282_v32, %v8134_v9  ;;  %v7535_v39 = vpop.f32.mrb[60].mxu0  ;;  %v7728_v57 = vpop.f32.mrb[60].mxu1 }
 0x574   : > { %v8007_v58 = vadd.f32 %v12720_v63, %v7535_v39  ;;  %v8009_v8 = vadd.f32 %v12724_v41, %v7728_v57  ;;  %v7537_v20 = vpop.f32.mrb[61].mxu0  ;;  %v7730_v10 = vpop.f32.mrb[61].mxu1 }
 0x575   : > { %v8008_v53 = vadd.f32 %v12735_v50, %v7537_v20  ;;  %v8010_v59 = vadd.f32 %v12731_v44, %v7730_v10  ;;  %v7539_v42 = vpop.f32.mrb[62].mxu0  ;;  %v7732_v40 = vpop.f32.mrb[62].mxu1 }
 0x576   : > { %v8135_v46 = vmax.f32 %v8007_v58, 0.0  ;;  %v8137_v47 = vmax.f32 %v8009_v8, 0.0  ;;  %v8011_v30 = vadd.f32 %v12720_v63, %v7539_v42  ;;  %v8013_v33 = vadd.f32 %v12724_v41, %v7732_v40  ;;  %v7541_v51 = vpop.f32.mrb[63].mxu0  ;;  %v7734_v0 = vpop.f32.mrb[63].mxu1 }
 0x577   : > { %v8136_v52 = vmax.f32 %v8008_v53, 0.0  ;;  %v8138_v54 = vmax.f32 %v8010_v59, 0.0  ;;  %v8012_v62 = vadd.f32 %v12735_v50, %v7541_v51  ;;  %v8014_v1 = vadd.f32 %v12731_v44, %v7734_v0  ;;  %v8143_v59 = vld [vmem:[#allocation2] sm:$0xf] }
 0x578   : > { %v8173_v45 = vadd.f32 %v8172_v29, %v8135_v46  ;;  %v8247_v25 = vadd.f32 %v8246_v13, %v8137_v47  ;;  %v8139_v37 = vmax.f32 %v8011_v30, 0.0  ;;  %v8141_v60 = vmax.f32 %v8013_v33, 0.0 }
 0x579   : > { %v8210_v7 = vadd.f32 %v8209_v48, %v8136_v52  ;;  %v8284_v11 = vadd.f32 %v8283_v14, %v8138_v54  ;;  %v8140_v16 = vmax.f32 %v8012_v62, 0.0  ;;  %v8142_v18 = vmax.f32 %v8014_v1, 0.0 }
 0x57a   : > { %v8174_v15 = vadd.f32 %v8173_v45, %v8139_v37  ;;  %v8248_v63 = vadd.f32 %v8247_v25, %v8141_v60  ;;  %v10888_v44 = vmov 1966171168  }
 0x57b   : > { %v8211_v31 = vadd.f32 %v8210_v7, %v8140_v16  ;;  %v8285_v41 = vadd.f32 %v8284_v11, %v8142_v18  ;;  %v8299_v3 = vunpack.c.l.s4 %v10888_v44 }
 0x57c   : > { %v8175_v38 = vrot.slane %v8174_v15, 4  ;;  %v8249_v49 = vrot.slane %v8248_v63, 4 }
 0x57d   : > { %v8212_v6 = vrot.slane %v8211_v31, 4  ;;  %v8286_v55 = vrot.slane %v8285_v41, 4  ;;  %v8300_v43 = vunpack.c.0.s8 %v8299_v3 }
 0x57e   : > { %v8176_v19 = vadd.f32 %v8175_v38, %v8174_v15  ;;  %v8250_v50 = vadd.f32 %v8249_v49, %v8248_v63 }
 0x57f   : > { %v8213_v61 = vadd.f32 %v8212_v6, %v8211_v31  ;;  %v8287_v22 = vadd.f32 %v8286_v55, %v8285_v41  ;;  %v8303_v39 = vsub.s32 %v8300_v43, %v10983_v5 }
 0x580   : > { %v8177_v23 = vrot.slane %v8176_v19, 2  ;;  %v8251_v24 = vrot.slane %v8250_v50, 2 }
 0x581   : > { %v8214_v26 = vrot.slane %v8213_v61, 2  ;;  %v8288_v2 = vrot.slane %v8287_v22, 2 }
 0x582   : > { %v8178_v28 = vadd.f32 %v8177_v23, %v8176_v19  ;;  %v8252_v34 = vadd.f32 %v8251_v24, %v8250_v50 }
 0x583   : > { %v8215_v36 = vadd.f32 %v8214_v26, %v8213_v61  ;;  %v8289_v27 = vadd.f32 %v8288_v2, %v8287_v22 }
 0x584   : > { %v8179_v32 = vrot.slane %v8178_v28, 1  ;;  %v8253_v56 = vrot.slane %v8252_v34, 1 }
 0x585   : > { %v8216_v9 = vrot.slane %v8215_v36, 1  ;;  %v8290_v29 = vrot.slane %v8289_v27, 1 }
 0x586   : > { %v8180_v13 = vadd.f32 %v8179_v32, %v8178_v28  ;;  %v8254_v48 = vadd.f32 %v8253_v56, %v8252_v34 }
 0x587   : > { %v8217_v14 = vadd.f32 %v8216_v9, %v8215_v36  ;;  %v8291_v57 = vadd.f32 %v8290_v29, %v8289_v27 }
 0x589   : > { %v8296_v58 = vcombine.low %v8180_v13, %v8217_v14  ;;  %v8297_v8 = vcombine.low %v8254_v48, %v8291_v57 }
 0x58b   : > { %v8304_v20 = vrot.slane %v8296_v58, %v8303_v39  ;;  %v8311_v10 = vrot.slane %v8297_v8, %v8303_v39 }
 0x58d   : > { %v8312_v53 = vcombine.low %v8304_v20, %v8311_v10 }
 0x58f   : > { %v8319_v42 = vrot.slane %v8312_v53, %v8303_v39 }
 0x591   : > { %v8321_v40 = vadd.f32 %v8319_v42, %v8143_v59 }
 0x593   : > { %8326 = vst.msk [vmem:[#allocation2] sm:$0xf] %vm12757_vm8, %v8321_v40 }
 0x59a   : > { %v8330_v46 = vld [vmem:[#allocation2] sm:$0xf] }
 0x59b   : > { %v8331_v47 = vmul.f32 0.00390625, %v8330_v46 }
 0x59d   : > { %v8340_v30 = vrot.slane %v8331_v47, %v7873_v12  ;;  %v8348_v33 = vrot.slane %v8331_v47, %v7881_v4  ;;  %v8336_v51 = vrot.slane %v8331_v47, %v7869_v21  ;;  %v8344_v0 = vrot.slane %v8331_v47, %v7877_v35  ;;  %v8421_v4 = vld [vmem:[%s12969_s4] sm:$0x1] }
 0x59f   : > { %v8354_v52 = vpack.c.bf16 %v8340_v30, %v8340_v30  ;;  %v8356_v54 = vpack.c.bf16 %v8348_v33, %v8348_v33  ;;  %v8353_v62 = vpack.c.bf16 %v8336_v51, %v8336_v51  ;;  %v8355_v17 = vpack.c.bf16 %v8344_v0, %v8344_v0 }
 0x5a1   : > { %8646 = vmatprep.mubr.bf16.mxu0 %v8354_v52  ;;  %8686 = vmatprep.mubr.bf16.mxu1 %v8356_v54 }
 0x5a2   : > { %8647 = vmatmul.mubr.bf16.vlgmr.msra.gmra.mrb[64].mxu0 %v8353_v62  ;;  %8687 = vmatmul.mubr.bf16.vlgmr.msra.gmra.mrb[64].mxu1 %v8355_v17 }
 0x675   : > { %v9600_v12 = vpop.f32.mrb[64].mxu0  ;;  %v9622_v1 = vpop.f32.mrb[64].mxu1 }
 0x676   : > { %v9601_v21 = vpop.f32.mrb[65].mxu0  ;;  %v9623_v45 = vpop.f32.mrb[65].mxu1 }
 0x677   : > { %v9602_v5 = vadd.f32 %v9601_v21, %v9600_v12  ;;  %v9624_v35 = vadd.f32 %v9623_v45, %v9622_v1  ;;  %v9603_v25 = vpop.f32.mrb[66].mxu0  ;;  %v9625_v37 = vpop.f32.mrb[66].mxu1 }
 0x678   : > { %v9604_v60 = vpop.f32.mrb[67].mxu0  ;;  %v9626_v7 = vpop.f32.mrb[67].mxu1 }
 0x679   : > { %v8649_v11 = vadd.f32 %v9602_v5, %v8421_v4 }
 0x67b   : > { %v8689_v16 = vadd.f32 %v9624_v35, %v8649_v11 }
 0x67d   : > { %8694 = vst [vmem:[%s228_s10] sm:$0x1] %v8689_v16 }
 0x67e   : > { %10818 = shalt.err (!%p10815_p5)
}
 0x67f   : > { %s10819_s25 = scalar_lea.hbm %s12918_s14, 16  ;;  %s10823_s7 = scalar_lea.hbm %s12970_s5, 32 }
 0x680   : > { %p10820_p6 = scmp.ne.s32.totalorder %s12918_s14, %s10819_s25  ;;  %p10824_p10 = scmp.lt.u32.totalorder %s12918_s14, %s12970_s5 }
 0x681   : > { %p10825_p11 = scmp.lt.u32.totalorder %s10823_s7, %s10819_s25  ;;  %p10827_p13 = scmp.lt.u32.totalorder %s10819_s25, %s12918_s14 }
 0x682   : > { %p10821_p7 = pnand %p10820_p6, %p10960_p4 }
 0x683   : > { %p10826_p12 = por %p10825_p11, %p10824_p10 }
 0x684   : > { %p10822_p9 = pneg %p10821_p7 }
 0x685   : > { %p10828_p0 = por %p10827_p13, %p10826_p12 }
 0x687   : > { %p10829_p1 = pnand %p10828_p0, %p10822_p9 }
 0x689   : > { %10832 = shalt.err (!%p10829_p1)
}
 0x68a   : > { %10653 = dma.vmem_to_hbm [thread:$0]  (%p10960_p4), %s12920_s11, 16, %s12918_s14, %s8696_s15  }
 0x68b PF: > { %p10659_p2 = scmp.ge.s32.totalorder %s10883_s23, 2  ;;  %s8720_s10 = sand.u32 1, %s10863_s18  }
 0x68c   : > { %s8721_s12 = scalar_lea.sflag [#allocation4], %s8720_s10 }
 0x68d   : > { %p10656_p3 = pnand %p10659_p2, %p10967_p8 }
 0x68f   : > { %10858 = dma.done.wait (!%p10656_p3), %s8721_s12, 16  }
 0x690   : > { %10860 = vsyncadd (!%p10656_p3), %s8721_s12, 4294967280  ;;  %s18_s23 = sadd.s32 1, %s10883_s23   ;;  %s12979_s18 = smov %s10867_s19 }
 0x691   : > { %p15_p5 = scmp.ge.s32.totalorder %s18_s23, 4   ;;  %s12980_s19 = smov %s10871_s20 }
 0x692   : > { %s12981_s20 = smov %s10973_s6  ;;  %s12982_s21 = smov %s10879_s22 }
 0x693   : > { %s12983_s22 = smov %s12985_s26  ;;  %17 = sbr.rel (!%p15_p5) target bundleno = 4 (0x4), region = 94 }
 0x69a   :  { %8725 = vsyncpa [#allocation4], 1 }
 0x69b   :  { %8727 = vsyncpa [#allocation4 + $0x1], 1 }

</bundles_post_ra>
